<compile_context>
chip_gen: v7x
topology: tpu7x:2x2x1
jax: 0.10.0
libtpu: 0.0.40
codegen_flags: <defaults>
</compile_context>

<pallas_src>
import functools
import math

import jax
import jax.numpy as jnp
import numpy as np
from jax.experimental import pallas as pl
from jax.experimental.pallas import tpu as pltpu

TM = 256          # node-row tile (output rows per grid step)
TK = 512          # reduction tile over source nodes for A_norm @ X
CP = 128          # padded channel width (lane-dense activations)
OUT_PAD = 128     # padded width of the 2-logit head output
NPAD_MULT = (TM * TK) // math.gcd(TM, TK)


# ----------------------------- activations ---------------------------------
def _apply_act(y, activation):
    if activation == "relu":
        return jnp.maximum(y, 0.0)
    if activation == "sigmoid":
        return jax.nn.sigmoid(y)
    if activation == "none":
        return y
    raise ValueError(f"unknown activation {activation}")


# ------------------------------ kernels -------------------------------------
def _input_stage_kernel(x_ref, wp_ref, bp_ref, w1_ref, b1_ref, w2_ref, b2_ref,
                        ni_ref, x0_ref, *, preproc_act, fc_act):
    # h  = preproc_act(x @ Wp + bp)      (f32)
    # ni = fc_act(h @ W1 + b1)  ;  x0 = fc_act(h @ W2 + b2)   (bf16 outputs)
    h = jnp.dot(x_ref[...], wp_ref[...], preferred_element_type=jnp.float32)
    h = _apply_act(h + bp_ref[...], preproc_act)
    hb = h.astype(jnp.bfloat16)
    ni = jnp.dot(hb, w1_ref[...], preferred_element_type=jnp.float32) + b1_ref[...]
    ni_ref[...] = _apply_act(ni, fc_act).astype(ni_ref.dtype)
    x0 = jnp.dot(hb, w2_ref[...], preferred_element_type=jnp.float32) + b2_ref[...]
    x0_ref[...] = _apply_act(x0, fc_act).astype(x0_ref.dtype)


def _gcn_layer_kernel(a_ref, x_ref, ni_ref, wg_ref, bg_ref,
                      wdt_ref, wdb_ref, bd_ref, *rest,
                      gcn_act, fc_act, fuse_head):
    # grid = (row tiles i [parallel], K tiles k [arbitrary, last])
    # acc[i] = sum_k A[i,k] @ X[k]        (bf16 operands, f32 accumulate)
    # finalize: h = gcn_act(acc @ Wg + bg)                      (transform fused)
    #           z = fc_act(ni @ Wd_top + h @ Wd_bot + bd)       (concat + dense fused)
    #           if last layer: logits = fc_act(ni@Wf1t + z@Wf1b + bf1) @ Wf2 + bf2
    if fuse_head:
        wf1t_ref, wf1b_ref, bf1_ref, wf2_ref, bf2_ref, o_ref, acc_ref = rest
    else:
        o_ref, acc_ref = rest

    k = pl.program_id(1)

    @pl.when(k == 0)
    def _init():
        acc_ref[...] = jnp.zeros_like(acc_ref)

    acc_ref[...] += jnp.dot(a_ref[...], x_ref[...],
                            preferred_element_type=jnp.float32)

    @pl.when(k == pl.num_programs(1) - 1)
    def _finalize():
        ax = acc_ref[...]                                            # f32 (A @ X)
        h = jnp.dot(ax.astype(jnp.bfloat16), wg_ref[...],
                    preferred_element_type=jnp.float32)
        h = _apply_act(h + bg_ref[...], gcn_act)                     # f32 epilogue
        z = jnp.dot(ni_ref[...], wdt_ref[...], preferred_element_type=jnp.float32)
        z = z + jnp.dot(h.astype(jnp.bfloat16), wdb_ref[...],
                        preferred_element_type=jnp.float32)
        z = _apply_act(z + bd_ref[...], fc_act)                      # f32 epilogue
        if fuse_head:
            u = jnp.dot(ni_ref[...], wf1t_ref[...],
                        preferred_element_type=jnp.float32)
            u = u + jnp.dot(z.astype(jnp.bfloat16), wf1b_ref[...],
                            preferred_element_type=jnp.float32)
            u = _apply_act(u + bf1_ref[...], fc_act)
            out = jnp.dot(u.astype(jnp.bfloat16), wf2_ref[...],
                          preferred_element_type=jnp.float32) + bf2_ref[...]
            o_ref[...] = out.astype(o_ref.dtype)                     # (TM, OUT_PAD) f32
        else:
            o_ref[...] = z.astype(o_ref.dtype)                       # (TM, CP) bf16


# ------------------------------ wrappers -------------------------------------
def pallas_input_stage(x, wp, bp, w1, b1, w2, b2, preproc_act, fc_act):
    n_pad = x.shape[0]
    row = pl.BlockSpec((TM, CP), lambda i: (i, 0))
    full = lambda s: pl.BlockSpec(s, lambda i: (0, 0))
    kernel = functools.partial(_input_stage_kernel,
                               preproc_act=preproc_act, fc_act=fc_act)
    return pl.pallas_call(
        kernel,
        out_shape=(jax.ShapeDtypeStruct((n_pad, CP), jnp.bfloat16),
                   jax.ShapeDtypeStruct((n_pad, CP), jnp.bfloat16)),
        grid=(n_pad // TM,),
        in_specs=[row,
                  full((CP, CP)), full((1, CP)),
                  full((CP, CP)), full((1, CP)),
                  full((CP, CP)), full((1, CP))],
        out_specs=(row, row),
        compiler_params=pltpu.CompilerParams(dimension_semantics=("parallel",)),
    )(x, wp, bp, w1, b1, w2, b2)


def pallas_gcn_layer(a_bf16, x_bf16, ni, wg, bg, wd_top, wd_bot, bd,
                     gcn_act, fc_act, head_weights=None):
    n_pad = a_bf16.shape[0]
    grid = (n_pad // TM, n_pad // TK)
    cw = lambda s: pl.BlockSpec(s, lambda i, k: (0, 0))     # constant weight blocks
    in_specs = [
        pl.BlockSpec((TM, TK), lambda i, k: (i, k)),        # A_norm tile (bf16)
        pl.BlockSpec((TK, CP), lambda i, k: (k, 0)),        # X tile, k-blocked (bf16)
        pl.BlockSpec((TM, CP), lambda i, k: (i, 0)),        # node_identity row tile (bf16)
        cw((CP, CP)), cw((1, CP)),                          # Wg, bg
        cw((CP, CP)), cw((CP, CP)), cw((1, CP)),            # Wd_top, Wd_bot, bd
    ]
    args = [a_bf16, x_bf16, ni, wg, bg, wd_top, wd_bot, bd]
    fuse_head = head_weights is not None
    if fuse_head:
        wf1t, wf1b, bf1, wf2, bf2 = head_weights
        in_specs += [cw((CP, CP)), cw((CP, CP)), cw((1, CP)),
                     cw((CP, OUT_PAD)), cw((1, OUT_PAD))]
        args += [wf1t, wf1b, bf1, wf2, bf2]
        out_shape = jax.ShapeDtypeStruct((n_pad, OUT_PAD), jnp.float32)
        out_specs = pl.BlockSpec((TM, OUT_PAD), lambda i, k: (i, 0))
    else:
        out_shape = jax.ShapeDtypeStruct((n_pad, CP), jnp.bfloat16)
        out_specs = pl.BlockSpec((TM, CP), lambda i, k: (i, 0))
    kernel = functools.partial(_gcn_layer_kernel, gcn_act=gcn_act, fc_act=fc_act,
                               fuse_head=fuse_head)
    return pl.pallas_call(
        kernel,
        out_shape=out_shape,
        grid=grid,
        in_specs=in_specs,
        out_specs=out_specs,
        scratch_shapes=[pltpu.VMEM((TM, CP), jnp.float32)],
        compiler_params=pltpu.CompilerParams(
            dimension_semantics=("parallel", "arbitrary")),
    )(*args)


# ------------------------------ glue -----------------------------------------
def _round_up(n, m):
    return ((n + m - 1) // m) * m


def build_norm_adj(edge_index, num_nodes, n_pad):
    """Dense D^{-1/2}(A+I)D^{-1/2}, bf16, zero-padded to (n_pad, n_pad)."""
    src = edge_index[0]
    dst = edge_index[1]
    loops = jnp.arange(num_nodes)
    src = jnp.concatenate([src, loops])
    dst = jnp.concatenate([dst, loops])
    a = jnp.zeros((n_pad, n_pad), jnp.float32).at[dst, src].add(1.0)
    deg = a.sum(axis=1)
    d_inv_sqrt = jnp.where(deg > 0, jax.lax.rsqrt(jnp.maximum(deg, 1e-12)), 0.0)
    a = d_inv_sqrt[:, None] * a * d_inv_sqrt[None, :]
    return a.astype(jnp.bfloat16)


def init_linear(key, fan_in, fan_out):
    """Deterministic nn.Linear-style init; W stored as (fan_in, fan_out)."""
    kw, kb = jax.random.split(key)
    bound = 1.0 / np.sqrt(fan_in)
    w = jax.random.uniform(kw, (fan_in, fan_out), jnp.float32, -bound, bound)
    b = jax.random.uniform(kb, (fan_out,), jnp.float32, -bound, bound)
    return w, b


def init_gcn_model(key, cfg):
    c_in = cfg["n_input_features"]
    c_pre = cfg["n_channels_preproc"]
    c = cfg["n_channels"]
    n_rep = 1 if cfg["tie_gnn_layers"] else cfg["n_gnn_layers"]
    keys = jax.random.split(key, 5 + 2 * n_rep)
    return {
        "preproc": init_linear(keys[0], c_in, c_pre),
        "fc_input_1": init_linear(keys[1], c_pre, c),
        "fc_input_2": init_linear(keys[2], c_pre, c),
        "final_fc1": init_linear(keys[3], 2 * c, c),
        "final_fc2": init_linear(keys[4], c, 2),
        "gcn": [init_linear(keys[5 + 2 * i], c, c) for i in range(n_rep)],
        "dense": [init_linear(keys[6 + 2 * i], 2 * c, c) for i in range(n_rep)],
    }


def _pad2(w, rows, cols):
    return jnp.zeros((rows, cols), jnp.float32).at[: w.shape[0], : w.shape[1]].set(w)


def _pad1(b, n):
    return jnp.zeros((1, n), jnp.float32).at[0, : b.shape[0]].set(b)


def prepare_kernel_weights(weights, cfg):
    """Zero-pad channel dims to CP (lane-dense), split 2C-wide dense/fc1 weights
    into top (node_identity) / bottom (x) halves for the fused concat, and cast
    matmul weight operands to bf16 (biases stay f32 for the f32 epilogue)."""
    c = cfg["n_channels"]
    assert cfg["n_channels"] <= CP
    assert cfg["n_channels_preproc"] <= CP
    assert cfg["n_input_features"] <= CP
    bf = jnp.bfloat16
    wp, bp = weights["preproc"]
    w1, b1 = weights["fc_input_1"]
    w2, b2 = weights["fc_input_2"]
    wf1, bf1 = weights["final_fc1"]
    wf2, bf2 = weights["final_fc2"]
    pw = {
        "wp": _pad2(wp, CP, CP), "bp": _pad1(bp, CP),
        "w1": _pad2(w1, CP, CP).astype(bf), "b1": _pad1(b1, CP),
        "w2": _pad2(w2, CP, CP).astype(bf), "b2": _pad1(b2, CP),
        "wf1_top": _pad2(wf1[:c], CP, CP).astype(bf),
        "wf1_bot": _pad2(wf1[c:], CP, CP).astype(bf),
        "bf1": _pad1(bf1, CP),
        "wf2": _pad2(wf2, CP, OUT_PAD).astype(bf), "bf2": _pad1(bf2, OUT_PAD),
        "wg": [], "bg": [], "wd_top": [], "wd_bot": [], "bd": [],
    }
    for (wg, bg), (wd, bd) in zip(weights["gcn"], weights["dense"]):
        pw["wg"].append(_pad2(wg, CP, CP).astype(bf))
        pw["bg"].append(_pad1(bg, CP))
        pw["wd_top"].append(_pad2(wd[:c], CP, CP).astype(bf))
        pw["wd_bot"].append(_pad2(wd[c:], CP, CP).astype(bf))
        pw["bd"].append(_pad1(bd, CP))
    return pw


def gcn_model_forward(cfg, weights, x, edge_index):
    # TODO(synk): dropout is eval-mode identity (training-mode dropout not implemented).
    fc_act = cfg["fully_connected_activation"]
    n_layers = cfg["n_gnn_layers"]
    assert n_layers >= 1  # head is fused into the last GNN layer's finalize
    n = x.shape[0]
    n_pad = int(_round_up(n, NPAD_MULT))

    a = build_norm_adj(edge_index, n, n_pad)                      # (n_pad, n_pad) bf16
    x_pad = jnp.zeros((n_pad, CP), jnp.float32).at[:n, : x.shape[1]].set(x)
    pw = prepare_kernel_weights(weights, cfg)

    ni, h = pallas_input_stage(x_pad, pw["wp"], pw["bp"], pw["w1"], pw["b1"],
                               pw["w2"], pw["b2"],
                               cfg["preproc_activation"], fc_act)
    for i in range(n_layers):
        li = 0 if cfg["tie_gnn_layers"] else i
        head = None
        if i == n_layers - 1:
            head = (pw["wf1_top"], pw["wf1_bot"], pw["bf1"], pw["wf2"], pw["bf2"])
        h = pallas_gcn_layer(a, h, ni, pw["wg"][li], pw["bg"][li],
                             pw["wd_top"][li], pw["wd_bot"][li], pw["bd"][li],
                             cfg["gcn_activation"], fc_act, head_weights=head)
    return h[:n, :2]


# -------------------------- pure-JAX reference --------------------------------
def gcn_model_reference(cfg, weights, x, edge_index):
    """Mirror of the module math with the same bf16 quantization points as the
    kernels (A, activations and weight matmul operands in bf16, f32 accumulate)."""
    bf = jnp.bfloat16
    f32 = jnp.float32
    fc_act = cfg["fully_connected_activation"]
    n = x.shape[0]
    a_bf = build_norm_adj(edge_index, n, n)                       # (n, n) bf16

    def lin_bf(h, w, b, act):
        z = jnp.dot(h.astype(bf), w.astype(bf), preferred_element_type=f32) + b
        return _apply_act(z, act)

    wp, bp = weights["preproc"]
    h = _apply_act(jnp.dot(x, wp, preferred_element_type=f32) + bp,
                   cfg["preproc_activation"])
    w1, b1 = weights["fc_input_1"]
    w2, b2 = weights["fc_input_2"]
    ni = lin_bf(h, w1, b1, fc_act).astype(bf).astype(f32)
    xx = lin_bf(h, w2, b2, fc_act).astype(bf).astype(f32)

    for i in range(cfg["n_gnn_layers"]):
        li = 0 if cfg["tie_gnn_layers"] else i
        wg, bg = weights["gcn"][li]
        wd, bd = weights["dense"][li]
        ax = jnp.dot(a_bf, xx.astype(bf), preferred_element_type=f32)
        hg = _apply_act(
            jnp.dot(ax.astype(bf), wg.astype(bf), preferred_element_type=f32) + bg,
            cfg["gcn_activation"])
        cat = jnp.concatenate([ni, hg], axis=1)
        xx = lin_bf(cat, wd, bd, fc_act).astype(bf).astype(f32)

    wf1, bf1 = weights["final_fc1"]
    wf2, bf2 = weights["final_fc2"]
    cat = jnp.concatenate([ni, xx], axis=1)
    u = lin_bf(cat, wf1, bf1, fc_act)
    return jnp.dot(u.astype(bf), wf2.astype(bf), preferred_element_type=f32) + bf2


# ------------------------------- main -----------------------------------------
if __name__ == "__main__":
    cfg = {
        "n_input_features": 16,
        "n_channels_preproc": 32,
        "n_channels": 32,
        "n_gnn_layers": 2,
        "tie_gnn_layers": True,
        "preproc_activation": "relu",
        "fully_connected_activation": "relu",
        "gcn_activation": "relu",
        "dropout_rate": 0.0,  # eval-mode identity
    }

    n_nodes, n_edges = 200, 400
    root = jax.random.PRNGKey(0)
    k_x, k_e, k_w = jax.random.split(root, 3)

    x = jax.random.normal(k_x, (n_nodes, cfg["n_input_features"]), jnp.float32)
    edge_index = jax.random.randint(k_e, (2, n_edges), 0, n_nodes, dtype=jnp.int32)
    weights = init_gcn_model(k_w, cfg)

    fwd = jax.jit(functools.partial(gcn_model_forward, cfg))
    out = jax.block_until_ready(fwd(weights, x, edge_index))

    ref = gcn_model_reference(cfg, weights, x, edge_index)
    np.testing.assert_allclose(np.asarray(out), np.asarray(ref), rtol=2e-2, atol=2e-2)
    assert out.shape == (n_nodes, 2)

    print("KERNEL_OK")
</pallas_src>

<mosaic_0001>
module attributes {stable_mosaic.version = 11 : i64} {
  func.func @_input_stage_kernel(%arg0: i32, %arg1: memref<256x128xf32, #tpu.memory_space<vmem>>, %arg2: memref<128x128xf32, #tpu.memory_space<vmem>>, %arg3: memref<1x128xf32, #tpu.memory_space<vmem>>, %arg4: memref<128x128xbf16, #tpu.memory_space<vmem>>, %arg5: memref<1x128xf32, #tpu.memory_space<vmem>>, %arg6: memref<128x128xbf16, #tpu.memory_space<vmem>>, %arg7: memref<1x128xf32, #tpu.memory_space<vmem>>, %arg8: memref<256x128xbf16, #tpu.memory_space<vmem>>, %arg9: memref<256x128xbf16, #tpu.memory_space<vmem>>) attributes {dimension_semantics = [#tpu.dimension_semantics<parallel>], iteration_bounds = array<i64: 2>, scalar_prefetch = 0 : i64, scratch_operands = 0 : i64, tpu.core_type = #tpu.core_type<tc>, window_params = [{transform_indices = @transform_0, window_bounds = array<i64: 256, 128>}, {pipeline_mode = #tpu.pipeline_mode<synchronous>, transform_indices = @transform_1, window_bounds = array<i64: 128, 128>}, {pipeline_mode = #tpu.pipeline_mode<synchronous>, transform_indices = @transform_2, window_bounds = array<i64: 1, 128>}, {pipeline_mode = #tpu.pipeline_mode<synchronous>, transform_indices = @transform_3, window_bounds = array<i64: 128, 128>}, {pipeline_mode = #tpu.pipeline_mode<synchronous>, transform_indices = @transform_4, window_bounds = array<i64: 1, 128>}, {pipeline_mode = #tpu.pipeline_mode<synchronous>, transform_indices = @transform_5, window_bounds = array<i64: 128, 128>}, {pipeline_mode = #tpu.pipeline_mode<synchronous>, transform_indices = @transform_6, window_bounds = array<i64: 1, 128>}, {transform_indices = @transform_7, window_bounds = array<i64: 256, 128>}, {transform_indices = @transform_8, window_bounds = array<i64: 256, 128>}]} {
    %c0 = arith.constant 0 : index
    %c0_0 = arith.constant 0 : index
    %0 = vector.load %arg1[%c0, %c0_0] : memref<256x128xf32, #tpu.memory_space<vmem>>, vector<256x128xf32>
    %c0_1 = arith.constant 0 : index
    %c0_2 = arith.constant 0 : index
    %1 = vector.load %arg2[%c0_1, %c0_2] : memref<128x128xf32, #tpu.memory_space<vmem>>, vector<128x128xf32>
    %cst = arith.constant dense<0.000000e+00> : vector<256x128xf32>
    %2 = tpu.matmul %0, %1, %cst {dimension_numbers = #tpu.dot_dimension_numbers<[1], [0], [0], [1], [0, 0, 1, 1], [], []>} : vector<256x128xf32>, vector<128x128xf32>, vector<256x128xf32> -> vector<256x128xf32>
    %c0_3 = arith.constant 0 : index
    %c0_4 = arith.constant 0 : index
    %3 = vector.load %arg3[%c0_3, %c0_4] : memref<1x128xf32, #tpu.memory_space<vmem>>, vector<1x128xf32>
    %4 = vector.broadcast %3 : vector<1x128xf32> to vector<256x128xf32>
    %5 = arith.addf %2, %4 : vector<256x128xf32>
    %cst_5 = arith.constant 0.000000e+00 : f32
    %6 = vector.broadcast %cst_5 : f32 to vector<256x128xf32>
    %7 = arith.maximumf %5, %6 : vector<256x128xf32>
    %8 = arith.truncf %7 : vector<256x128xf32> to vector<256x128xbf16>
    %c0_6 = arith.constant 0 : index
    %c0_7 = arith.constant 0 : index
    %9 = vector.load %arg4[%c0_6, %c0_7] : memref<128x128xbf16, #tpu.memory_space<vmem>>, vector<128x128xbf16>
    %cst_8 = arith.constant dense<0.000000e+00> : vector<256x128xf32>
    %10 = tpu.matmul %8, %9, %cst_8 {dimension_numbers = #tpu.dot_dimension_numbers<[1], [0], [0], [1], [0, 0, 1, 1], [], []>} : vector<256x128xbf16>, vector<128x128xbf16>, vector<256x128xf32> -> vector<256x128xf32>
    %c0_9 = arith.constant 0 : index
    %c0_10 = arith.constant 0 : index
    %11 = vector.load %arg5[%c0_9, %c0_10] : memref<1x128xf32, #tpu.memory_space<vmem>>, vector<1x128xf32>
    %12 = vector.broadcast %11 : vector<1x128xf32> to vector<256x128xf32>
    %13 = arith.addf %10, %12 : vector<256x128xf32>
    %cst_11 = arith.constant 0.000000e+00 : f32
    %14 = vector.broadcast %cst_11 : f32 to vector<256x128xf32>
    %15 = arith.maximumf %13, %14 : vector<256x128xf32>
    %16 = arith.truncf %15 : vector<256x128xf32> to vector<256x128xbf16>
    %c0_12 = arith.constant 0 : index
    %c0_13 = arith.constant 0 : index
    %17 = vector.load %arg8[%c0_12, %c0_13] : memref<256x128xbf16, #tpu.memory_space<vmem>>, vector<256x128xbf16>
    tpu.vector_store %arg8[%c0_12, %c0_13], %16 {strides = array<i32>} : memref<256x128xbf16, #tpu.memory_space<vmem>>, vector<256x128xbf16>,
    %c0_14 = arith.constant 0 : index
    %c0_15 = arith.constant 0 : index
    %18 = vector.load %arg6[%c0_14, %c0_15] : memref<128x128xbf16, #tpu.memory_space<vmem>>, vector<128x128xbf16>
    %cst_16 = arith.constant dense<0.000000e+00> : vector<256x128xf32>
    %19 = tpu.matmul %8, %18, %cst_16 {dimension_numbers = #tpu.dot_dimension_numbers<[1], [0], [0], [1], [0, 0, 1, 1], [], []>} : vector<256x128xbf16>, vector<128x128xbf16>, vector<256x128xf32> -> vector<256x128xf32>
    %c0_17 = arith.constant 0 : index
    %c0_18 = arith.constant 0 : index
    %20 = vector.load %arg7[%c0_17, %c0_18] : memref<1x128xf32, #tpu.memory_space<vmem>>, vector<1x128xf32>
    %21 = vector.broadcast %20 : vector<1x128xf32> to vector<256x128xf32>
    %22 = arith.addf %19, %21 : vector<256x128xf32>
    %cst_19 = arith.constant 0.000000e+00 : f32
    %23 = vector.broadcast %cst_19 : f32 to vector<256x128xf32>
    %24 = arith.maximumf %22, %23 : vector<256x128xf32>
    %25 = arith.truncf %24 : vector<256x128xf32> to vector<256x128xbf16>
    %c0_20 = arith.constant 0 : index
    %c0_21 = arith.constant 0 : index
    %26 = vector.load %arg9[%c0_20, %c0_21] : memref<256x128xbf16, #tpu.memory_space<vmem>>, vector<256x128xbf16>
    tpu.vector_store %arg9[%c0_20, %c0_21], %25 {strides = array<i32>} : memref<256x128xbf16, #tpu.memory_space<vmem>>, vector<256x128xbf16>,
    return
  }
  func.func @transform_0(%arg0: i32) -> (i32, i32) {
    %c0_i32 = arith.constant 0 : i32
    %c0_i32_0 = arith.constant 0 : i32
    return %arg0, %c0_i32 : i32, i32
  }
  func.func @transform_1(%arg0: i32) -> (i32, i32) {
    %c0_i32 = arith.constant 0 : i32
    %c0_i32_0 = arith.constant 0 : i32
    %c0_i32_1 = arith.constant 0 : i32
    return %c0_i32, %c0_i32_0 : i32, i32
  }
  func.func @transform_2(%arg0: i32) -> (i32, i32) {
    %c0_i32 = arith.constant 0 : i32
    %c0_i32_0 = arith.constant 0 : i32
    %c0_i32_1 = arith.constant 0 : i32
    return %c0_i32, %c0_i32_0 : i32, i32
  }
  func.func @transform_3(%arg0: i32) -> (i32, i32) {
    %c0_i32 = arith.constant 0 : i32
    %c0_i32_0 = arith.constant 0 : i32
    %c0_i32_1 = arith.constant 0 : i32
    return %c0_i32, %c0_i32_0 : i32, i32
  }
  func.func @transform_4(%arg0: i32) -> (i32, i32) {
    %c0_i32 = arith.constant 0 : i32
    %c0_i32_0 = arith.constant 0 : i32
    %c0_i32_1 = arith.constant 0 : i32
    return %c0_i32, %c0_i32_0 : i32, i32
  }
  func.func @transform_5(%arg0: i32) -> (i32, i32) {
    %c0_i32 = arith.constant 0 : i32
    %c0_i32_0 = arith.constant 0 : i32
    %c0_i32_1 = arith.constant 0 : i32
    return %c0_i32, %c0_i32_0 : i32, i32
  }
  func.func @transform_6(%arg0: i32) -> (i32, i32) {
    %c0_i32 = arith.constant 0 : i32
    %c0_i32_0 = arith.constant 0 : i32
    %c0_i32_1 = arith.constant 0 : i32
    return %c0_i32, %c0_i32_0 : i32, i32
  }
  func.func @transform_7(%arg0: i32) -> (i32, i32) {
    %c0_i32 = arith.constant 0 : i32
    %c0_i32_0 = arith.constant 0 : i32
    return %arg0, %c0_i32 : i32, i32
  }
  func.func @transform_8(%arg0: i32) -> (i32, i32) {
    %c0_i32 = arith.constant 0 : i32
    %c0_i32_0 = arith.constant 0 : i32
    return %arg0, %c0_i32 : i32, i32
  }
}

module attributes {stable_mosaic.version = 11 : i64} {
  func.func @_gcn_layer_kernel(%arg0: i32, %arg1: i32, %arg2: memref<256x512xbf16, #tpu.memory_space<vmem>>, %arg3: memref<512x128xbf16, #tpu.memory_space<vmem>>, %arg4: memref<256x128xbf16, #tpu.memory_space<vmem>>, %arg5: memref<128x128xbf16, #tpu.memory_space<vmem>>, %arg6: memref<1x128xf32, #tpu.memory_space<vmem>>, %arg7: memref<128x128xbf16, #tpu.memory_space<vmem>>, %arg8: memref<128x128xbf16, #tpu.memory_space<vmem>>, %arg9: memref<1x128xf32, #tpu.memory_space<vmem>>, %arg10: memref<256x128xbf16, #tpu.memory_space<vmem>>, %arg11: memref<256x128xf32, #tpu.memory_space<vmem>>) attributes {dimension_semantics = [#tpu.dimension_semantics<parallel>, #tpu.dimension_semantics<arbitrary>], iteration_bounds = array<i64: 2, 1>, scalar_prefetch = 0 : i64, scratch_operands = 1 : i64, tpu.core_type = #tpu.core_type<tc>, window_params = [{transform_indices = @transform_0, window_bounds = array<i64: 256, 512>}, {transform_indices = @transform_1, window_bounds = array<i64: 512, 128>}, {transform_indices = @transform_2, window_bounds = array<i64: 256, 128>}, {pipeline_mode = #tpu.pipeline_mode<synchronous>, transform_indices = @transform_3, window_bounds = array<i64: 128, 128>}, {pipeline_mode = #tpu.pipeline_mode<synchronous>, transform_indices = @transform_4, window_bounds = array<i64: 1, 128>}, {pipeline_mode = #tpu.pipeline_mode<synchronous>, transform_indices = @transform_5, window_bounds = array<i64: 128, 128>}, {pipeline_mode = #tpu.pipeline_mode<synchronous>, transform_indices = @transform_6, window_bounds = array<i64: 128, 128>}, {pipeline_mode = #tpu.pipeline_mode<synchronous>, transform_indices = @transform_7, window_bounds = array<i64: 1, 128>}, {transform_indices = @transform_8, window_bounds = array<i64: 256, 128>}]} {
    %c0_i32 = arith.constant 0 : i32
    %0 = arith.cmpi eq, %arg1, %c0_i32 : i32
    %1 = arith.extui %0 : i1 to i32
    %c0_i32_0 = arith.constant 0 : i32
    %2 = arith.cmpi ne, %1, %c0_i32_0 : i32
    scf.if %2 {
      %cst_10 = arith.constant 0.000000e+00 : f32
      %12 = vector.broadcast %cst_10 : f32 to vector<256x128xf32>
      %c0_11 = arith.constant 0 : index
      %c0_12 = arith.constant 0 : index
      %13 = vector.load %arg11[%c0_11, %c0_12] : memref<256x128xf32, #tpu.memory_space<vmem>>, vector<256x128xf32>
      tpu.vector_store %arg11[%c0_11, %c0_12], %12 {strides = array<i32>} : memref<256x128xf32, #tpu.memory_space<vmem>>, vector<256x128xf32>,
    } else {
    }
    %c0 = arith.constant 0 : index
    %c0_1 = arith.constant 0 : index
    %3 = vector.load %arg11[%c0, %c0_1] : memref<256x128xf32, #tpu.memory_space<vmem>>, vector<256x128xf32>
    %c0_2 = arith.constant 0 : index
    %c0_3 = arith.constant 0 : index
    %4 = vector.load %arg2[%c0_2, %c0_3] : memref<256x512xbf16, #tpu.memory_space<vmem>>, vector<256x512xbf16>
    %c0_4 = arith.constant 0 : index
    %c0_5 = arith.constant 0 : index
    %5 = vector.load %arg3[%c0_4, %c0_5] : memref<512x128xbf16, #tpu.memory_space<vmem>>, vector<512x128xbf16>
    %cst = arith.constant dense<0.000000e+00> : vector<256x128xf32>
    %6 = tpu.matmul %4, %5, %cst {dimension_numbers = #tpu.dot_dimension_numbers<[1], [0], [0], [1], [0, 0, 1, 1], [], []>} : vector<256x512xbf16>, vector<512x128xbf16>, vector<256x128xf32> -> vector<256x128xf32>
    %7 = arith.addf %3, %6 : vector<256x128xf32>
    %c0_6 = arith.constant 0 : index
    %c0_7 = arith.constant 0 : index
    %8 = vector.load %arg11[%c0_6, %c0_7] : memref<256x128xf32, #tpu.memory_space<vmem>>, vector<256x128xf32>
    tpu.vector_store %arg11[%c0_6, %c0_7], %7 {strides = array<i32>} : memref<256x128xf32, #tpu.memory_space<vmem>>, vector<256x128xf32>,
    %c0_i32_8 = arith.constant 0 : i32
    %9 = arith.cmpi eq, %arg1, %c0_i32_8 : i32
    %10 = arith.extui %9 : i1 to i32
    %c0_i32_9 = arith.constant 0 : i32
    %11 = arith.cmpi ne, %10, %c0_i32_9 : i32
    scf.if %11 {
      %c0_10 = arith.constant 0 : index
      %c0_11 = arith.constant 0 : index
      %12 = vector.load %arg11[%c0_10, %c0_11] : memref<256x128xf32, #tpu.memory_space<vmem>>, vector<256x128xf32>
      %13 = arith.truncf %12 : vector<256x128xf32> to vector<256x128xbf16>
      %c0_12 = arith.constant 0 : index
      %c0_13 = arith.constant 0 : index
      %14 = vector.load %arg5[%c0_12, %c0_13] : memref<128x128xbf16, #tpu.memory_space<vmem>>, vector<128x128xbf16>
      %cst_14 = arith.constant dense<0.000000e+00> : vector<256x128xf32>
      %15 = tpu.matmul %13, %14, %cst_14 {dimension_numbers = #tpu.dot_dimension_numbers<[1], [0], [0], [1], [0, 0, 1, 1], [], []>} : vector<256x128xbf16>, vector<128x128xbf16>, vector<256x128xf32> -> vector<256x128xf32>
      %c0_15 = arith.constant 0 : index
      %c0_16 = arith.constant 0 : index
      %16 = vector.load %arg6[%c0_15, %c0_16] : memref<1x128xf32, #tpu.memory_space<vmem>>, vector<1x128xf32>
      %17 = vector.broadcast %16 : vector<1x128xf32> to vector<256x128xf32>
      %18 = arith.addf %15, %17 : vector<256x128xf32>
      %cst_17 = arith.constant 0.000000e+00 : f32
      %19 = vector.broadcast %cst_17 : f32 to vector<256x128xf32>
      %20 = arith.maximumf %18, %19 : vector<256x128xf32>
      %c0_18 = arith.constant 0 : index
      %c0_19 = arith.constant 0 : index
      %21 = vector.load %arg4[%c0_18, %c0_19] : memref<256x128xbf16, #tpu.memory_space<vmem>>, vector<256x128xbf16>
      %c0_20 = arith.constant 0 : index
      %c0_21 = arith.constant 0 : index
      %22 = vector.load %arg7[%c0_20, %c0_21] : memref<128x128xbf16, #tpu.memory_space<vmem>>, vector<128x128xbf16>
      %cst_22 = arith.constant dense<0.000000e+00> : vector<256x128xf32>
      %23 = tpu.matmul %21, %22, %cst_22 {dimension_numbers = #tpu.dot_dimension_numbers<[1], [0], [0], [1], [0, 0, 1, 1], [], []>} : vector<256x128xbf16>, vector<128x128xbf16>, vector<256x128xf32> -> vector<256x128xf32>
      %24 = arith.truncf %20 : vector<256x128xf32> to vector<256x128xbf16>
      %c0_23 = arith.constant 0 : index
      %c0_24 = arith.constant 0 : index
      %25 = vector.load %arg8[%c0_23, %c0_24] : memref<128x128xbf16, #tpu.memory_space<vmem>>, vector<128x128xbf16>
      %cst_25 = arith.constant dense<0.000000e+00> : vector<256x128xf32>
      %26 = tpu.matmul %24, %25, %cst_25 {dimension_numbers = #tpu.dot_dimension_numbers<[1], [0], [0], [1], [0, 0, 1, 1], [], []>} : vector<256x128xbf16>, vector<128x128xbf16>, vector<256x128xf32> -> vector<256x128xf32>
      %27 = arith.addf %23, %26 : vector<256x128xf32>
      %c0_26 = arith.constant 0 : index
      %c0_27 = arith.constant 0 : index
      %28 = vector.load %arg9[%c0_26, %c0_27] : memref<1x128xf32, #tpu.memory_space<vmem>>, vector<1x128xf32>
      %29 = vector.broadcast %28 : vector<1x128xf32> to vector<256x128xf32>
      %30 = arith.addf %27, %29 : vector<256x128xf32>
      %cst_28 = arith.constant 0.000000e+00 : f32
      %31 = vector.broadcast %cst_28 : f32 to vector<256x128xf32>
      %32 = arith.maximumf %30, %31 : vector<256x128xf32>
      %33 = arith.truncf %32 : vector<256x128xf32> to vector<256x128xbf16>
      %c0_29 = arith.constant 0 : index
      %c0_30 = arith.constant 0 : index
      %34 = vector.load %arg10[%c0_29, %c0_30] : memref<256x128xbf16, #tpu.memory_space<vmem>>, vector<256x128xbf16>
      tpu.vector_store %arg10[%c0_29, %c0_30], %33 {strides = array<i32>} : memref<256x128xbf16, #tpu.memory_space<vmem>>, vector<256x128xbf16>,
    } else {
    }
    return
  }
  func.func @transform_0(%arg0: i32, %arg1: i32) -> (i32, i32) {
    %c0_i32 = arith.constant 0 : i32
    return %arg0, %arg1 : i32, i32
  }
  func.func @transform_1(%arg0: i32, %arg1: i32) -> (i32, i32) {
    %c0_i32 = arith.constant 0 : i32
    %c0_i32_0 = arith.constant 0 : i32
    return %arg1, %c0_i32 : i32, i32
  }
  func.func @transform_2(%arg0: i32, %arg1: i32) -> (i32, i32) {
    %c0_i32 = arith.constant 0 : i32
    %c0_i32_0 = arith.constant 0 : i32
    return %arg0, %c0_i32 : i32, i32
  }
  func.func @transform_3(%arg0: i32, %arg1: i32) -> (i32, i32) {
    %c0_i32 = arith.constant 0 : i32
    %c0_i32_0 = arith.constant 0 : i32
    %c0_i32_1 = arith.constant 0 : i32
    return %c0_i32, %c0_i32_0 : i32, i32
  }
  func.func @transform_4(%arg0: i32, %arg1: i32) -> (i32, i32) {
    %c0_i32 = arith.constant 0 : i32
    %c0_i32_0 = arith.constant 0 : i32
    %c0_i32_1 = arith.constant 0 : i32
    return %c0_i32, %c0_i32_0 : i32, i32
  }
  func.func @transform_5(%arg0: i32, %arg1: i32) -> (i32, i32) {
    %c0_i32 = arith.constant 0 : i32
    %c0_i32_0 = arith.constant 0 : i32
    %c0_i32_1 = arith.constant 0 : i32
    return %c0_i32, %c0_i32_0 : i32, i32
  }
  func.func @transform_6(%arg0: i32, %arg1: i32) -> (i32, i32) {
    %c0_i32 = arith.constant 0 : i32
    %c0_i32_0 = arith.constant 0 : i32
    %c0_i32_1 = arith.constant 0 : i32
    return %c0_i32, %c0_i32_0 : i32, i32
  }
  func.func @transform_7(%arg0: i32, %arg1: i32) -> (i32, i32) {
    %c0_i32 = arith.constant 0 : i32
    %c0_i32_0 = arith.constant 0 : i32
    %c0_i32_1 = arith.constant 0 : i32
    return %c0_i32, %c0_i32_0 : i32, i32
  }
  func.func @transform_8(%arg0: i32, %arg1: i32) -> (i32, i32) {
    %c0_i32 = arith.constant 0 : i32
    %c0_i32_0 = arith.constant 0 : i32
    return %arg0, %c0_i32 : i32, i32
  }
}

module attributes {stable_mosaic.version = 11 : i64} {
  func.func @_gcn_layer_kernel(%arg0: i32, %arg1: i32, %arg2: memref<256x512xbf16, #tpu.memory_space<vmem>>, %arg3: memref<512x128xbf16, #tpu.memory_space<vmem>>, %arg4: memref<256x128xbf16, #tpu.memory_space<vmem>>, %arg5: memref<128x128xbf16, #tpu.memory_space<vmem>>, %arg6: memref<1x128xf32, #tpu.memory_space<vmem>>, %arg7: memref<128x128xbf16, #tpu.memory_space<vmem>>, %arg8: memref<128x128xbf16, #tpu.memory_space<vmem>>, %arg9: memref<1x128xf32, #tpu.memory_space<vmem>>, %arg10: memref<128x128xbf16, #tpu.memory_space<vmem>>, %arg11: memref<128x128xbf16, #tpu.memory_space<vmem>>, %arg12: memref<1x128xf32, #tpu.memory_space<vmem>>, %arg13: memref<128x128xbf16, #tpu.memory_space<vmem>>, %arg14: memref<1x128xf32, #tpu.memory_space<vmem>>, %arg15: memref<256x128xf32, #tpu.memory_space<vmem>>, %arg16: memref<256x128xf32, #tpu.memory_space<vmem>>) attributes {dimension_semantics = [#tpu.dimension_semantics<parallel>, #tpu.dimension_semantics<arbitrary>], iteration_bounds = array<i64: 2, 1>, scalar_prefetch = 0 : i64, scratch_operands = 1 : i64, tpu.core_type = #tpu.core_type<tc>, window_params = [{transform_indices = @transform_0, window_bounds = array<i64: 256, 512>}, {transform_indices = @transform_1, window_bounds = array<i64: 512, 128>}, {transform_indices = @transform_2, window_bounds = array<i64: 256, 128>}, {pipeline_mode = #tpu.pipeline_mode<synchronous>, transform_indices = @transform_3, window_bounds = array<i64: 128, 128>}, {pipeline_mode = #tpu.pipeline_mode<synchronous>, transform_indices = @transform_4, window_bounds = array<i64: 1, 128>}, {pipeline_mode = #tpu.pipeline_mode<synchronous>, transform_indices = @transform_5, window_bounds = array<i64: 128, 128>}, {pipeline_mode = #tpu.pipeline_mode<synchronous>, transform_indices = @transform_6, window_bounds = array<i64: 128, 128>}, {pipeline_mode = #tpu.pipeline_mode<synchronous>, transform_indices = @transform_7, window_bounds = array<i64: 1, 128>}, {pipeline_mode = #tpu.pipeline_mode<synchronous>, transform_indices = @transform_8, window_bounds = array<i64: 128, 128>}, {pipeline_mode = #tpu.pipeline_mode<synchronous>, transform_indices = @transform_9, window_bounds = array<i64: 128, 128>}, {pipeline_mode = #tpu.pipeline_mode<synchronous>, transform_indices = @transform_10, window_bounds = array<i64: 1, 128>}, {pipeline_mode = #tpu.pipeline_mode<synchronous>, transform_indices = @transform_11, window_bounds = array<i64: 128, 128>}, {pipeline_mode = #tpu.pipeline_mode<synchronous>, transform_indices = @transform_12, window_bounds = array<i64: 1, 128>}, {transform_indices = @transform_13, window_bounds = array<i64: 256, 128>}]} {
    %c0_i32 = arith.constant 0 : i32
    %0 = arith.cmpi eq, %arg1, %c0_i32 : i32
    %1 = arith.extui %0 : i1 to i32
    %c0_i32_0 = arith.constant 0 : i32
    %2 = arith.cmpi ne, %1, %c0_i32_0 : i32
    scf.if %2 {
      %cst_10 = arith.constant 0.000000e+00 : f32
      %12 = vector.broadcast %cst_10 : f32 to vector<256x128xf32>
      %c0_11 = arith.constant 0 : index
      %c0_12 = arith.constant 0 : index
      %13 = vector.load %arg16[%c0_11, %c0_12] : memref<256x128xf32, #tpu.memory_space<vmem>>, vector<256x128xf32>
      tpu.vector_store %arg16[%c0_11, %c0_12], %12 {strides = array<i32>} : memref<256x128xf32, #tpu.memory_space<vmem>>, vector<256x128xf32>,
    } else {
    }
    %c0 = arith.constant 0 : index
    %c0_1 = arith.constant 0 : index
    %3 = vector.load %arg16[%c0, %c0_1] : memref<256x128xf32, #tpu.memory_space<vmem>>, vector<256x128xf32>
    %c0_2 = arith.constant 0 : index
    %c0_3 = arith.constant 0 : index
    %4 = vector.load %arg2[%c0_2, %c0_3] : memref<256x512xbf16, #tpu.memory_space<vmem>>, vector<256x512xbf16>
    %c0_4 = arith.constant 0 : index
    %c0_5 = arith.constant 0 : index
    %5 = vector.load %arg3[%c0_4, %c0_5] : memref<512x128xbf16, #tpu.memory_space<vmem>>, vector<512x128xbf16>
    %cst = arith.constant dense<0.000000e+00> : vector<256x128xf32>
    %6 = tpu.matmul %4, %5, %cst {dimension_numbers = #tpu.dot_dimension_numbers<[1], [0], [0], [1], [0, 0, 1, 1], [], []>} : vector<256x512xbf16>, vector<512x128xbf16>, vector<256x128xf32> -> vector<256x128xf32>
    %7 = arith.addf %3, %6 : vector<256x128xf32>
    %c0_6 = arith.constant 0 : index
    %c0_7 = arith.constant 0 : index
    %8 = vector.load %arg16[%c0_6, %c0_7] : memref<256x128xf32, #tpu.memory_space<vmem>>, vector<256x128xf32>
    tpu.vector_store %arg16[%c0_6, %c0_7], %7 {strides = array<i32>} : memref<256x128xf32, #tpu.memory_space<vmem>>, vector<256x128xf32>,
    %c0_i32_8 = arith.constant 0 : i32
    %9 = arith.cmpi eq, %arg1, %c0_i32_8 : i32
    %10 = arith.extui %9 : i1 to i32
    %c0_i32_9 = arith.constant 0 : i32
    %11 = arith.cmpi ne, %10, %c0_i32_9 : i32
    scf.if %11 {
      %c0_10 = arith.constant 0 : index
      %c0_11 = arith.constant 0 : index
      %12 = vector.load %arg16[%c0_10, %c0_11] : memref<256x128xf32, #tpu.memory_space<vmem>>, vector<256x128xf32>
      %13 = arith.truncf %12 : vector<256x128xf32> to vector<256x128xbf16>
      %c0_12 = arith.constant 0 : index
      %c0_13 = arith.constant 0 : index
      %14 = vector.load %arg5[%c0_12, %c0_13] : memref<128x128xbf16, #tpu.memory_space<vmem>>, vector<128x128xbf16>
      %cst_14 = arith.constant dense<0.000000e+00> : vector<256x128xf32>
      %15 = tpu.matmul %13, %14, %cst_14 {dimension_numbers = #tpu.dot_dimension_numbers<[1], [0], [0], [1], [0, 0, 1, 1], [], []>} : vector<256x128xbf16>, vector<128x128xbf16>, vector<256x128xf32> -> vector<256x128xf32>
      %c0_15 = arith.constant 0 : index
      %c0_16 = arith.constant 0 : index
      %16 = vector.load %arg6[%c0_15, %c0_16] : memref<1x128xf32, #tpu.memory_space<vmem>>, vector<1x128xf32>
      %17 = vector.broadcast %16 : vector<1x128xf32> to vector<256x128xf32>
      %18 = arith.addf %15, %17 : vector<256x128xf32>
      %cst_17 = arith.constant 0.000000e+00 : f32
      %19 = vector.broadcast %cst_17 : f32 to vector<256x128xf32>
      %20 = arith.maximumf %18, %19 : vector<256x128xf32>
      %c0_18 = arith.constant 0 : index
      %c0_19 = arith.constant 0 : index
      %21 = vector.load %arg4[%c0_18, %c0_19] : memref<256x128xbf16, #tpu.memory_space<vmem>>, vector<256x128xbf16>
      %c0_20 = arith.constant 0 : index
      %c0_21 = arith.constant 0 : index
      %22 = vector.load %arg7[%c0_20, %c0_21] : memref<128x128xbf16, #tpu.memory_space<vmem>>, vector<128x128xbf16>
      %cst_22 = arith.constant dense<0.000000e+00> : vector<256x128xf32>
      %23 = tpu.matmul %21, %22, %cst_22 {dimension_numbers = #tpu.dot_dimension_numbers<[1], [0], [0], [1], [0, 0, 1, 1], [], []>} : vector<256x128xbf16>, vector<128x128xbf16>, vector<256x128xf32> -> vector<256x128xf32>
      %24 = arith.truncf %20 : vector<256x128xf32> to vector<256x128xbf16>
      %c0_23 = arith.constant 0 : index
      %c0_24 = arith.constant 0 : index
      %25 = vector.load %arg8[%c0_23, %c0_24] : memref<128x128xbf16, #tpu.memory_space<vmem>>, vector<128x128xbf16>
      %cst_25 = arith.constant dense<0.000000e+00> : vector<256x128xf32>
      %26 = tpu.matmul %24, %25, %cst_25 {dimension_numbers = #tpu.dot_dimension_numbers<[1], [0], [0], [1], [0, 0, 1, 1], [], []>} : vector<256x128xbf16>, vector<128x128xbf16>, vector<256x128xf32> -> vector<256x128xf32>
      %27 = arith.addf %23, %26 : vector<256x128xf32>
      %c0_26 = arith.constant 0 : index
      %c0_27 = arith.constant 0 : index
      %28 = vector.load %arg9[%c0_26, %c0_27] : memref<1x128xf32, #tpu.memory_space<vmem>>, vector<1x128xf32>
      %29 = vector.broadcast %28 : vector<1x128xf32> to vector<256x128xf32>
      %30 = arith.addf %27, %29 : vector<256x128xf32>
      %cst_28 = arith.constant 0.000000e+00 : f32
      %31 = vector.broadcast %cst_28 : f32 to vector<256x128xf32>
      %32 = arith.maximumf %30, %31 : vector<256x128xf32>
      %c0_29 = arith.constant 0 : index
      %c0_30 = arith.constant 0 : index
      %33 = vector.load %arg4[%c0_29, %c0_30] : memref<256x128xbf16, #tpu.memory_space<vmem>>, vector<256x128xbf16>
      %c0_31 = arith.constant 0 : index
      %c0_32 = arith.constant 0 : index
      %34 = vector.load %arg10[%c0_31, %c0_32] : memref<128x128xbf16, #tpu.memory_space<vmem>>, vector<128x128xbf16>
      %cst_33 = arith.constant dense<0.000000e+00> : vector<256x128xf32>
      %35 = tpu.matmul %33, %34, %cst_33 {dimension_numbers = #tpu.dot_dimension_numbers<[1], [0], [0], [1], [0, 0, 1, 1], [], []>} : vector<256x128xbf16>, vector<128x128xbf16>, vector<256x128xf32> -> vector<256x128xf32>
      %36 = arith.truncf %32 : vector<256x128xf32> to vector<256x128xbf16>
      %c0_34 = arith.constant 0 : index
      %c0_35 = arith.constant 0 : index
      %37 = vector.load %arg11[%c0_34, %c0_35] : memref<128x128xbf16, #tpu.memory_space<vmem>>, vector<128x128xbf16>
      %cst_36 = arith.constant dense<0.000000e+00> : vector<256x128xf32>
      %38 = tpu.matmul %36, %37, %cst_36 {dimension_numbers = #tpu.dot_dimension_numbers<[1], [0], [0], [1], [0, 0, 1, 1], [], []>} : vector<256x128xbf16>, vector<128x128xbf16>, vector<256x128xf32> -> vector<256x128xf32>
      %39 = arith.addf %35, %38 : vector<256x128xf32>
      %c0_37 = arith.constant 0 : index
      %c0_38 = arith.constant 0 : index
      %40 = vector.load %arg12[%c0_37, %c0_38] : memref<1x128xf32, #tpu.memory_space<vmem>>, vector<1x128xf32>
      %41 = vector.broadcast %40 : vector<1x128xf32> to vector<256x128xf32>
      %42 = arith.addf %39, %41 : vector<256x128xf32>
      %cst_39 = arith.constant 0.000000e+00 : f32
      %43 = vector.broadcast %cst_39 : f32 to vector<256x128xf32>
      %44 = arith.maximumf %42, %43 : vector<256x128xf32>
      %45 = arith.truncf %44 : vector<256x128xf32> to vector<256x128xbf16>
      %c0_40 = arith.constant 0 : index
      %c0_41 = arith.constant 0 : index
      %46 = vector.load %arg13[%c0_40, %c0_41] : memref<128x128xbf16, #tpu.memory_space<vmem>>, vector<128x128xbf16>
      %cst_42 = arith.constant dense<0.000000e+00> : vector<256x128xf32>
      %47 = tpu.matmul %45, %46, %cst_42 {dimension_numbers = #tpu.dot_dimension_numbers<[1], [0], [0], [1], [0, 0, 1, 1], [], []>} : vector<256x128xbf16>, vector<128x128xbf16>, vector<256x128xf32> -> vector<256x128xf32>
      %c0_43 = arith.constant 0 : index
      %c0_44 = arith.constant 0 : index
      %48 = vector.load %arg14[%c0_43, %c0_44] : memref<1x128xf32, #tpu.memory_space<vmem>>, vector<1x128xf32>
      %49 = vector.broadcast %48 : vector<1x128xf32> to vector<256x128xf32>
      %50 = arith.addf %47, %49 : vector<256x128xf32>
      %c0_45 = arith.constant 0 : index
      %c0_46 = arith.constant 0 : index
      %51 = vector.load %arg15[%c0_45, %c0_46] : memref<256x128xf32, #tpu.memory_space<vmem>>, vector<256x128xf32>
      tpu.vector_store %arg15[%c0_45, %c0_46], %50 {strides = array<i32>} : memref<256x128xf32, #tpu.memory_space<vmem>>, vector<256x128xf32>,
    } else {
    }
    return
  }
  func.func @transform_0(%arg0: i32, %arg1: i32) -> (i32, i32) {
    %c0_i32 = arith.constant 0 : i32
    return %arg0, %arg1 : i32, i32
  }
  func.func @transform_1(%arg0: i32, %arg1: i32) -> (i32, i32) {
    %c0_i32 = arith.constant 0 : i32
    %c0_i32_0 = arith.constant 0 : i32
    return %arg1, %c0_i32 : i32, i32
  }
  func.func @transform_2(%arg0: i32, %arg1: i32) -> (i32, i32) {
    %c0_i32 = arith.constant 0 : i32
    %c0_i32_0 = arith.constant 0 : i32
    return %arg0, %c0_i32 : i32, i32
  }
  func.func @transform_3(%arg0: i32, %arg1: i32) -> (i32, i32) {
    %c0_i32 = arith.constant 0 : i32
    %c0_i32_0 = arith.constant 0 : i32
    %c0_i32_1 = arith.constant 0 : i32
    return %c0_i32, %c0_i32_0 : i32, i32
  }
  func.func @transform_4(%arg0: i32, %arg1: i32) -> (i32, i32) {
    %c0_i32 = arith.constant 0 : i32
    %c0_i32_0 = arith.constant 0 : i32
    %c0_i32_1 = arith.constant 0 : i32
    return %c0_i32, %c0_i32_0 : i32, i32
  }
  func.func @transform_5(%arg0: i32, %arg1: i32) -> (i32, i32) {
    %c0_i32 = arith.constant 0 : i32
    %c0_i32_0 = arith.constant 0 : i32
    %c0_i32_1 = arith.constant 0 : i32
    return %c0_i32, %c0_i32_0 : i32, i32
  }
  func.func @transform_6(%arg0: i32, %arg1: i32) -> (i32, i32) {
    %c0_i32 = arith.constant 0 : i32
    %c0_i32_0 = arith.constant 0 : i32
    %c0_i32_1 = arith.constant 0 : i32
    return %c0_i32, %c0_i32_0 : i32, i32
  }
  func.func @transform_7(%arg0: i32, %arg1: i32) -> (i32, i32) {
    %c0_i32 = arith.constant 0 : i32
    %c0_i32_0 = arith.constant 0 : i32
    %c0_i32_1 = arith.constant 0 : i32
    return %c0_i32, %c0_i32_0 : i32, i32
  }
  func.func @transform_8(%arg0: i32, %arg1: i32) -> (i32, i32) {
    %c0_i32 = arith.constant 0 : i32
    %c0_i32_0 = arith.constant 0 : i32
    %c0_i32_1 = arith.constant 0 : i32
    return %c0_i32, %c0_i32_0 : i32, i32
  }
  func.func @transform_9(%arg0: i32, %arg1: i32) -> (i32, i32) {
    %c0_i32 = arith.constant 0 : i32
    %c0_i32_0 = arith.constant 0 : i32
    %c0_i32_1 = arith.constant 0 : i32
    return %c0_i32, %c0_i32_0 : i32, i32
  }
  func.func @transform_10(%arg0: i32, %arg1: i32) -> (i32, i32) {
    %c0_i32 = arith.constant 0 : i32
    %c0_i32_0 = arith.constant 0 : i32
    %c0_i32_1 = arith.constant 0 : i32
    return %c0_i32, %c0_i32_0 : i32, i32
  }
  func.func @transform_11(%arg0: i32, %arg1: i32) -> (i32, i32) {
    %c0_i32 = arith.constant 0 : i32
    %c0_i32_0 = arith.constant 0 : i32
    %c0_i32_1 = arith.constant 0 : i32
    return %c0_i32, %c0_i32_0 : i32, i32
  }
  func.func @transform_12(%arg0: i32, %arg1: i32) -> (i32, i32) {
    %c0_i32 = arith.constant 0 : i32
    %c0_i32_0 = arith.constant 0 : i32
    %c0_i32_1 = arith.constant 0 : i32
    return %c0_i32, %c0_i32_0 : i32, i32
  }
  func.func @transform_13(%arg0: i32, %arg1: i32) -> (i32, i32) {
    %c0_i32 = arith.constant 0 : i32
    %c0_i32_0 = arith.constant 0 : i32
    return %arg0, %c0_i32 : i32, i32
  }
}

</mosaic_0001>

<bundles_post_ra>
// kernel: gcn_model_forward.3
= control target key start
LH: loop header
LB: loop body
LE: loop exit
PB: predicated region body
PF: predicated region fallthrough
CT: control target
= control target key end

     0   :  { %s2337_s27 = smov 0   ;;  %s2654_s0 = inlined_call_operand.vmem [shape: f32[512,128], index: 0, kind: input, shape index: {}]   ;;  %s2655_s1 = inlined_call_operand.vmem [shape: f32[128,128], index: 1, kind: input, shape index: {}]   ;;  %s2656_s2 = inlined_call_operand.vmem [shape: f32[1,128], index: 2, kind: input, shape index: {}]   ;;  %s2657_s3 = inlined_call_operand.vmem [shape: bf16[128,128], index: 3, kind: input, shape index: {}]   ;;  %s2658_s4 = inlined_call_operand.vmem [shape: f32[1,128], index: 4, kind: input, shape index: {}]   ;;  %s2659_s5 = inlined_call_operand.vmem [shape: bf16[128,128], index: 5, kind: input, shape index: {}]   ;;  %s2660_s6 = inlined_call_operand.vmem [shape: f32[1,128], index: 6, kind: input, shape index: {}]   ;;  %s2661_s7 = inlined_call_operand.vmem [shape: bf16[512,128], index: 7, kind: output, shape index: {0}]   ;;  %s2662_s8 = inlined_call_operand.vmem [shape: bf16[512,128], index: 8, kind: output, shape index: {1}]  }
   0x1 LB: > { %s1590_s28 = sadd.s32 4294967295, %s2290_s27   ;;  %p1594_p0 = scmp.ge.s32.totalorder %s2290_s27, 1  ;;  %s2290_s27 = sphi %s2337_s27, %s19_s27  }
   0x2   : > { %p266_p1 = scmp.lt.s32.totalorder %s2290_s27, 3 }
   0x4   : > { %p267_p2 = pnand %p1594_p0, %p266_p1 }
   0x5   : > { %v356_v0 = vld [vmem:[%s2655_s1] sm:$0xff] (!%p267_p2)  ;;  %v357_v1 = vld [vmem:[%s2655_s1 + $0x8] sm:$0xff] (!%p267_p2)  ;;  %v358_v2 = vld [vmem:[%s2655_s1 + $0x10] sm:$0xff] (!%p267_p2)  ;;  %s1595_s13 = sshll.u32 (!%p267_p2), %s1590_s28, 5 }
   0x6   : > { %270 = sbr.rel (%p267_p2) target bundleno = 541 (0x21d), region = 48  ;;  %v2212_v3 = vpack.c.bf16 (!%p267_p2), %v357_v1, %v356_v0  ;;  %v359_v4 = vld [vmem:[%s2655_s1 + $0x18] sm:$0xff] (!%p267_p2)  ;;  %p306_p3 = scmp.lt.s32.totalorder (!%p267_p2), %s1595_s13, 63  ;;  %v360_v6 = vld [vmem:[%s2655_s1 + $0x20] sm:$0xff] (!%p267_p2)  ;;  %v361_v7 = vld [vmem:[%s2655_s1 + $0x28] sm:$0xff] (!%p267_p2) }
   0x7   : > { %v2216_v5 = vpack.c.bf16 (!%p267_p2), %v359_v4, %v358_v2  ;;  %v2220_v8 = vpack.c.bf16 (!%p267_p2), %v361_v7, %v360_v6  ;;  %v362_v9 = vld [vmem:[%s2655_s1 + $0x30] sm:$0xff] (!%p267_p2)  ;;  %v363_v10 = vld [vmem:[%s2655_s1 + $0x38] sm:$0xff] (!%p267_p2)  ;;  %v364_v13 = vld [vmem:[%s2655_s1 + $0x40] sm:$0xff] (!%p267_p2) }
   0x8   : > { %2213 = vmatprep.subr.bf16.mxu0 (!%p267_p2), %v2212_v3  ;;  %2244 = vmatprep.subr.bf16.mxu1 (!%p267_p2), %v2212_v3  ;;  %v2224_v12 = vpack.c.bf16 (!%p267_p2), %v363_v10, %v362_v9  ;;  %v365_v14 = vld [vmem:[%s2655_s1 + $0x48] sm:$0xff] (!%p267_p2)  ;;  %v366_v17 = vld [vmem:[%s2655_s1 + $0x50] sm:$0xff] (!%p267_p2)  ;;  %v367_v18 = vld [vmem:[%s2655_s1 + $0x58] sm:$0xff] (!%p267_p2) }
   0x9   : > { %2215 = vmatpush3.bf16.msra.mxu0 (!%p267_p2), %v2212_v3  ;;  %2252 = vmatpush3.bf16.msra.mxu1 (!%p267_p2), %v2212_v3  ;;  %v2228_v16 = vpack.c.bf16 (!%p267_p2), %v365_v14, %v364_v13  ;;  %v2232_v19 = vpack.c.bf16 (!%p267_p2), %v367_v18, %v366_v17  ;;  %v368_v20 = vld [vmem:[%s2655_s1 + $0x60] sm:$0xff] (!%p267_p2)  ;;  %v369_v21 = vld [vmem:[%s2655_s1 + $0x68] sm:$0xff] (!%p267_p2)  ;;  %v370_v23 = vld [vmem:[%s2655_s1 + $0x70] sm:$0xff] (!%p267_p2) }
   0xa   : > { %2217 = vmatprep.subr.bf16.mxu0 (!%p267_p2), %v2216_v5  ;;  %2245 = vmatprep.subr.bf16.mxu1 (!%p267_p2), %v2216_v5  ;;  %v2236_v22 = vpack.c.bf16 (!%p267_p2), %v369_v21, %v368_v20  ;;  %v371_v24 = vld [vmem:[%s2655_s1 + $0x78] sm:$0xff] (!%p267_p2)  ;;  %v2269_v26 = vld [vmem:[%s2659_s5] sm:$0xff] (!%p267_p2)   ;;  %v2270_v32 = vld [vmem:[%s2657_s3 + $0x8] sm:$0xff] (!%p267_p2)  }
   0xb   : > { %v2240_v25 = vpack.c.bf16 (!%p267_p2), %v371_v24, %v370_v23  ;;  %v2268_v27 = vld [vmem:[%s2657_s3] sm:$0xff] (!%p267_p2)   ;;  %v2271_v33 = vld [vmem:[%s2659_s5 + $0x8] sm:$0xff] (!%p267_p2)   ;;  %v2272_v38 = vld [vmem:[%s2657_s3 + $0x10] sm:$0xff] (!%p267_p2)  }
   0xc   : > { %v2273_v39 = vld [vmem:[%s2659_s5 + $0x10] sm:$0xff] (!%p267_p2)   ;;  %v2274_v44 = vld [vmem:[%s2657_s3 + $0x18] sm:$0xff] (!%p267_p2)   ;;  %v2276_v50 = vld [vmem:[%s2657_s3 + $0x20] sm:$0xff] (!%p267_p2)  }
   0xd   : > { %s2664_s13 = smov (!%p306_p3, %s1595_s13), 63  ;;  %2219 = vmatpush3.bf16.msra.mxu0 %v2216_v5  ;;  %2253 = vmatpush3.bf16.msra.mxu1 %v2216_v5  ;;  %v2275_v45 = vld [vmem:[%s2659_s5 + $0x18] sm:$0xff]   ;;  %v2277_v51 = vld [vmem:[%s2659_s5 + $0x20] sm:$0xff]   ;;  %v2278_v56 = vld [vmem:[%s2657_s3 + $0x28] sm:$0xff]  }
   0xe   : > { %s1596_s22 = sshll.u32 %s2664_s13, 3  ;;  %2221 = vmatprep.subr.bf16.mxu0 %v2220_v8  ;;  %2246 = vmatprep.subr.bf16.mxu1 %v2220_v8  ;;  %v2279_v57 = vld [vmem:[%s2659_s5 + $0x28] sm:$0xff]   ;;  %v2280_v4 = vld [vmem:[%s2657_s3 + $0x30] sm:$0xff]   ;;  %v2282_v6 = vld [vmem:[%s2657_s3 + $0x38] sm:$0xff]   ;;  %s1598_s23 = sshll.u32 %s2664_s13, 2 }
   0xf   : > { %s2375_s28 = scalar_lea.vmem %s2654_s0, %s1596_s22  ;;  %v2281_v5 = vld [vmem:[%s2659_s5 + $0x30] sm:$0xff]   ;;  %v2283_v7 = vld [vmem:[%s2659_s5 + $0x38] sm:$0xff]   ;;  %s2556_s13 = scalar_lea.vmem %s2661_s7, %s1598_s23 }
  0x10   : > { %v324_v11 = vld [vmem:[%s2375_s28] sm:$0xff]  ;;  %v325_v28 = vld [vmem:[%s2375_s28 + $0x8] sm:$0xff]  ;;  %v326_v29 = vld [vmem:[%s2375_s28 + $0x10] sm:$0xff]  ;;  %s2561_s30 = scalar_lea.vmem %s2662_s8, %s1598_s23 }
  0x11   : > { %2068 = vmatprep.mubr.f32.mxu0 %v324_v11  ;;  %2223 = vmatpush3.bf16.msra.mxu0 %v2220_v8  ;;  %v340_v15 = vld [vmem:[%s2375_s28 + $0x80] sm:$0xff]  ;;  %v341_v30 = vld [vmem:[%s2375_s28 + $0x88] sm:$0xff]  ;;  %v342_v31 = vld [vmem:[%s2375_s28 + $0x90] sm:$0xff] }
  0x12   : > { %2225 = vmatprep.subr.bf16.mxu0 %v2224_v12  ;;  %2254 = vmatpush3.bf16.msra.mxu1 %v2220_v8  ;;  %v327_v34 = vld [vmem:[%s2375_s28 + $0x18] sm:$0xff]  ;;  %v328_v35 = vld [vmem:[%s2375_s28 + $0x20] sm:$0xff]  ;;  %v329_v40 = vld [vmem:[%s2375_s28 + $0x28] sm:$0xff] }
  0x13   : > { %2247 = vmatprep.subr.bf16.mxu1 %v2224_v12  ;;  %2092 = vmatprep.mubr.f32.mxu1 %v340_v15  ;;  %v343_v36 = vld [vmem:[%s2375_s28 + $0x98] sm:$0xff]  ;;  %v344_v37 = vld [vmem:[%s2375_s28 + $0xa0] sm:$0xff]  ;;  %v330_v41 = vld [vmem:[%s2375_s28 + $0x30] sm:$0xff] }
  0x14   : > { %v345_v42 = vld [vmem:[%s2375_s28 + $0xa8] sm:$0xff]  ;;  %v346_v43 = vld [vmem:[%s2375_s28 + $0xb0] sm:$0xff]  ;;  %v331_v46 = vld [vmem:[%s2375_s28 + $0x38] sm:$0xff] }
  0x15   : > { %2227 = vmatpush3.bf16.msra.mxu0 %v2224_v12  ;;  %v332_v47 = vld [vmem:[%s2375_s28 + $0x40] sm:$0xff]  ;;  %v347_v48 = vld [vmem:[%s2375_s28 + $0xb8] sm:$0xff]  ;;  %v333_v52 = vld [vmem:[%s2375_s28 + $0x48] sm:$0xff] }
  0x16   : > { %2229 = vmatprep.subr.bf16.mxu0 %v2228_v16  ;;  %2255 = vmatpush3.bf16.msra.mxu1 %v2224_v12  ;;  %v348_v49 = vld [vmem:[%s2375_s28 + $0xc0] sm:$0xff]  ;;  %v334_v53 = vld [vmem:[%s2375_s28 + $0x50] sm:$0xff]  ;;  %v349_v54 = vld [vmem:[%s2375_s28 + $0xc8] sm:$0xff] }
  0x17   : > { %2248 = vmatprep.subr.bf16.mxu1 %v2228_v16  ;;  %v350_v55 = vld [vmem:[%s2375_s28 + $0xd0] sm:$0xff]  ;;  %v335_v58 = vld [vmem:[%s2375_s28 + $0x58] sm:$0xff]  ;;  %v336_v59 = vld [vmem:[%s2375_s28 + $0x60] sm:$0xff] }
  0x18   : > { %v351_v60 = vld [vmem:[%s2375_s28 + $0xd8] sm:$0xff]  ;;  %v352_v61 = vld [vmem:[%s2375_s28 + $0xe0] sm:$0xff]  ;;  %v337_v62 = vld [vmem:[%s2375_s28 + $0x68] sm:$0xff] }
  0x19   : > { %2231 = vmatpush3.bf16.msra.mxu0 %v2228_v16  ;;  %v338_v63 = vld [vmem:[%s2375_s28 + $0x70] sm:$0xff]  ;;  %v353_v0 = vld [vmem:[%s2375_s28 + $0xe8] sm:$0xff]  ;;  %v339_v2 = vld [vmem:[%s2375_s28 + $0x78] sm:$0xff] }
  0x1a   : > { %2233 = vmatprep.subr.bf16.mxu0 %v2232_v19  ;;  %2256 = vmatpush3.bf16.msra.mxu1 %v2228_v16  ;;  %v354_v1 = vld [vmem:[%s2375_s28 + $0xf0] sm:$0xff]  ;;  %v355_v3 = vld [vmem:[%s2375_s28 + $0xf8] sm:$0xff]  ;;  %v2484_v8 = vld [vmem:[%s2656_s2] ss:$0 sm:$0xff] }
  0x1b   : > { %2249 = vmatprep.subr.bf16.mxu1 %v2232_v19 }
  0x1d   : > { %2235 = vmatpush3.bf16.msra.mxu0 %v2232_v19 }
  0x1e   : > { %2237 = vmatprep.subr.bf16.mxu0 %v2236_v22  ;;  %2257 = vmatpush3.bf16.msra.mxu1 %v2232_v19 }
  0x1f   : > { %2250 = vmatprep.subr.bf16.mxu1 %v2236_v22 }
  0x21   : > { %2239 = vmatpush3.bf16.msra.mxu0 %v2236_v22 }
  0x22   : > { %2241 = vmatprep.subr.bf16.mxu0 %v2240_v25  ;;  %2258 = vmatpush3.bf16.msra.mxu1 %v2236_v22 }
  0x23   : > { %2251 = vmatprep.subr.bf16.mxu1 %v2240_v25 }
  0x25   : > { %2243 = vmatpush3.bf16.msra.mxu0 %v2240_v25 }
  0x26   : > { %2259 = vmatpush3.bf16.msra.mxu1 %v2240_v25  ;;  %2164 = vmatprep.subr.bf16.mxu0 %v2269_v26 }
  0x27   : > { %2116 = vmatprep.subr.bf16.mxu1 %v2268_v27 }
  0x28   : > { %2069 = vmatmul.mubr.f32.vlgmr.msra.gmra.mrb[0].mxu0 %v325_v28 }
  0x29   : > { %2071 = vmatprep.mubr.f32.mxu0 %v326_v29  ;;  %2093 = vmatmul.mubr.f32.vlgmr.msra.gmra.mrb[0].mxu1 %v341_v30 }
  0x2a   : > { %2095 = vmatprep.mubr.f32.mxu1 %v342_v31  ;;  %2117 = vmatpush3.bf16.msra.mxu1 %v2268_v27 }
  0x2b   : > { %2165 = vmatpush3.bf16.msra.mxu0 %v2269_v26  ;;  %2118 = vmatprep.subr.bf16.mxu1 %v2270_v32 }
  0x2c   : > { %2072 = vmatmul.mubr.f32.gmra.mrb[2].mxu0 %v327_v34  ;;  %2166 = vmatprep.subr.bf16.mxu0 %v2271_v33 }
  0x2d   : > { %2074 = vmatprep.mubr.f32.mxu0 %v328_v35  ;;  %2096 = vmatmul.mubr.f32.gmra.mrb[2].mxu1 %v343_v36 }
  0x2e   : > { %2098 = vmatprep.mubr.f32.mxu1 %v344_v37  ;;  %2119 = vmatpush3.bf16.msra.mxu1 %v2270_v32 }
  0x2f   : > { %2167 = vmatpush3.bf16.msra.mxu0 %v2271_v33  ;;  %2120 = vmatprep.subr.bf16.mxu1 %v2272_v38 }
  0x30   : > { %2075 = vmatmul.mubr.f32.gmra.mrb[4].mxu0 %v329_v40  ;;  %2168 = vmatprep.subr.bf16.mxu0 %v2273_v39 }
  0x31   : > { %2077 = vmatprep.mubr.f32.mxu0 %v330_v41  ;;  %2099 = vmatmul.mubr.f32.gmra.mrb[4].mxu1 %v345_v42 }
  0x32   : > { %2101 = vmatprep.mubr.f32.mxu1 %v346_v43  ;;  %2121 = vmatpush3.bf16.msra.mxu1 %v2272_v38 }
  0x33   : > { %2169 = vmatpush3.bf16.msra.mxu0 %v2273_v39  ;;  %2122 = vmatprep.subr.bf16.mxu1 %v2274_v44 }
  0x34   : > { %2078 = vmatmul.mubr.f32.gmra.mrb[6].mxu0 %v331_v46  ;;  %2170 = vmatprep.subr.bf16.mxu0 %v2275_v45 }
  0x35   : > { %2080 = vmatprep.mubr.f32.mxu0 %v332_v47  ;;  %2102 = vmatmul.mubr.f32.gmra.mrb[6].mxu1 %v347_v48 }
  0x36   : > { %2104 = vmatprep.mubr.f32.mxu1 %v348_v49  ;;  %2123 = vmatpush3.bf16.msra.mxu1 %v2274_v44 }
  0x37   : > { %2171 = vmatpush3.bf16.msra.mxu0 %v2275_v45  ;;  %2124 = vmatprep.subr.bf16.mxu1 %v2276_v50 }
  0x38   : > { %2081 = vmatmul.mubr.f32.gmra.mrb[8].mxu0 %v333_v52  ;;  %2172 = vmatprep.subr.bf16.mxu0 %v2277_v51 }
  0x39   : > { %2083 = vmatprep.mubr.f32.mxu0 %v334_v53  ;;  %2105 = vmatmul.mubr.f32.gmra.mrb[8].mxu1 %v349_v54 }
  0x3a   : > { %2107 = vmatprep.mubr.f32.mxu1 %v350_v55  ;;  %2125 = vmatpush3.bf16.msra.mxu1 %v2276_v50 }
  0x3b   : > { %2173 = vmatpush3.bf16.msra.mxu0 %v2277_v51  ;;  %2126 = vmatprep.subr.bf16.mxu1 %v2278_v56 }
  0x3c   : > { %2084 = vmatmul.mubr.f32.gmra.mrb[10].mxu0 %v335_v58  ;;  %2174 = vmatprep.subr.bf16.mxu0 %v2279_v57 }
  0x3d   : > { %2086 = vmatprep.mubr.f32.mxu0 %v336_v59  ;;  %2108 = vmatmul.mubr.f32.gmra.mrb[10].mxu1 %v351_v60 }
  0x3e   : > { %2110 = vmatprep.mubr.f32.mxu1 %v352_v61  ;;  %2127 = vmatpush3.bf16.msra.mxu1 %v2278_v56 }
  0x3f   : > { %2175 = vmatpush3.bf16.msra.mxu0 %v2279_v57  ;;  %2128 = vmatprep.subr.bf16.mxu1 %v2280_v4 }
  0x40   : > { %2087 = vmatmul.mubr.f32.gmra.mrb[12].mxu0 %v337_v62  ;;  %2176 = vmatprep.subr.bf16.mxu0 %v2281_v5 }
  0x41   : > { %2089 = vmatprep.mubr.f32.mxu0 %v338_v63  ;;  %2111 = vmatmul.mubr.f32.gmra.mrb[12].mxu1 %v353_v0 }
  0x42   : > { %2113 = vmatprep.mubr.f32.mxu1 %v354_v1  ;;  %2129 = vmatpush3.bf16.msra.mxu1 %v2280_v4 }
  0x43   : > { %2177 = vmatpush3.bf16.msra.mxu0 %v2281_v5  ;;  %2130 = vmatprep.subr.bf16.mxu1 %v2282_v6 }
  0x44   : > { %2090 = vmatmul.mubr.f32.gmra.mrb[14].mxu0 %v339_v2  ;;  %2178 = vmatprep.subr.bf16.mxu0 %v2283_v7 }
  0x45   : > { %2114 = vmatmul.mubr.f32.gmra.mrb[14].mxu1 %v355_v3 }
  0x46   : > { %2131 = vmatpush3.bf16.msra.mxu1 %v2282_v6 }
  0x47   : > { %2179 = vmatpush3.bf16.msra.mxu0 %v2283_v7 }
  0xfb   : > { %v2070_v9 = vpop.f32.mrb[0].mxu0 }
  0xfc   : > { %v451_v10 = vadd.f32 %v2070_v9, %v2484_v8  ;;  %v445_v11 = vpop.f32.mrb[1].mxu0  ;;  %v2094_v12 = vpop.f32.mrb[0].mxu1 }
  0xfd   : > { %v446_v13 = vadd.f32 %v2484_v8, %v445_v11  ;;  %v531_v14 = vadd.f32 %v2094_v12, %v2484_v8  ;;  %v525_v15 = vpop.f32.mrb[1].mxu1 }
  0xfe   : > { %v605_v16 = vmax.f32 %v451_v10, 0.0  ;;  %v526_v17 = vadd.f32 %v2484_v8, %v525_v15 }
  0xff   : > { %v604_v18 = vmax.f32 %v446_v13, 0.0  ;;  %v2073_v19 = vpop.f32.mrb[2].mxu0  ;;  %v621_v20 = vmax.f32 %v531_v14, 0.0 }
 0x100   : > { %v461_v21 = vadd.f32 %v2073_v19, %v2484_v8  ;;  %v455_v22 = vpop.f32.mrb[3].mxu0  ;;  %v620_v23 = vmax.f32 %v526_v17, 0.0  ;;  %v2097_v24 = vpop.f32.mrb[2].mxu1 }
 0x101   : > { %v636_v25 = vpack.c.bf16 %v605_v16, %v604_v18  ;;  %v456_v26 = vadd.f32 %v2484_v8, %v455_v22  ;;  %v541_v27 = vadd.f32 %v2097_v24, %v2484_v8  ;;  %v535_v28 = vpop.f32.mrb[3].mxu1 }
 0x102   : > { %v607_v29 = vmax.f32 %v461_v21, 0.0  ;;  %v2493_v30 = vpack.c.bf16 %v621_v20, %v620_v23  ;;  %v536_v31 = vadd.f32 %v2484_v8, %v535_v28 }
 0x103   : > { %v606_v32 = vmax.f32 %v456_v26, 0.0  ;;  %v2076_v33 = vpop.f32.mrb[4].mxu0  ;;  %2132 = vmatprep.mubr.bf16.mxu1 %v636_v25  ;;  %2180 = vmatprep.mubr.bf16.mxu0 %v636_v25  ;;  %v623_v34 = vmax.f32 %v541_v27, 0.0 }
 0x104   : > { %v471_v35 = vadd.f32 %v2076_v33, %v2484_v8  ;;  %v465_v36 = vpop.f32.mrb[5].mxu0  ;;  %v622_v37 = vmax.f32 %v536_v31, 0.0  ;;  %v2100_v38 = vpop.f32.mrb[4].mxu1 }
 0x105   : > { %v637_v39 = vpack.c.bf16 %v607_v29, %v606_v32  ;;  %v466_v40 = vadd.f32 %v2484_v8, %v465_v36  ;;  %v551_v41 = vadd.f32 %v2100_v38, %v2484_v8  ;;  %v545_v42 = vpop.f32.mrb[5].mxu1 }
 0x106   : > { %v609_v43 = vmax.f32 %v471_v35, 0.0  ;;  %v2499_v44 = vpack.c.bf16 %v623_v34, %v622_v37  ;;  %v546_v45 = vadd.f32 %v2484_v8, %v545_v42 }
 0x107   : > { %v608_v46 = vmax.f32 %v466_v40, 0.0  ;;  %v2079_v47 = vpop.f32.mrb[6].mxu0  ;;  %2133 = vmatmul.mubr.bf16.vlgmr.msra.gmra.mrb[16].mxu1 %v637_v39  ;;  %2181 = vmatmul.mubr.bf16.vlgmr.msra.gmra.mrb[16].mxu0 %v637_v39  ;;  %v625_v48 = vmax.f32 %v551_v41, 0.0 }
 0x108   : > { %v481_v49 = vadd.f32 %v2079_v47, %v2484_v8  ;;  %v475_v50 = vpop.f32.mrb[7].mxu0  ;;  %v624_v51 = vmax.f32 %v546_v45, 0.0  ;;  %v2103_v52 = vpop.f32.mrb[6].mxu1 }
 0x109   : > { %v638_v53 = vpack.c.bf16 %v609_v43, %v608_v46  ;;  %v476_v54 = vadd.f32 %v2484_v8, %v475_v50  ;;  %v561_v55 = vadd.f32 %v2103_v52, %v2484_v8  ;;  %v555_v56 = vpop.f32.mrb[7].mxu1 }
 0x10a   : > { %v611_v57 = vmax.f32 %v481_v49, 0.0  ;;  %v2505_v58 = vpack.c.bf16 %v625_v48, %v624_v51  ;;  %v556_v59 = vadd.f32 %v2484_v8, %v555_v56 }
 0x10b   : > { %v610_v60 = vmax.f32 %v476_v54, 0.0  ;;  %v2082_v61 = vpop.f32.mrb[8].mxu0  ;;  %2136 = vmatprep.mubr.bf16.mxu1 %v638_v53  ;;  %2184 = vmatprep.mubr.bf16.mxu0 %v638_v53  ;;  %v627_v62 = vmax.f32 %v561_v55, 0.0 }
 0x10c   : > { %v491_v63 = vadd.f32 %v2082_v61, %v2484_v8  ;;  %v485_v0 = vpop.f32.mrb[9].mxu0  ;;  %v626_v1 = vmax.f32 %v556_v59, 0.0  ;;  %v2106_v2 = vpop.f32.mrb[8].mxu1 }
 0x10d   : > { %v639_v3 = vpack.c.bf16 %v611_v57, %v610_v60  ;;  %v486_v4 = vadd.f32 %v2484_v8, %v485_v0  ;;  %v571_v5 = vadd.f32 %v2106_v2, %v2484_v8  ;;  %v565_v6 = vpop.f32.mrb[9].mxu1 }
 0x10e   : > { %v613_v7 = vmax.f32 %v491_v63, 0.0  ;;  %v2511_v9 = vpack.c.bf16 %v627_v62, %v626_v1  ;;  %v566_v10 = vadd.f32 %v2484_v8, %v565_v6 }
 0x10f   : > { %v612_v11 = vmax.f32 %v486_v4, 0.0  ;;  %v2085_v12 = vpop.f32.mrb[10].mxu0  ;;  %2137 = vmatmul.mubr.bf16.gmra.mrb[20].mxu1 %v639_v3  ;;  %2185 = vmatmul.mubr.bf16.gmra.mrb[20].mxu0 %v639_v3  ;;  %v629_v13 = vmax.f32 %v571_v5, 0.0 }
 0x110   : > { %v501_v14 = vadd.f32 %v2085_v12, %v2484_v8  ;;  %v495_v15 = vpop.f32.mrb[11].mxu0  ;;  %v628_v16 = vmax.f32 %v566_v10, 0.0  ;;  %v2109_v17 = vpop.f32.mrb[10].mxu1 }
 0x111   : > { %v640_v18 = vpack.c.bf16 %v613_v7, %v612_v11  ;;  %v496_v19 = vadd.f32 %v2484_v8, %v495_v15  ;;  %v581_v20 = vadd.f32 %v2109_v17, %v2484_v8  ;;  %v575_v21 = vpop.f32.mrb[11].mxu1 }
 0x112   : > { %v615_v22 = vmax.f32 %v501_v14, 0.0  ;;  %v648_v23 = vpack.c.bf16 %v629_v13, %v628_v16  ;;  %v576_v24 = vadd.f32 %v2484_v8, %v575_v21 }
 0x113   : > { %v614_v25 = vmax.f32 %v496_v19, 0.0  ;;  %v2088_v26 = vpop.f32.mrb[12].mxu0  ;;  %2140 = vmatprep.mubr.bf16.mxu1 %v640_v18  ;;  %2188 = vmatprep.mubr.bf16.mxu0 %v640_v18  ;;  %v631_v27 = vmax.f32 %v581_v20, 0.0 }
 0x114   : > { %v511_v28 = vadd.f32 %v2088_v26, %v2484_v8  ;;  %v505_v29 = vpop.f32.mrb[13].mxu0  ;;  %v630_v31 = vmax.f32 %v576_v24, 0.0  ;;  %v2112_v32 = vpop.f32.mrb[12].mxu1 }
 0x115   : > { %v641_v33 = vpack.c.bf16 %v615_v22, %v614_v25  ;;  %v506_v34 = vadd.f32 %v2484_v8, %v505_v29  ;;  %v591_v35 = vadd.f32 %v2112_v32, %v2484_v8  ;;  %v585_v36 = vpop.f32.mrb[13].mxu1 }
 0x116   : > { %v617_v37 = vmax.f32 %v511_v28, 0.0  ;;  %v649_v38 = vpack.c.bf16 %v631_v27, %v630_v31  ;;  %v586_v39 = vadd.f32 %v2484_v8, %v585_v36 }
 0x117   : > { %v616_v40 = vmax.f32 %v506_v34, 0.0  ;;  %v2091_v41 = vpop.f32.mrb[14].mxu0  ;;  %2141 = vmatmul.mubr.bf16.gmra.mrb[24].mxu1 %v641_v33  ;;  %2189 = vmatmul.mubr.bf16.gmra.mrb[24].mxu0 %v641_v33  ;;  %v633_v42 = vmax.f32 %v591_v35, 0.0 }
 0x118   : > { %v521_v43 = vadd.f32 %v2091_v41, %v2484_v8  ;;  %v515_v45 = vpop.f32.mrb[15].mxu0  ;;  %v632_v46 = vmax.f32 %v586_v39, 0.0  ;;  %v2115_v47 = vpop.f32.mrb[14].mxu1 }
 0x119   : > { %v642_v48 = vpack.c.bf16 %v617_v37, %v616_v40  ;;  %v516_v49 = vadd.f32 %v2484_v8, %v515_v45  ;;  %v601_v50 = vadd.f32 %v2115_v47, %v2484_v8  ;;  %v595_v51 = vpop.f32.mrb[15].mxu1 }
 0x11a   : > { %v619_v52 = vmax.f32 %v521_v43, 0.0  ;;  %v650_v53 = vpack.c.bf16 %v633_v42, %v632_v46  ;;  %v596_v54 = vadd.f32 %v2484_v8, %v595_v51  ;;  %v2537_v8 = vld [vmem:[%s2658_s4] ss:$0 sm:$0xff] }
 0x11b   : > { %v618_v55 = vmax.f32 %v516_v49, 0.0  ;;  %2144 = vmatprep.mubr.bf16.mxu1 %v642_v48  ;;  %2192 = vmatprep.mubr.bf16.mxu0 %v642_v48  ;;  %v635_v56 = vmax.f32 %v601_v50, 0.0 }
 0x11c   : > { %v634_v57 = vmax.f32 %v596_v54, 0.0 }
 0x11d   : > { %v643_v59 = vpack.c.bf16 %v619_v52, %v618_v55 }
 0x11e   : > { %v651_v60 = vpack.c.bf16 %v635_v56, %v634_v57 }
 0x11f   : > { %2145 = vmatmul.mubr.bf16.gmra.mrb[28].mxu1 %v643_v59  ;;  %2193 = vmatmul.mubr.bf16.gmra.mrb[28].mxu0 %v643_v59 }
 0x120   : > { %2148 = vmatprep.mubr.bf16.mxu1 %v2493_v30  ;;  %2196 = vmatprep.mubr.bf16.mxu0 %v2493_v30  ;;  %v2542_v30 = vld [vmem:[%s2660_s6] ss:$0 sm:$0xff] }
 0x127   : > { %2149 = vmatmul.mubr.bf16.gmra.mrb[32].mxu1 %v2499_v44  ;;  %2197 = vmatmul.mubr.bf16.gmra.mrb[32].mxu0 %v2499_v44 }
 0x128   : > { %2152 = vmatprep.mubr.bf16.mxu1 %v2505_v58  ;;  %2200 = vmatprep.mubr.bf16.mxu0 %v2505_v58 }
 0x12f   : > { %2153 = vmatmul.mubr.bf16.gmra.mrb[36].mxu1 %v2511_v9  ;;  %2201 = vmatmul.mubr.bf16.gmra.mrb[36].mxu0 %v2511_v9 }
 0x130   : > { %2156 = vmatprep.mubr.bf16.mxu1 %v648_v23  ;;  %2204 = vmatprep.mubr.bf16.mxu0 %v648_v23 }
 0x137   : > { %2157 = vmatmul.mubr.bf16.gmra.mrb[40].mxu1 %v649_v38  ;;  %2205 = vmatmul.mubr.bf16.gmra.mrb[40].mxu0 %v649_v38 }
 0x138   : > { %2160 = vmatprep.mubr.bf16.mxu1 %v650_v53  ;;  %2208 = vmatprep.mubr.bf16.mxu0 %v650_v53 }
 0x13f   : > { %2161 = vmatmul.mubr.bf16.gmra.mrb[44].mxu1 %v651_v60  ;;  %2209 = vmatmul.mubr.bf16.gmra.mrb[44].mxu0 %v651_v60 }
 0x1da   : > { %v2134_v44 = vpop.f32.mrb[16].mxu1  ;;  %v2182_v58 = vpop.f32.mrb[16].mxu0 }
 0x1db   : > { %v766_v61 = vadd.f32 %v2134_v44, %v2537_v8  ;;  %v1190_v62 = vadd.f32 %v2182_v58, %v2542_v30  ;;  %v757_v63 = vpop.f32.mrb[17].mxu1  ;;  %v1181_v0 = vpop.f32.mrb[17].mxu0 }
 0x1dc   : > { %v758_v1 = vadd.f32 %v2537_v8, %v757_v63  ;;  %v1182_v2 = vadd.f32 %v2542_v30, %v1181_v0  ;;  %v2135_v3 = vpop.f32.mrb[18].mxu1  ;;  %v2183_v4 = vpop.f32.mrb[18].mxu0 }
 0x1dd   : > { %v769_v5 = vadd.f32 %v2135_v3, %v2537_v8  ;;  %v1193_v6 = vadd.f32 %v2183_v4, %v2542_v30  ;;  %v760_v7 = vpop.f32.mrb[19].mxu1  ;;  %v1184_v9 = vpop.f32.mrb[19].mxu0  ;;  %v886_v12 = vmax.f32 %v766_v61, 0.0  ;;  %v1310_v13 = vmax.f32 %v1190_v62, 0.0 }
 0x1de   : > { %v761_v10 = vadd.f32 %v2537_v8, %v760_v7  ;;  %v1185_v11 = vadd.f32 %v2542_v30, %v1184_v9  ;;  %v884_v16 = vmax.f32 %v758_v1, 0.0  ;;  %v1308_v17 = vmax.f32 %v1182_v2, 0.0 }
 0x1df   : > { %v887_v14 = vmax.f32 %v769_v5, 0.0  ;;  %v1311_v15 = vmax.f32 %v1193_v6, 0.0 }
 0x1e0   : > { %v885_v18 = vmax.f32 %v761_v10, 0.0  ;;  %v1309_v19 = vmax.f32 %v1185_v11, 0.0 }
 0x1e1   : > { %v1758_v20 = vpack.c.bf16 %v887_v14, %v886_v12  ;;  %v1838_v21 = vpack.c.bf16 %v1311_v15, %v1310_v13 }
 0x1e2   : > { %v1753_v22 = vpack.c.bf16 %v885_v18, %v884_v16  ;;  %v1833_v23 = vpack.c.bf16 %v1309_v19, %v1308_v17  ;;  %v2138_v24 = vpop.f32.mrb[20].mxu1  ;;  %v2186_v25 = vpop.f32.mrb[20].mxu0 }
 0x1e3   : > { %1910 = vst [vmem:[%s2556_s13 + $0x8] sm:$0xff] %v1758_v20   ;;  %1925 = vst [vmem:[%s2561_s30 + $0x8] sm:$0xff] %v1838_v21   ;;  %v782_v26 = vadd.f32 %v2138_v24, %v2537_v8  ;;  %v1206_v27 = vadd.f32 %v2186_v25, %v2542_v30  ;;  %v773_v28 = vpop.f32.mrb[21].mxu1  ;;  %v1197_v29 = vpop.f32.mrb[21].mxu0 }
 0x1e4   : > { %1754 = vst [vmem:[%s2556_s13] sm:$0xff] %v1753_v22   ;;  %1834 = vst [vmem:[%s2561_s30] sm:$0xff] %v1833_v23   ;;  %v774_v31 = vadd.f32 %v2537_v8, %v773_v28  ;;  %v1198_v32 = vadd.f32 %v2542_v30, %v1197_v29  ;;  %v2139_v33 = vpop.f32.mrb[22].mxu1  ;;  %v2187_v34 = vpop.f32.mrb[22].mxu0 }
 0x1e5   : > { %v785_v35 = vadd.f32 %v2139_v33, %v2537_v8  ;;  %v1209_v36 = vadd.f32 %v2187_v34, %v2542_v30  ;;  %v776_v37 = vpop.f32.mrb[23].mxu1  ;;  %v1200_v38 = vpop.f32.mrb[23].mxu0  ;;  %v890_v41 = vmax.f32 %v782_v26, 0.0  ;;  %v1314_v42 = vmax.f32 %v1206_v27, 0.0 }
 0x1e6   : > { %v777_v39 = vadd.f32 %v2537_v8, %v776_v37  ;;  %v1201_v40 = vadd.f32 %v2542_v30, %v1200_v38  ;;  %v888_v46 = vmax.f32 %v774_v31, 0.0  ;;  %v1312_v47 = vmax.f32 %v1198_v32, 0.0 }
 0x1e7   : > { %v891_v43 = vmax.f32 %v785_v35, 0.0  ;;  %v1315_v45 = vmax.f32 %v1209_v36, 0.0 }
 0x1e8   : > { %v889_v48 = vmax.f32 %v777_v39, 0.0  ;;  %v1313_v49 = vmax.f32 %v1201_v40, 0.0 }
 0x1e9   : > { %v1768_v50 = vpack.c.bf16 %v891_v43, %v890_v41  ;;  %v1848_v51 = vpack.c.bf16 %v1315_v45, %v1314_v42 }
 0x1ea   : > { %v1763_v52 = vpack.c.bf16 %v889_v48, %v888_v46  ;;  %v1843_v53 = vpack.c.bf16 %v1313_v49, %v1312_v47  ;;  %v2142_v54 = vpop.f32.mrb[24].mxu1  ;;  %v2190_v55 = vpop.f32.mrb[24].mxu0 }
 0x1eb   : > { %1912 = vst [vmem:[%s2556_s13 + $0x18] sm:$0xff] %v1768_v50   ;;  %1927 = vst [vmem:[%s2561_s30 + $0x18] sm:$0xff] %v1848_v51   ;;  %v798_v56 = vadd.f32 %v2142_v54, %v2537_v8  ;;  %v1222_v57 = vadd.f32 %v2190_v55, %v2542_v30  ;;  %v789_v59 = vpop.f32.mrb[25].mxu1  ;;  %v1213_v60 = vpop.f32.mrb[25].mxu0 }
 0x1ec   : > { %1911 = vst [vmem:[%s2556_s13 + $0x10] sm:$0xff] %v1763_v52   ;;  %1926 = vst [vmem:[%s2561_s30 + $0x10] sm:$0xff] %v1843_v53   ;;  %v790_v44 = vadd.f32 %v2537_v8, %v789_v59  ;;  %v1214_v58 = vadd.f32 %v2542_v30, %v1213_v60  ;;  %v2143_v61 = vpop.f32.mrb[26].mxu1  ;;  %v2191_v62 = vpop.f32.mrb[26].mxu0 }
 0x1ed   : > { %v801_v63 = vadd.f32 %v2143_v61, %v2537_v8  ;;  %v1225_v0 = vadd.f32 %v2191_v62, %v2542_v30  ;;  %v792_v1 = vpop.f32.mrb[27].mxu1  ;;  %v1216_v2 = vpop.f32.mrb[27].mxu0  ;;  %v894_v5 = vmax.f32 %v798_v56, 0.0  ;;  %v1318_v6 = vmax.f32 %v1222_v57, 0.0 }
 0x1ee   : > { %v793_v3 = vadd.f32 %v2537_v8, %v792_v1  ;;  %v1217_v4 = vadd.f32 %v2542_v30, %v1216_v2  ;;  %v892_v10 = vmax.f32 %v790_v44, 0.0  ;;  %v1316_v11 = vmax.f32 %v1214_v58, 0.0 }
 0x1ef   : > { %v895_v7 = vmax.f32 %v801_v63, 0.0  ;;  %v1319_v9 = vmax.f32 %v1225_v0, 0.0 }
 0x1f0   : > { %v893_v12 = vmax.f32 %v793_v3, 0.0  ;;  %v1317_v13 = vmax.f32 %v1217_v4, 0.0 }
 0x1f1   : > { %v1778_v14 = vpack.c.bf16 %v895_v7, %v894_v5  ;;  %v1858_v15 = vpack.c.bf16 %v1319_v9, %v1318_v6 }
 0x1f2   : > { %v1773_v16 = vpack.c.bf16 %v893_v12, %v892_v10  ;;  %v1853_v17 = vpack.c.bf16 %v1317_v13, %v1316_v11  ;;  %v2146_v18 = vpop.f32.mrb[28].mxu1  ;;  %v2194_v19 = vpop.f32.mrb[28].mxu0 }
 0x1f3   : > { %1914 = vst [vmem:[%s2556_s13 + $0x28] sm:$0xff] %v1778_v14   ;;  %1929 = vst [vmem:[%s2561_s30 + $0x28] sm:$0xff] %v1858_v15   ;;  %v814_v20 = vadd.f32 %v2146_v18, %v2537_v8  ;;  %v1238_v21 = vadd.f32 %v2194_v19, %v2542_v30  ;;  %v805_v22 = vpop.f32.mrb[29].mxu1  ;;  %v1229_v23 = vpop.f32.mrb[29].mxu0 }
 0x1f4   : > { %1913 = vst [vmem:[%s2556_s13 + $0x20] sm:$0xff] %v1773_v16   ;;  %1928 = vst [vmem:[%s2561_s30 + $0x20] sm:$0xff] %v1853_v17   ;;  %v806_v24 = vadd.f32 %v2537_v8, %v805_v22  ;;  %v1230_v25 = vadd.f32 %v2542_v30, %v1229_v23  ;;  %v2147_v26 = vpop.f32.mrb[30].mxu1  ;;  %v2195_v27 = vpop.f32.mrb[30].mxu0 }
 0x1f5   : > { %v817_v28 = vadd.f32 %v2147_v26, %v2537_v8  ;;  %v1241_v29 = vadd.f32 %v2195_v27, %v2542_v30  ;;  %v808_v31 = vpop.f32.mrb[31].mxu1  ;;  %v1232_v32 = vpop.f32.mrb[31].mxu0  ;;  %v898_v35 = vmax.f32 %v814_v20, 0.0  ;;  %v1322_v36 = vmax.f32 %v1238_v21, 0.0 }
 0x1f6   : > { %v809_v33 = vadd.f32 %v2537_v8, %v808_v31  ;;  %v1233_v34 = vadd.f32 %v2542_v30, %v1232_v32  ;;  %v896_v39 = vmax.f32 %v806_v24, 0.0  ;;  %v1320_v40 = vmax.f32 %v1230_v25, 0.0 }
 0x1f7   : > { %v899_v37 = vmax.f32 %v817_v28, 0.0  ;;  %v1323_v38 = vmax.f32 %v1241_v29, 0.0 }
 0x1f8   : > { %v897_v41 = vmax.f32 %v809_v33, 0.0  ;;  %v1321_v42 = vmax.f32 %v1233_v34, 0.0 }
 0x1f9   : > { %v1788_v43 = vpack.c.bf16 %v899_v37, %v898_v35  ;;  %v1868_v45 = vpack.c.bf16 %v1323_v38, %v1322_v36 }
 0x1fa   : > { %v1783_v46 = vpack.c.bf16 %v897_v41, %v896_v39  ;;  %v1863_v47 = vpack.c.bf16 %v1321_v42, %v1320_v40  ;;  %v2150_v48 = vpop.f32.mrb[32].mxu1  ;;  %v2198_v49 = vpop.f32.mrb[32].mxu0 }
 0x1fb   : > { %1916 = vst [vmem:[%s2556_s13 + $0x38] sm:$0xff] %v1788_v43   ;;  %1931 = vst [vmem:[%s2561_s30 + $0x38] sm:$0xff] %v1868_v45   ;;  %v830_v50 = vadd.f32 %v2150_v48, %v2537_v8  ;;  %v1254_v51 = vadd.f32 %v2198_v49, %v2542_v30  ;;  %v821_v52 = vpop.f32.mrb[33].mxu1  ;;  %v1245_v53 = vpop.f32.mrb[33].mxu0 }
 0x1fc   : > { %1915 = vst [vmem:[%s2556_s13 + $0x30] sm:$0xff] %v1783_v46   ;;  %1930 = vst [vmem:[%s2561_s30 + $0x30] sm:$0xff] %v1863_v47   ;;  %v822_v54 = vadd.f32 %v2537_v8, %v821_v52  ;;  %v1246_v55 = vadd.f32 %v2542_v30, %v1245_v53  ;;  %v2151_v56 = vpop.f32.mrb[34].mxu1  ;;  %v2199_v57 = vpop.f32.mrb[34].mxu0 }
 0x1fd   : > { %v833_v59 = vadd.f32 %v2151_v56, %v2537_v8  ;;  %v1257_v60 = vadd.f32 %v2199_v57, %v2542_v30  ;;  %v824_v44 = vpop.f32.mrb[35].mxu1  ;;  %v1248_v58 = vpop.f32.mrb[35].mxu0  ;;  %v902_v63 = vmax.f32 %v830_v50, 0.0  ;;  %v1326_v0 = vmax.f32 %v1254_v51, 0.0 }
 0x1fe   : > { %v825_v61 = vadd.f32 %v2537_v8, %v824_v44  ;;  %v1249_v62 = vadd.f32 %v2542_v30, %v1248_v58  ;;  %v900_v3 = vmax.f32 %v822_v54, 0.0  ;;  %v1324_v4 = vmax.f32 %v1246_v55, 0.0 }
 0x1ff   : > { %v903_v1 = vmax.f32 %v833_v59, 0.0  ;;  %v1327_v2 = vmax.f32 %v1257_v60, 0.0 }
 0x200   : > { %v901_v5 = vmax.f32 %v825_v61, 0.0  ;;  %v1325_v6 = vmax.f32 %v1249_v62, 0.0 }
 0x201   : > { %v1798_v7 = vpack.c.bf16 %v903_v1, %v902_v63  ;;  %v1878_v9 = vpack.c.bf16 %v1327_v2, %v1326_v0 }
 0x202   : > { %v1793_v10 = vpack.c.bf16 %v901_v5, %v900_v3  ;;  %v1873_v11 = vpack.c.bf16 %v1325_v6, %v1324_v4  ;;  %v2154_v12 = vpop.f32.mrb[36].mxu1  ;;  %v2202_v13 = vpop.f32.mrb[36].mxu0 }
 0x203   : > { %1918 = vst [vmem:[%s2556_s13 + $0x48] sm:$0xff] %v1798_v7   ;;  %1933 = vst [vmem:[%s2561_s30 + $0x48] sm:$0xff] %v1878_v9   ;;  %v846_v14 = vadd.f32 %v2154_v12, %v2537_v8  ;;  %v1270_v15 = vadd.f32 %v2202_v13, %v2542_v30  ;;  %v837_v16 = vpop.f32.mrb[37].mxu1  ;;  %v1261_v17 = vpop.f32.mrb[37].mxu0 }
 0x204   : > { %1917 = vst [vmem:[%s2556_s13 + $0x40] sm:$0xff] %v1793_v10   ;;  %1932 = vst [vmem:[%s2561_s30 + $0x40] sm:$0xff] %v1873_v11   ;;  %v838_v18 = vadd.f32 %v2537_v8, %v837_v16  ;;  %v1262_v19 = vadd.f32 %v2542_v30, %v1261_v17  ;;  %v2155_v20 = vpop.f32.mrb[38].mxu1  ;;  %v2203_v21 = vpop.f32.mrb[38].mxu0 }
 0x205   : > { %v849_v22 = vadd.f32 %v2155_v20, %v2537_v8  ;;  %v1273_v23 = vadd.f32 %v2203_v21, %v2542_v30  ;;  %v840_v24 = vpop.f32.mrb[39].mxu1  ;;  %v1264_v25 = vpop.f32.mrb[39].mxu0  ;;  %v906_v28 = vmax.f32 %v846_v14, 0.0  ;;  %v1330_v29 = vmax.f32 %v1270_v15, 0.0 }
 0x206   : > { %v841_v26 = vadd.f32 %v2537_v8, %v840_v24  ;;  %v1265_v27 = vadd.f32 %v2542_v30, %v1264_v25  ;;  %v904_v33 = vmax.f32 %v838_v18, 0.0  ;;  %v1328_v34 = vmax.f32 %v1262_v19, 0.0 }
 0x207   : > { %v907_v31 = vmax.f32 %v849_v22, 0.0  ;;  %v1331_v32 = vmax.f32 %v1273_v23, 0.0 }
 0x208   : > { %v905_v35 = vmax.f32 %v841_v26, 0.0  ;;  %v1329_v36 = vmax.f32 %v1265_v27, 0.0 }
 0x209   : > { %v1808_v37 = vpack.c.bf16 %v907_v31, %v906_v28  ;;  %v1888_v38 = vpack.c.bf16 %v1331_v32, %v1330_v29 }
 0x20a   : > { %v1803_v39 = vpack.c.bf16 %v905_v35, %v904_v33  ;;  %v1883_v40 = vpack.c.bf16 %v1329_v36, %v1328_v34  ;;  %v2158_v41 = vpop.f32.mrb[40].mxu1  ;;  %v2206_v42 = vpop.f32.mrb[40].mxu0 }
 0x20b   : > { %1920 = vst [vmem:[%s2556_s13 + $0x58] sm:$0xff] %v1808_v37   ;;  %1935 = vst [vmem:[%s2561_s30 + $0x58] sm:$0xff] %v1888_v38   ;;  %v862_v43 = vadd.f32 %v2158_v41, %v2537_v8  ;;  %v1286_v45 = vadd.f32 %v2206_v42, %v2542_v30  ;;  %v853_v46 = vpop.f32.mrb[41].mxu1  ;;  %v1277_v47 = vpop.f32.mrb[41].mxu0 }
 0x20c   : > { %1919 = vst [vmem:[%s2556_s13 + $0x50] sm:$0xff] %v1803_v39   ;;  %1934 = vst [vmem:[%s2561_s30 + $0x50] sm:$0xff] %v1883_v40   ;;  %v854_v48 = vadd.f32 %v2537_v8, %v853_v46  ;;  %v1278_v49 = vadd.f32 %v2542_v30, %v1277_v47  ;;  %v2159_v50 = vpop.f32.mrb[42].mxu1  ;;  %v2207_v51 = vpop.f32.mrb[42].mxu0 }
 0x20d   : > { %v865_v52 = vadd.f32 %v2159_v50, %v2537_v8  ;;  %v1289_v53 = vadd.f32 %v2207_v51, %v2542_v30  ;;  %v856_v54 = vpop.f32.mrb[43].mxu1  ;;  %v1280_v55 = vpop.f32.mrb[43].mxu0  ;;  %v910_v59 = vmax.f32 %v862_v43, 0.0  ;;  %v1334_v60 = vmax.f32 %v1286_v45, 0.0 }
 0x20e   : > { %v857_v56 = vadd.f32 %v2537_v8, %v856_v54  ;;  %v1281_v57 = vadd.f32 %v2542_v30, %v1280_v55  ;;  %v908_v61 = vmax.f32 %v854_v48, 0.0  ;;  %v1332_v62 = vmax.f32 %v1278_v49, 0.0 }
 0x20f   : > { %v911_v44 = vmax.f32 %v865_v52, 0.0  ;;  %v1335_v58 = vmax.f32 %v1289_v53, 0.0 }
 0x210   : > { %v909_v63 = vmax.f32 %v857_v56, 0.0  ;;  %v1333_v0 = vmax.f32 %v1281_v57, 0.0 }
 0x211   : > { %v1818_v1 = vpack.c.bf16 %v911_v44, %v910_v59  ;;  %v1898_v2 = vpack.c.bf16 %v1335_v58, %v1334_v60 }
 0x212   : > { %v1813_v3 = vpack.c.bf16 %v909_v63, %v908_v61  ;;  %v1893_v4 = vpack.c.bf16 %v1333_v0, %v1332_v62  ;;  %v2162_v5 = vpop.f32.mrb[44].mxu1  ;;  %v2210_v6 = vpop.f32.mrb[44].mxu0 }
 0x213   : > { %1922 = vst [vmem:[%s2556_s13 + $0x68] sm:$0xff] %v1818_v1   ;;  %1937 = vst [vmem:[%s2561_s30 + $0x68] sm:$0xff] %v1898_v2   ;;  %v878_v7 = vadd.f32 %v2162_v5, %v2537_v8  ;;  %v1302_v9 = vadd.f32 %v2210_v6, %v2542_v30  ;;  %v869_v10 = vpop.f32.mrb[45].mxu1  ;;  %v1293_v11 = vpop.f32.mrb[45].mxu0 }
 0x214   : > { %1921 = vst [vmem:[%s2556_s13 + $0x60] sm:$0xff] %v1813_v3   ;;  %1936 = vst [vmem:[%s2561_s30 + $0x60] sm:$0xff] %v1893_v4   ;;  %v870_v12 = vadd.f32 %v2537_v8, %v869_v10  ;;  %v1294_v13 = vadd.f32 %v2542_v30, %v1293_v11  ;;  %v2163_v14 = vpop.f32.mrb[46].mxu1  ;;  %v2211_v15 = vpop.f32.mrb[46].mxu0 }
 0x215   : > { %v881_v16 = vadd.f32 %v2163_v14, %v2537_v8  ;;  %v1305_v17 = vadd.f32 %v2211_v15, %v2542_v30  ;;  %v872_v18 = vpop.f32.mrb[47].mxu1  ;;  %v1296_v19 = vpop.f32.mrb[47].mxu0  ;;  %v914_v22 = vmax.f32 %v878_v7, 0.0  ;;  %v1338_v23 = vmax.f32 %v1302_v9, 0.0 }
 0x216   : > { %v873_v20 = vadd.f32 %v2537_v8, %v872_v18  ;;  %v1297_v21 = vadd.f32 %v2542_v30, %v1296_v19  ;;  %v912_v26 = vmax.f32 %v870_v12, 0.0  ;;  %v1336_v27 = vmax.f32 %v1294_v13, 0.0 }
 0x217   : > { %v915_v24 = vmax.f32 %v881_v16, 0.0  ;;  %v1339_v25 = vmax.f32 %v1305_v17, 0.0 }
 0x218   : > { %v913_v28 = vmax.f32 %v873_v20, 0.0  ;;  %v1337_v29 = vmax.f32 %v1297_v21, 0.0 }
 0x219   : > { %v1828_v31 = vpack.c.bf16 %v915_v24, %v914_v22  ;;  %v1908_v32 = vpack.c.bf16 %v1339_v25, %v1338_v23 }
 0x21a   : > { %v1823_v33 = vpack.c.bf16 %v913_v28, %v912_v26  ;;  %v1903_v34 = vpack.c.bf16 %v1337_v29, %v1336_v27 }
 0x21b   : > { %1924 = vst [vmem:[%s2556_s13 + $0x78] sm:$0xff] %v1828_v31   ;;  %1939 = vst [vmem:[%s2561_s30 + $0x78] sm:$0xff] %v1908_v32  }
 0x21c   : > { %1923 = vst [vmem:[%s2556_s13 + $0x70] sm:$0xff] %v1823_v33   ;;  %1938 = vst [vmem:[%s2561_s30 + $0x70] sm:$0xff] %v1903_v34  }
 0x21d PF: > { %s19_s27 = sadd.s32 1, %s2290_s27  }
 0x21e   : > { %p16_p4 = scmp.ge.s32.totalorder %s19_s27, 4  }
 0x220   :  { %18 = sbr.rel (!%p16_p4) target bundleno = 1 (0x1), region = 90 }

// kernel: gcn_model_forward.4
= control target key start
LH: loop header
LB: loop body
LE: loop exit
PB: predicated region body
PF: predicated region fallthrough
CT: control target
= control target key end

     0   :  { %s3779_s27 = smov 0   ;;  %s3781_s28 = smov 0   ;;  %s4284_s0 = inlined_call_operand.vmem [shape: bf16[512,512], index: 0, kind: input, shape index: {}]   ;;  %s4285_s1 = inlined_call_operand.vmem [shape: bf16[512,128], index: 1, kind: input, shape index: {}]   ;;  %s4286_s2 = inlined_call_operand.vmem [shape: bf16[512,128], index: 2, kind: input, shape index: {}]   ;;  %s4287_s3 = inlined_call_operand.vmem [shape: bf16[128,128], index: 3, kind: input, shape index: {}]   ;;  %s4288_s4 = inlined_call_operand.vmem [shape: f32[1,128], index: 4, kind: input, shape index: {}]   ;;  %s4289_s5 = inlined_call_operand.vmem [shape: bf16[128,128], index: 5, kind: input, shape index: {}]   ;;  %s4290_s6 = inlined_call_operand.vmem [shape: bf16[128,128], index: 6, kind: input, shape index: {}]   ;;  %s4291_s7 = inlined_call_operand.vmem [shape: f32[1,128], index: 7, kind: input, shape index: {}]   ;;  %s4292_s8 = inlined_call_operand.vmem [shape: bf16[512,128], index: 8, kind: output, shape index: {}]  }
   0x1   :  { %s3783_s29 = smov 0  }
   0x2 LB: > { %s30_s30 = sadd.s32 1, %s3728_s28  ;;  %p2722_p0 = scmp.ge.s32.totalorder %s3732_s29, 1  ;;  %s3732_s29 = sphi %s3783_s29, %s18_s29   ;;  %s3728_s28 = sphi %s3781_s28, %s4294_s28   ;;  %s3724_s27 = sphi %s3779_s27, %s4293_s27  }
   0x3   : > { %p32_p1 = scmp.ge.s32.totalorder %s30_s30, 2  ;;  %p305_p2 = scmp.lt.s32.totalorder %s3732_s29, 3 }
   0x5   : > { %s4296_s30 = smov (%p32_p1, %s30_s30), 0  ;;  %p306_p3 = pnand %p2722_p0, %p305_p2 }
   0x6   : > { %v3542_v0 = vld [vmem:[%s4285_s1 + $0x40] sm:$0xff] (!%p306_p3)   ;;  %s2723_s11 = sshll.u32 (!%p306_p3), %s3724_s27, 5  ;;  %v3544_v2 = vld [vmem:[%s4285_s1 + $0x48] sm:$0xff] (!%p306_p3)   ;;  %v3546_v4 = vld [vmem:[%s4285_s1 + $0x50] sm:$0xff] (!%p306_p3)  }
   0x7   : > { %309 = sbr.rel (%p306_p3) target bundleno = 968 (0x3c8), region = 52  ;;  %v3543_v1 = vld [vmem:[%s4285_s1] sm:$0xff] (!%p306_p3)   ;;  %3030 = vmatprep.subr.bf16.mxu0 (!%p306_p3), %v3542_v0  ;;  %v3545_v3 = vld [vmem:[%s4285_s1 + $0x8] sm:$0xff] (!%p306_p3)   ;;  %p356_p4 = scmp.lt.s32.totalorder (!%p306_p3), %s2723_s11, 63  ;;  %v3547_v5 = vld [vmem:[%s4285_s1 + $0x10] sm:$0xff] (!%p306_p3)  }
   0x8   : > { %3031 = vmatpush3.bf16.msra.mxu0 (!%p306_p3), %v3543_v1  ;;  %v3548_v6 = vld [vmem:[%s4285_s1 + $0x58] sm:$0xff] (!%p306_p3)   ;;  %v3550_v8 = vld [vmem:[%s4285_s1 + $0x60] sm:$0xff] (!%p306_p3)   ;;  %v3552_v10 = vld [vmem:[%s4285_s1 + $0x68] sm:$0xff] (!%p306_p3)  }
   0x9   : > { %3032 = vmatprep.subr.bf16.mxu0 (!%p306_p3), %v3544_v2  ;;  %v3549_v7 = vld [vmem:[%s4285_s1 + $0x18] sm:$0xff] (!%p306_p3)   ;;  %v3551_v9 = vld [vmem:[%s4285_s1 + $0x20] sm:$0xff] (!%p306_p3)   ;;  %v3553_v11 = vld [vmem:[%s4285_s1 + $0x28] sm:$0xff] (!%p306_p3)  }
   0xa   : > { %v3554_v13 = vld [vmem:[%s4285_s1 + $0x70] sm:$0xff] (!%p306_p3)   ;;  %v3561_v14 = vld [vmem:[%s4285_s1 + $0xc0] sm:$0xff] (!%p306_p3)   ;;  %v3563_v16 = vld [vmem:[%s4285_s1 + $0xc8] sm:$0xff] (!%p306_p3)  }
   0xb   : > { %v3562_v15 = vld [vmem:[%s4285_s1 + $0x80] sm:$0xff] (!%p306_p3)   ;;  %3470 = vmatprep.subr.bf16.mxu1 (!%p306_p3), %v3561_v14  ;;  %v3564_v17 = vld [vmem:[%s4285_s1 + $0x88] sm:$0xff] (!%p306_p3)   ;;  %v3555_v18 = vld [vmem:[%s4285_s1 + $0x30] sm:$0xff] (!%p306_p3)  }
   0xc   : > { %3033 = vmatpush3.bf16.msra.mxu0 (!%p306_p3), %v3545_v3  ;;  %3478 = vmatpush3.bf16.msra.mxu1 (!%p306_p3), %v3562_v15  ;;  %v3568_v19 = vld [vmem:[%s4285_s1 + $0xd0] sm:$0xff] (!%p306_p3)   ;;  %v3556_v20 = vld [vmem:[%s4285_s1 + $0x78] sm:$0xff] (!%p306_p3)   ;;  %v3575_v26 = vld [vmem:[%s4285_s1 + $0xe0] sm:$0xff] (!%p306_p3)  }
   0xd   : > { %3034 = vmatprep.subr.bf16.mxu0 (!%p306_p3), %v3546_v4  ;;  %3471 = vmatprep.subr.bf16.mxu1 (!%p306_p3), %v3563_v16  ;;  %v3569_v21 = vld [vmem:[%s4285_s1 + $0x90] sm:$0xff] (!%p306_p3)   ;;  %v3570_v22 = vld [vmem:[%s4285_s1 + $0xd8] sm:$0xff] (!%p306_p3)   ;;  %v3576_v28 = vld [vmem:[%s4285_s1 + $0xa0] sm:$0xff] (!%p306_p3)  }
   0xe   : > { %s4298_s11 = smov (!%p356_p4, %s2723_s11), 63  ;;  %v3557_v23 = vld [vmem:[%s4285_s1 + $0x38] sm:$0xff]   ;;  %v3577_v29 = vld [vmem:[%s4285_s1 + $0xe8] sm:$0xff]   ;;  %v3582_v32 = vld [vmem:[%s4285_s1 + $0xf0] sm:$0xff]  }
   0xf   : > { %s2902_s26 = sshll.u32 %s4298_s11, 4  ;;  %v3571_v25 = vld [vmem:[%s4285_s1 + $0x98] sm:$0xff]   ;;  %v3578_v31 = vld [vmem:[%s4285_s1 + $0xa8] sm:$0xff]   ;;  %v3583_v35 = vld [vmem:[%s4285_s1 + $0xb0] sm:$0xff]   ;;  %s2727_s24 = sshll.u32 %s4298_s11, 2 }
  0x10   : > { %3035 = vmatpush3.bf16.msra.mxu0 %v3547_v5  ;;  %s3830_s13 = scalar_lea.vmem %s4284_s0, %s2902_s26  ;;  %3479 = vmatpush3.bf16.msra.mxu1 %v3564_v17  ;;  %v3584_v36 = vld [vmem:[%s4285_s1 + $0xf8] sm:$0xff]   ;;  %s4139_s27 = scalar_lea.vmem %s4286_s2, %s2727_s24 }
  0x11   : > { %3036 = vmatprep.subr.bf16.mxu0 %v3548_v6  ;;  %v3560_v12 = vld [vmem:[%s3830_s13 + $0x4] ss:$16 sps:$4 sm:$0xff]   ;;  %3472 = vmatprep.subr.bf16.mxu1 %v3568_v19  ;;  %v3558_v24 = vld [vmem:[%s3830_s13] ss:$16 sps:$4 sm:$0xff]   ;;  %v3590_v34 = vld [vmem:[%s3830_s13 + $0x8c] ss:$16 sps:$4 sm:$0xff]   ;;  %s4229_s14 = scalar_lea.vmem %s4292_s8, %s2727_s24 }
  0x12   : > { %1125 = vmatprep.mubr.bf16.mxu0 %v3560_v12  ;;  %v3565_v27 = vld [vmem:[%s3830_s13 + $0x24] ss:$16 sps:$4 sm:$0xff]   ;;  %v3567_v30 = vld [vmem:[%s3830_s13 + $0x20] ss:$16 sps:$4 sm:$0xff]   ;;  %1318 = vmatprep.mubr.bf16.mxu1 %v3590_v34  ;;  %v3585_v37 = vld [vmem:[%s4285_s1 + $0xb8] sm:$0xff]  }
  0x13   : > { %v3572_v33 = vld [vmem:[%s3830_s13 + $0x44] ss:$16 sps:$4 sm:$0xff]   ;;  %v3574_v38 = vld [vmem:[%s3830_s13 + $0x40] ss:$16 sps:$4 sm:$0xff]   ;;  %v3588_v40 = vld [vmem:[%s3830_s13 + $0x88] ss:$16 sps:$4 sm:$0xff]  }
  0x14   : > { %3037 = vmatpush3.bf16.msra.mxu0 %v3549_v7  ;;  %3480 = vmatpush3.bf16.msra.mxu1 %v3569_v21  ;;  %v3579_v39 = vld [vmem:[%s3830_s13 + $0x64] ss:$16 sps:$4 sm:$0xff]   ;;  %v3594_v41 = vld [vmem:[%s3830_s13 + $0xac] ss:$16 sps:$4 sm:$0xff]   ;;  %v3581_v42 = vld [vmem:[%s3830_s13 + $0x60] ss:$16 sps:$4 sm:$0xff]  }
  0x15   : > { %3038 = vmatprep.subr.bf16.mxu0 %v3550_v8  ;;  %3473 = vmatprep.subr.bf16.mxu1 %v3570_v22  ;;  %v3586_v43 = vld [vmem:[%s3830_s13 + $0x84] ss:$16 sps:$4 sm:$0xff]   ;;  %v3597_v44 = vld [vmem:[%s3830_s13 + $0xa8] ss:$16 sps:$4 sm:$0xff]   ;;  %v3600_v45 = vld [vmem:[%s3830_s13 + $0xcc] ss:$16 sps:$4 sm:$0xff]  }
  0x16   : > { %v3591_v46 = vld [vmem:[%s3830_s13 + $0x80] ss:$16 sps:$4 sm:$0xff]   ;;  %v3592_v47 = vld [vmem:[%s3830_s13 + $0xa4] ss:$16 sps:$4 sm:$0xff]   ;;  %v3603_v48 = vld [vmem:[%s3830_s13 + $0xc8] ss:$16 sps:$4 sm:$0xff]  }
  0x17   : > { %v3606_v49 = vld [vmem:[%s3830_s13 + $0xec] ss:$16 sps:$4 sm:$0xff]   ;;  %v3596_v50 = vld [vmem:[%s3830_s13 + $0xa0] ss:$16 sps:$4 sm:$0xff]   ;;  %v3598_v51 = vld [vmem:[%s3830_s13 + $0xc4] ss:$16 sps:$4 sm:$0xff]  }
  0x18   : > { %3039 = vmatpush3.bf16.msra.mxu0 %v3551_v9  ;;  %3481 = vmatpush3.bf16.msra.mxu1 %v3571_v25  ;;  %v3609_v52 = vld [vmem:[%s3830_s13 + $0xe8] ss:$16 sps:$4 sm:$0xff]   ;;  %v3612_v53 = vld [vmem:[%s3830_s13 + $0x10c] ss:$16 sps:$4 sm:$0xff]   ;;  %v3602_v54 = vld [vmem:[%s3830_s13 + $0xc0] ss:$16 sps:$4 sm:$0xff]  }
  0x19   : > { %3040 = vmatprep.subr.bf16.mxu0 %v3552_v10  ;;  %3474 = vmatprep.subr.bf16.mxu1 %v3575_v26  ;;  %v3604_v55 = vld [vmem:[%s3830_s13 + $0xe4] ss:$16 sps:$4 sm:$0xff]   ;;  %v3615_v56 = vld [vmem:[%s3830_s13 + $0x108] ss:$16 sps:$4 sm:$0xff]   ;;  %v3618_v57 = vld [vmem:[%s3830_s13 + $0x12c] ss:$16 sps:$4 sm:$0xff]  }
  0x1a   : > { %v3608_v58 = vld [vmem:[%s3830_s13 + $0xe0] ss:$16 sps:$4 sm:$0xff]   ;;  %v3610_v59 = vld [vmem:[%s3830_s13 + $0x104] ss:$16 sps:$4 sm:$0xff]   ;;  %v3621_v60 = vld [vmem:[%s3830_s13 + $0x128] ss:$16 sps:$4 sm:$0xff]  }
  0x1b   : > { %v3624_v61 = vld [vmem:[%s3830_s13 + $0x14c] ss:$16 sps:$4 sm:$0xff]   ;;  %v3614_v62 = vld [vmem:[%s3830_s13 + $0x100] ss:$16 sps:$4 sm:$0xff]   ;;  %v3616_v63 = vld [vmem:[%s3830_s13 + $0x124] ss:$16 sps:$4 sm:$0xff]  }
  0x1c   : > { %3041 = vmatpush3.bf16.msra.mxu0 %v3553_v11  ;;  %3482 = vmatpush3.bf16.msra.mxu1 %v3576_v28  ;;  %v3627_v0 = vld [vmem:[%s3830_s13 + $0x148] ss:$16 sps:$4 sm:$0xff]   ;;  %v3630_v1 = vld [vmem:[%s3830_s13 + $0x16c] ss:$16 sps:$4 sm:$0xff]   ;;  %v3620_v2 = vld [vmem:[%s3830_s13 + $0x120] ss:$16 sps:$4 sm:$0xff]  }
  0x1d   : > { %3042 = vmatprep.subr.bf16.mxu0 %v3554_v13  ;;  %3475 = vmatprep.subr.bf16.mxu1 %v3577_v29  ;;  %v3622_v3 = vld [vmem:[%s3830_s13 + $0x144] ss:$16 sps:$4 sm:$0xff]   ;;  %v3633_v4 = vld [vmem:[%s3830_s13 + $0x168] ss:$16 sps:$4 sm:$0xff]   ;;  %v3636_v5 = vld [vmem:[%s3830_s13 + $0x18c] ss:$16 sps:$4 sm:$0xff]  }
  0x1e   : > { %v3626_v6 = vld [vmem:[%s3830_s13 + $0x140] ss:$16 sps:$4 sm:$0xff]   ;;  %v3628_v7 = vld [vmem:[%s3830_s13 + $0x164] ss:$16 sps:$4 sm:$0xff]   ;;  %v3639_v8 = vld [vmem:[%s3830_s13 + $0x188] ss:$16 sps:$4 sm:$0xff]  }
  0x1f   : > { %v3642_v9 = vld [vmem:[%s3830_s13 + $0x1ac] ss:$16 sps:$4 sm:$0xff]   ;;  %v3632_v10 = vld [vmem:[%s3830_s13 + $0x160] ss:$16 sps:$4 sm:$0xff]   ;;  %v3634_v11 = vld [vmem:[%s3830_s13 + $0x184] ss:$16 sps:$4 sm:$0xff]  }
  0x20   : > { %3043 = vmatpush3.bf16.msra.mxu0 %v3555_v18  ;;  %3483 = vmatpush3.bf16.msra.mxu1 %v3578_v31  ;;  %v3645_v12 = vld [vmem:[%s3830_s13 + $0x1a8] ss:$16 sps:$4 sm:$0xff]   ;;  %v3648_v13 = vld [vmem:[%s3830_s13 + $0x1cc] ss:$16 sps:$4 sm:$0xff]   ;;  %v3644_v18 = vld [vmem:[%s3830_s13 + $0x1a0] ss:$16 sps:$4 sm:$0xff]  }
  0x21   : > { %3044 = vmatprep.subr.bf16.mxu0 %v3556_v20  ;;  %3476 = vmatprep.subr.bf16.mxu1 %v3582_v32  ;;  %v3657_v20 = vld [vmem:[%s3830_s13 + $0x1e8] ss:$16 sps:$4 sm:$0xff]   ;;  %v3672_v34 = vld [vmem:[%s4287_s3 + $0x10] sm:$0xff]  }
  0x24   : > { %3045 = vmatpush3.bf16.msra.mxu0 %v3557_v23  ;;  %3484 = vmatpush3.bf16.msra.mxu1 %v3583_v35  ;;  %v3656_v23 = vld [vmem:[%s3830_s13 + $0x1e0] ss:$16 sps:$4 sm:$0xff]  }
  0x25   : > { %3142 = vmatprep.subr.bf16.mxu0 %v3561_v14  ;;  %3477 = vmatprep.subr.bf16.mxu1 %v3584_v36  ;;  %v3638_v14 = vld [vmem:[%s3830_s13 + $0x180] ss:$16 sps:$4 sm:$0xff]  }
  0x27   : > { %1126 = vmatmul.mubr.bf16.vlgmr.msra.gmra.mrb[0].mxu0 %v3558_v24  ;;  %v3660_v24 = vld [vmem:[%s3830_s13 + $0xc] ss:$16 sps:$4 sm:$0xff]  }
  0x28   : > { %3143 = vmatpush3.bf16.msra.mxu0 %v3562_v15  ;;  %1133 = vmatprep.mubr.bf16.mxu0 %v3565_v27  ;;  %v3640_v15 = vld [vmem:[%s3830_s13 + $0x1a4] ss:$16 sps:$4 sm:$0xff]   ;;  %v3663_v27 = vld [vmem:[%s3830_s13 + $0x28] ss:$16 sps:$4 sm:$0xff]  }
  0x29   : > { %3144 = vmatprep.subr.bf16.mxu0 %v3563_v16  ;;  %3485 = vmatpush3.bf16.msra.mxu1 %v3585_v37  ;;  %v3651_v16 = vld [vmem:[%s3830_s13 + $0x1c8] ss:$16 sps:$4 sm:$0xff]  }
  0x2c   : > { %3145 = vmatpush3.bf16.msra.mxu0 %v3564_v17  ;;  %1319 = vmatmul.mubr.bf16.vlgmr.msra.gmra.mrb[0].mxu1 %v3588_v40  ;;  %v3654_v17 = vld [vmem:[%s3830_s13 + $0x1ec] ss:$16 sps:$4 sm:$0xff]  }
  0x2d   : > { %3146 = vmatprep.subr.bf16.mxu0 %v3568_v19  ;;  %1326 = vmatprep.mubr.bf16.mxu1 %v3594_v41  ;;  %v3646_v19 = vld [vmem:[%s3830_s13 + $0x1c4] ss:$16 sps:$4 sm:$0xff]  }
  0x2f   : > { %1134 = vmatmul.mubr.bf16.gmra.mrb[4].mxu0 %v3567_v30  ;;  %v3667_v30 = vld [vmem:[%s3830_s13 + $0x6c] ss:$16 sps:$4 sm:$0xff]  }
  0x30   : > { %1141 = vmatprep.mubr.bf16.mxu0 %v3572_v33  ;;  %3147 = vmatpush3.bf16.msra.mxu0 %v3569_v21  ;;  %v3650_v21 = vld [vmem:[%s3830_s13 + $0x1c0] ss:$16 sps:$4 sm:$0xff]   ;;  %v3671_v33 = vld [vmem:[%s4287_s3 + $0x8] sm:$0xff]  }
  0x31   : > { %3148 = vmatprep.subr.bf16.mxu0 %v3570_v22  ;;  %v3652_v22 = vld [vmem:[%s3830_s13 + $0x1e4] ss:$16 sps:$4 sm:$0xff]  }
  0x34   : > { %3149 = vmatpush3.bf16.msra.mxu0 %v3571_v25  ;;  %1327 = vmatmul.mubr.bf16.gmra.mrb[4].mxu1 %v3597_v44  ;;  %v3658_v25 = vld [vmem:[%s3830_s13 + $0x8] ss:$16 sps:$4 sm:$0xff]  }
  0x35   : > { %3150 = vmatprep.subr.bf16.mxu0 %v3575_v26  ;;  %1334 = vmatprep.mubr.bf16.mxu1 %v3600_v45  ;;  %v3661_v26 = vld [vmem:[%s3830_s13 + $0x2c] ss:$16 sps:$4 sm:$0xff]   ;;  %v3676_v45 = vld [vmem:[%s4287_s3 + $0x30] sm:$0xff]  }
  0x37   : > { %1142 = vmatmul.mubr.bf16.gmra.mrb[8].mxu0 %v3574_v38 }
  0x38   : > { %1149 = vmatprep.mubr.bf16.mxu0 %v3579_v39  ;;  %3151 = vmatpush3.bf16.msra.mxu0 %v3576_v28  ;;  %v3664_v28 = vld [vmem:[%s3830_s13 + $0x4c] ss:$16 sps:$4 sm:$0xff]  }
  0x39   : > { %3152 = vmatprep.subr.bf16.mxu0 %v3577_v29  ;;  %v3666_v29 = vld [vmem:[%s3830_s13 + $0x48] ss:$16 sps:$4 sm:$0xff]  }
  0x3c   : > { %3153 = vmatpush3.bf16.msra.mxu0 %v3578_v31  ;;  %1335 = vmatmul.mubr.bf16.gmra.mrb[8].mxu1 %v3603_v48  ;;  %v3669_v31 = vld [vmem:[%s3830_s13 + $0x68] ss:$16 sps:$4 sm:$0xff]  }
  0x3d   : > { %3154 = vmatprep.subr.bf16.mxu0 %v3582_v32  ;;  %1342 = vmatprep.mubr.bf16.mxu1 %v3606_v49  ;;  %v3670_v32 = vld [vmem:[%s4287_s3] sm:$0xff]  }
  0x3f   : > { %1150 = vmatmul.mubr.bf16.gmra.mrb[12].mxu0 %v3581_v42 }
  0x40   : > { %1157 = vmatprep.mubr.bf16.mxu0 %v3586_v43  ;;  %3155 = vmatpush3.bf16.msra.mxu0 %v3583_v35  ;;  %v3673_v35 = vld [vmem:[%s4287_s3 + $0x18] sm:$0xff]   ;;  %v3675_v43 = vld [vmem:[%s4287_s3 + $0x28] sm:$0xff]  }
  0x41   : > { %3156 = vmatprep.subr.bf16.mxu0 %v3584_v36 }
  0x44   : > { %3157 = vmatpush3.bf16.msra.mxu0 %v3585_v37  ;;  %1343 = vmatmul.mubr.bf16.gmra.mrb[12].mxu1 %v3609_v52  ;;  %v3674_v37 = vld [vmem:[%s4287_s3 + $0x20] sm:$0xff]  }
  0x45   : > { %1350 = vmatprep.mubr.bf16.mxu1 %v3612_v53  ;;  %3326 = vmatprep.subr.bf16.mxu0 %v3670_v32 }
  0x47   : > { %1158 = vmatmul.mubr.bf16.gmra.mrb[16].mxu0 %v3591_v46 }
  0x48   : > { %1165 = vmatprep.mubr.bf16.mxu0 %v3592_v47 }
  0x4c   : > { %1351 = vmatmul.mubr.bf16.gmra.mrb[16].mxu1 %v3615_v56 }
  0x4d   : > { %1358 = vmatprep.mubr.bf16.mxu1 %v3618_v57 }
  0x4f   : > { %1166 = vmatmul.mubr.bf16.gmra.mrb[20].mxu0 %v3596_v50 }
  0x50   : > { %1173 = vmatprep.mubr.bf16.mxu0 %v3598_v51  ;;  %v3677_v51 = vld [vmem:[%s4287_s3 + $0x38] sm:$0xff]  }
  0x54   : > { %1359 = vmatmul.mubr.bf16.gmra.mrb[20].mxu1 %v3621_v60 }
  0x55   : > { %1366 = vmatprep.mubr.bf16.mxu1 %v3624_v61 }
  0x57   : > { %1174 = vmatmul.mubr.bf16.gmra.mrb[24].mxu0 %v3602_v54 }
  0x58   : > { %1181 = vmatprep.mubr.bf16.mxu0 %v3604_v55 }
  0x5c   : > { %1367 = vmatmul.mubr.bf16.gmra.mrb[24].mxu1 %v3627_v0 }
  0x5d   : > { %1374 = vmatprep.mubr.bf16.mxu1 %v3630_v1 }
  0x5f   : > { %1182 = vmatmul.mubr.bf16.gmra.mrb[28].mxu0 %v3608_v58 }
  0x60   : > { %1189 = vmatprep.mubr.bf16.mxu0 %v3610_v59 }
  0x64   : > { %1375 = vmatmul.mubr.bf16.gmra.mrb[28].mxu1 %v3633_v4 }
  0x65   : > { %1382 = vmatprep.mubr.bf16.mxu1 %v3636_v5 }
  0x67   : > { %1190 = vmatmul.mubr.bf16.gmra.mrb[32].mxu0 %v3614_v62 }
  0x68   : > { %1197 = vmatprep.mubr.bf16.mxu0 %v3616_v63 }
  0x6c   : > { %1383 = vmatmul.mubr.bf16.gmra.mrb[32].mxu1 %v3639_v8 }
  0x6d   : > { %1390 = vmatprep.mubr.bf16.mxu1 %v3642_v9 }
  0x6f   : > { %1198 = vmatmul.mubr.bf16.gmra.mrb[36].mxu0 %v3620_v2 }
  0x70   : > { %1205 = vmatprep.mubr.bf16.mxu0 %v3622_v3 }
  0x74   : > { %1391 = vmatmul.mubr.bf16.gmra.mrb[36].mxu1 %v3645_v12 }
  0x75   : > { %1398 = vmatprep.mubr.bf16.mxu1 %v3648_v13 }
  0x77   : > { %1206 = vmatmul.mubr.bf16.gmra.mrb[40].mxu0 %v3626_v6 }
  0x78   : > { %1213 = vmatprep.mubr.bf16.mxu0 %v3628_v7 }
  0x7c   : > { %1399 = vmatmul.mubr.bf16.gmra.mrb[40].mxu1 %v3651_v16 }
  0x7d   : > { %1406 = vmatprep.mubr.bf16.mxu1 %v3654_v17 }
  0x7f   : > { %1214 = vmatmul.mubr.bf16.gmra.mrb[44].mxu0 %v3632_v10 }
  0x80   : > { %1221 = vmatprep.mubr.bf16.mxu0 %v3634_v11 }
  0x84   : > { %1407 = vmatmul.mubr.bf16.gmra.mrb[44].mxu1 %v3657_v20 }
  0x87   : > { %1222 = vmatmul.mubr.bf16.gmra.mrb[48].mxu0 %v3638_v14 }
  0x88   : > { %1229 = vmatprep.mubr.bf16.mxu0 %v3640_v15 }
  0x8f   : > { %1230 = vmatmul.mubr.bf16.gmra.mrb[52].mxu0 %v3644_v18 }
  0x90   : > { %1237 = vmatprep.mubr.bf16.mxu0 %v3646_v19 }
  0x97   : > { %1238 = vmatmul.mubr.bf16.gmra.mrb[56].mxu0 %v3650_v21 }
  0x98   : > { %1245 = vmatprep.mubr.bf16.mxu0 %v3652_v22 }
  0x9f   : > { %1246 = vmatmul.mubr.bf16.gmra.mrb[60].mxu0 %v3656_v23 }
  0xa0   : > { %1286 = vmatprep.mubr.bf16.mxu0 %v3660_v24 }
  0xa7   : > { %1287 = vmatmul.mubr.bf16.vlgmr.msra.gmra.mrb[64].mxu0 %v3658_v25 }
  0xa8   : > { %1294 = vmatprep.mubr.bf16.mxu0 %v3661_v26  ;;  %3327 = vmatpush3.bf16.msra.mxu0 %v3670_v32 }
  0xa9   : > { %3328 = vmatprep.subr.bf16.mxu0 %v3671_v33 }
  0xac   : > { %3329 = vmatpush3.bf16.msra.mxu0 %v3671_v33 }
  0xad   : > { %3330 = vmatprep.subr.bf16.mxu0 %v3672_v34 }
  0xaf   : > { %1295 = vmatmul.mubr.bf16.gmra.mrb[68].mxu0 %v3663_v27 }
  0xb0   : > { %1302 = vmatprep.mubr.bf16.mxu0 %v3664_v28  ;;  %3331 = vmatpush3.bf16.msra.mxu0 %v3672_v34 }
  0xb1   : > { %3332 = vmatprep.subr.bf16.mxu0 %v3673_v35 }
  0xb4   : > { %3333 = vmatpush3.bf16.msra.mxu0 %v3673_v35 }
  0xb5   : > { %3334 = vmatprep.subr.bf16.mxu0 %v3674_v37 }
  0xb7   : > { %1303 = vmatmul.mubr.bf16.gmra.mrb[72].mxu0 %v3666_v29 }
  0xb8   : > { %1310 = vmatprep.mubr.bf16.mxu0 %v3667_v30  ;;  %3335 = vmatpush3.bf16.msra.mxu0 %v3674_v37 }
  0xb9   : > { %3336 = vmatprep.subr.bf16.mxu0 %v3675_v43 }
  0xbc   : > { %3337 = vmatpush3.bf16.msra.mxu0 %v3675_v43 }
  0xbd   : > { %3338 = vmatprep.subr.bf16.mxu0 %v3676_v45 }
  0xbf   : > { %1311 = vmatmul.mubr.bf16.gmra.mrb[76].mxu0 %v3669_v31 }
  0xc0   : > { %3339 = vmatpush3.bf16.msra.mxu0 %v3676_v45 }
  0xc1   : > { %3340 = vmatprep.subr.bf16.mxu0 %v3677_v51 }
  0xc4   : > { %3341 = vmatpush3.bf16.msra.mxu0 %v3677_v51 }
  0xfa   : > { %v3046_v36 = vpop.f32.mrb[0].mxu0 }
  0xfb   : > { %v3047_v38 = vpop.f32.mrb[1].mxu0 }
  0xfc   : > { %v3980_v39 = vadd.f32 %v3047_v38, %v3046_v36  ;;  %v3049_v40 = vpop.f32.mrb[2].mxu0 }
  0xfd   : > { %v3050_v41 = vpop.f32.mrb[3].mxu0 }
  0xfe   : > { %v3982_v42 = vadd.f32 %v3050_v41, %v3049_v40 }
  0xff   : > { %v3182_v56 = vpop.f32.mrb[0].mxu1 }
 0x100   : > { %v3183_v58 = vpop.f32.mrb[1].mxu1 }
 0x101   : > { %v3184_v60 = vadd.f32 %v3183_v58, %v3182_v56  ;;  %v3185_v61 = vpop.f32.mrb[2].mxu1 }
 0x102   : > { %v3052_v44 = vpop.f32.mrb[4].mxu0  ;;  %v3186_v62 = vpop.f32.mrb[3].mxu1 }
 0x103   : > { %v3053_v46 = vpop.f32.mrb[5].mxu0  ;;  %v3187_v63 = vadd.f32 %v3186_v62, %v3185_v61 }
 0x104   : > { %v3990_v47 = vadd.f32 %v3053_v46, %v3052_v44  ;;  %v3055_v48 = vpop.f32.mrb[6].mxu0 }
 0x105   : > { %v3056_v49 = vpop.f32.mrb[7].mxu0 }
 0x106   : > { %v3992_v50 = vadd.f32 %v3056_v49, %v3055_v48 }
 0x107   : > { %v3188_v4 = vpop.f32.mrb[4].mxu1 }
 0x108   : > { %v3189_v6 = vpop.f32.mrb[5].mxu1 }
 0x109   : > { %v3190_v8 = vadd.f32 %v3189_v6, %v3188_v4  ;;  %v3191_v9 = vpop.f32.mrb[6].mxu1 }
 0x10a   : > { %v3058_v52 = vpop.f32.mrb[8].mxu0  ;;  %v3192_v10 = vpop.f32.mrb[7].mxu1 }
 0x10b   : > { %v3059_v53 = vpop.f32.mrb[9].mxu0  ;;  %v3193_v11 = vadd.f32 %v3192_v10, %v3191_v9 }
 0x10c   : > { %v3997_v54 = vadd.f32 %v3059_v53, %v3058_v52  ;;  %v3061_v55 = vpop.f32.mrb[10].mxu0 }
 0x10d   : > { %v3062_v57 = vpop.f32.mrb[11].mxu0 }
 0x10e   : > { %v3999_v59 = vadd.f32 %v3062_v57, %v3061_v55 }
 0x10f   : > { %v3194_v16 = vpop.f32.mrb[8].mxu1 }
 0x110   : > { %v3195_v18 = vpop.f32.mrb[9].mxu1 }
 0x111   : > { %v3196_v21 = vadd.f32 %v3195_v18, %v3194_v16  ;;  %v3197_v22 = vpop.f32.mrb[10].mxu1 }
 0x112   : > { %v3064_v0 = vpop.f32.mrb[12].mxu0  ;;  %v3198_v23 = vpop.f32.mrb[11].mxu1 }
 0x113   : > { %v3065_v1 = vpop.f32.mrb[13].mxu0  ;;  %v3199_v25 = vadd.f32 %v3198_v23, %v3197_v22 }
 0x114   : > { %v4001_v2 = vadd.f32 %v3065_v1, %v3064_v0  ;;  %v3067_v3 = vpop.f32.mrb[14].mxu0 }
 0x115   : > { %v3068_v5 = vpop.f32.mrb[15].mxu0 }
 0x116   : > { %v4003_v7 = vadd.f32 %v3068_v5, %v3067_v3 }
 0x117   : > { %v3200_v31 = vpop.f32.mrb[12].mxu1 }
 0x118   : > { %v3201_v33 = vpop.f32.mrb[13].mxu1 }
 0x119   : > { %v3202_v36 = vadd.f32 %v3201_v33, %v3200_v31  ;;  %v3203_v37 = vpop.f32.mrb[14].mxu1 }
 0x11a   : > { %v3070_v12 = vpop.f32.mrb[16].mxu0  ;;  %v3204_v38 = vpop.f32.mrb[15].mxu1 }
 0x11b   : > { %v3071_v13 = vpop.f32.mrb[17].mxu0  ;;  %v3205_v41 = vadd.f32 %v3204_v38, %v3203_v37 }
 0x11c   : > { %v3072_v14 = vadd.f32 %v3071_v13, %v3070_v12  ;;  %v3073_v15 = vpop.f32.mrb[18].mxu0 }
 0x11d   : > { %v3074_v17 = vpop.f32.mrb[19].mxu0 }
 0x11e   : > { %v4005_v19 = vadd.f32 %v3184_v60, %v3072_v14  ;;  %v3075_v20 = vadd.f32 %v3074_v17, %v3073_v15 }
 0x11f   : > { %v3206_v49 = vpop.f32.mrb[16].mxu1 }
 0x120   : > { %v4007_v24 = vadd.f32 %v3187_v63, %v3075_v20  ;;  %v3207_v52 = vpop.f32.mrb[17].mxu1 }
 0x121   : > { %v3208_v56 = vadd.f32 %v3207_v52, %v3206_v49  ;;  %v3209_v57 = vpop.f32.mrb[18].mxu1 }
 0x122   : > { %v3076_v26 = vpop.f32.mrb[20].mxu0  ;;  %v1518_v27 = vpack.c.bf16 %v4007_v24, %v4005_v19  ;;  %v3210_v58 = vpop.f32.mrb[19].mxu1 }
 0x123   : > { %v3077_v28 = vpop.f32.mrb[21].mxu0  ;;  %v3211_v61 = vadd.f32 %v3210_v58, %v3209_v57 }
 0x124   : > { %v3078_v29 = vadd.f32 %v3077_v28, %v3076_v26  ;;  %v3079_v30 = vpop.f32.mrb[22].mxu0 }
 0x125   : > { %v3080_v32 = vpop.f32.mrb[23].mxu0 }
 0x126   : > { %v4011_v34 = vadd.f32 %v3190_v8, %v3078_v29  ;;  %v3081_v35 = vadd.f32 %v3080_v32, %v3079_v30 }
 0x127   : > { %v3212_v4 = vpop.f32.mrb[20].mxu1 }
 0x128   : > { %v4013_v40 = vadd.f32 %v3193_v11, %v3081_v35  ;;  %v3213_v6 = vpop.f32.mrb[21].mxu1 }
 0x129   : > { %v3214_v10 = vadd.f32 %v3213_v6, %v3212_v4  ;;  %v3215_v11 = vpop.f32.mrb[22].mxu1  ;;  %v3679_v4 = vld [vmem:[%s4290_s6 + $0x8] sm:$0xff]  }
 0x12a   : > { %v3082_v43 = vpop.f32.mrb[24].mxu0  ;;  %v1519_v44 = vpack.c.bf16 %v4013_v40, %v4011_v34  ;;  %v3216_v12 = vpop.f32.mrb[23].mxu1 }
 0x12b   : > { %v3083_v45 = vpop.f32.mrb[25].mxu0  ;;  %v3217_v14 = vadd.f32 %v3216_v12, %v3215_v11 }
 0x12c   : > { %v3084_v46 = vadd.f32 %v3083_v45, %v3082_v43  ;;  %v3085_v48 = vpop.f32.mrb[26].mxu0 }
 0x12d   : > { %v3086_v51 = vpop.f32.mrb[27].mxu0 }
 0x12e   : > { %v4017_v53 = vadd.f32 %v3196_v21, %v3084_v46  ;;  %v3087_v55 = vadd.f32 %v3086_v51, %v3085_v48 }
 0x12f   : > { %v3218_v21 = vpop.f32.mrb[24].mxu1 }
 0x130   : > { %v4019_v60 = vadd.f32 %v3199_v25, %v3087_v55  ;;  %v3219_v23 = vpop.f32.mrb[25].mxu1 }
 0x131   : > { %v3220_v28 = vadd.f32 %v3219_v23, %v3218_v21  ;;  %v3221_v29 = vpop.f32.mrb[26].mxu1 }
 0x132   : > { %v3088_v62 = vpop.f32.mrb[28].mxu0  ;;  %v1520_v63 = vpack.c.bf16 %v4019_v60, %v4017_v53  ;;  %v3222_v30 = vpop.f32.mrb[27].mxu1 }
 0x133   : > { %v3089_v0 = vpop.f32.mrb[29].mxu0  ;;  %v3223_v32 = vadd.f32 %v3222_v30, %v3221_v29  ;;  %v3681_v29 = vld [vmem:[%s4290_s6 + $0x18] sm:$0xff]  }
 0x134   : > { %v3090_v1 = vadd.f32 %v3089_v0, %v3088_v62  ;;  %v3091_v3 = vpop.f32.mrb[30].mxu0 }
 0x135   : > { %v3092_v5 = vpop.f32.mrb[31].mxu0 }
 0x136   : > { %v4023_v8 = vadd.f32 %v3202_v36, %v3090_v1  ;;  %v3093_v9 = vadd.f32 %v3092_v5, %v3091_v3  ;;  %v3678_v3 = vld [vmem:[%s4290_s6] sm:$0xff]  }
 0x137   : > { %3374 = vmatprep.subr.bf16.mxu1 %v3678_v3 }
 0x138   : > { %v4025_v13 = vadd.f32 %v3205_v41, %v3093_v9  ;;  %v3224_v41 = vpop.f32.mrb[28].mxu1  ;;  %3375 = vmatpush3.bf16.msra.mxu1 %v3678_v3 }
 0x139   : > { %v3225_v45 = vpop.f32.mrb[29].mxu1  ;;  %3376 = vmatprep.subr.bf16.mxu1 %v3679_v4 }
 0x13a   : > { %v3094_v15 = vpop.f32.mrb[32].mxu0  ;;  %v1521_v16 = vpack.c.bf16 %v4025_v13, %v4023_v8  ;;  %v3226_v49 = vadd.f32 %v3225_v45, %v3224_v41  ;;  %v3227_v51 = vpop.f32.mrb[30].mxu1 }
 0x13b   : > { %v3095_v17 = vpop.f32.mrb[33].mxu0  ;;  %v3228_v52 = vpop.f32.mrb[31].mxu1 }
 0x13c   : > { %v3096_v18 = vadd.f32 %v3095_v17, %v3094_v15  ;;  %v3097_v20 = vpop.f32.mrb[34].mxu0  ;;  %3377 = vmatpush3.bf16.msra.mxu1 %v3679_v4 }
 0x13d   : > { %v3098_v22 = vpop.f32.mrb[35].mxu0 }
 0x13e   : > { %v4029_v25 = vadd.f32 %v3208_v56, %v3096_v18  ;;  %v3099_v26 = vadd.f32 %v3098_v22, %v3097_v20  ;;  %v3229_v56 = vadd.f32 %v3228_v52, %v3227_v51  ;;  %v3680_v18 = vld [vmem:[%s4290_s6 + $0x10] sm:$0xff]  }
 0x13f   : > { %v3230_v1 = vpop.f32.mrb[32].mxu1  ;;  %3378 = vmatprep.subr.bf16.mxu1 %v3680_v18 }
 0x140   : > { %v4031_v31 = vadd.f32 %v3211_v61, %v3099_v26  ;;  %v3231_v6 = vpop.f32.mrb[33].mxu1  ;;  %3379 = vmatpush3.bf16.msra.mxu1 %v3680_v18  ;;  %v3684_v18 = vld [vmem:[%s4290_s6 + $0x30] sm:$0xff]  }
 0x141   : > { %v3232_v11 = vadd.f32 %v3231_v6, %v3230_v1  ;;  %v3233_v12 = vpop.f32.mrb[34].mxu1  ;;  %3380 = vmatprep.subr.bf16.mxu1 %v3681_v29 }
 0x142   : > { %v3100_v33 = vpop.f32.mrb[36].mxu0  ;;  %v1522_v35 = vpack.c.bf16 %v4031_v31, %v4029_v25  ;;  %v3687_v31 = vld [vmem:[%s4289_s5 + $0x8] sm:$0xff]  }
 0x143   : > { %v3101_v36 = vpop.f32.mrb[37].mxu0 }
 0x144   : > { %v3102_v37 = vadd.f32 %v3101_v36, %v3100_v33  ;;  %v3103_v38 = vpop.f32.mrb[38].mxu0  ;;  %3381 = vmatpush3.bf16.msra.mxu1 %v3681_v29 }
 0x145   : > { %v3104_v43 = vpop.f32.mrb[39].mxu0 }
 0x146   : > { %v4035_v46 = vadd.f32 %v3214_v10, %v3102_v37  ;;  %v3105_v48 = vadd.f32 %v3104_v43, %v3103_v38 }
 0x148   : > { %v4037_v55 = vadd.f32 %v3217_v14, %v3105_v48  ;;  %v3234_v14 = vpop.f32.mrb[35].mxu1  ;;  %v3682_v48 = vld [vmem:[%s4290_s6 + $0x20] sm:$0xff]  }
 0x149   : > { %v3235_v17 = vadd.f32 %v3234_v14, %v3233_v12  ;;  %3382 = vmatprep.subr.bf16.mxu1 %v3682_v48 }
 0x14a   : > { %v3106_v57 = vpop.f32.mrb[40].mxu0  ;;  %v1523_v58 = vpack.c.bf16 %v4037_v55, %v4035_v46  ;;  %3383 = vmatpush3.bf16.msra.mxu1 %v3682_v48 }
 0x14b   : > { %v3107_v61 = vpop.f32.mrb[41].mxu0 }
 0x14c   : > { %v3108_v62 = vadd.f32 %v3107_v61, %v3106_v57  ;;  %v3109_v0 = vpop.f32.mrb[42].mxu0 }
 0x14d   : > { %v3110_v5 = vpop.f32.mrb[43].mxu0 }
 0x14e   : > { %v4047_v9 = vadd.f32 %v3220_v28, %v3108_v62  ;;  %v3111_v10 = vadd.f32 %v3110_v5, %v3109_v0  ;;  %v3236_v28 = vpop.f32.mrb[36].mxu1 }
 0x150   : > { %v4049_v15 = vadd.f32 %v3223_v32, %v3111_v10  ;;  %v3237_v32 = vpop.f32.mrb[37].mxu1 }
 0x151   : > { %v3238_v37 = vadd.f32 %v3237_v32, %v3236_v28  ;;  %v3239_v38 = vpop.f32.mrb[38].mxu1 }
 0x152   : > { %v3112_v20 = vpop.f32.mrb[44].mxu0  ;;  %v1524_v21 = vpack.c.bf16 %v4049_v15, %v4047_v9  ;;  %v3240_v41 = vpop.f32.mrb[39].mxu1  ;;  %v3689_v9 = vld [vmem:[%s4289_s5 + $0x18] sm:$0xff]  }
 0x153   : > { %v3113_v22 = vpop.f32.mrb[45].mxu0  ;;  %v3241_v45 = vadd.f32 %v3240_v41, %v3239_v38  ;;  %v3242_v62 = vpop.f32.mrb[40].mxu1 }
 0x154   : > { %v3114_v23 = vadd.f32 %v3113_v22, %v3112_v20  ;;  %v3115_v26 = vpop.f32.mrb[46].mxu0  ;;  %v3243_v1 = vpop.f32.mrb[41].mxu1 }
 0x155   : > { %v3116_v30 = vpop.f32.mrb[47].mxu0  ;;  %v3244_v5 = vadd.f32 %v3243_v1, %v3242_v62  ;;  %v3245_v6 = vpop.f32.mrb[42].mxu1 }
 0x156   : > { %v4059_v33 = vadd.f32 %v3226_v49, %v3114_v23  ;;  %v3117_v36 = vadd.f32 %v3116_v30, %v3115_v26  ;;  %v3246_v10 = vpop.f32.mrb[43].mxu1 }
 0x157   : > { %v3247_v14 = vadd.f32 %v3246_v10, %v3245_v6  ;;  %v3248_v28 = vpop.f32.mrb[44].mxu1 }
 0x158   : > { %v4061_v43 = vadd.f32 %v3229_v56, %v3117_v36  ;;  %v3683_v56 = vld [vmem:[%s4290_s6 + $0x28] sm:$0xff]   ;;  %v3249_v30 = vpop.f32.mrb[45].mxu1 }
 0x159   : > { %3384 = vmatprep.subr.bf16.mxu1 %v3683_v56  ;;  %v3250_v36 = vadd.f32 %v3249_v30, %v3248_v28  ;;  %v3251_v38 = vpop.f32.mrb[46].mxu1 }
 0x15a   : > { %v3118_v51 = vpop.f32.mrb[48].mxu0  ;;  %v1525_v52 = vpack.c.bf16 %v4061_v43, %v4059_v33  ;;  %3385 = vmatpush3.bf16.msra.mxu1 %v3683_v56  ;;  %v3252_v41 = vpop.f32.mrb[47].mxu1 }
 0x15b   : > { %v3119_v57 = vpop.f32.mrb[49].mxu0  ;;  %3386 = vmatprep.subr.bf16.mxu1 %v3684_v18 }
 0x15c   : > { %v3120_v49 = vadd.f32 %v3119_v57, %v3118_v51  ;;  %v3121_v61 = vpop.f32.mrb[50].mxu0  ;;  %v3253_v51 = vadd.f32 %v3252_v41, %v3251_v38 }
 0x15d   : > { %v3122_v0 = vpop.f32.mrb[51].mxu0 }
 0x15e   : > { %v4071_v3 = vadd.f32 %v3232_v11, %v3120_v49  ;;  %v3123_v4 = vadd.f32 %v3122_v0, %v3121_v61  ;;  %3387 = vmatpush3.bf16.msra.mxu1 %v3684_v18 }
 0x160   : > { %v4073_v12 = vadd.f32 %v3235_v17, %v3123_v4 }
 0x162   : > { %v3124_v20 = vpop.f32.mrb[52].mxu0  ;;  %v1526_v22 = vpack.c.bf16 %v4073_v12, %v4071_v3 }
 0x163   : > { %v3125_v23 = vpop.f32.mrb[53].mxu0 }
 0x164   : > { %v3126_v11 = vadd.f32 %v3125_v23, %v3124_v20  ;;  %v3127_v26 = vpop.f32.mrb[54].mxu0 }
 0x165   : > { %v3128_v29 = vpop.f32.mrb[55].mxu0 }
 0x166   : > { %v4080_v17 = vadd.f32 %v3238_v37, %v3126_v11  ;;  %v3129_v32 = vadd.f32 %v3128_v29, %v3127_v26 }
 0x168   : > { %v4082_v48 = vadd.f32 %v3241_v45, %v3129_v32 }
 0x16a   : > { %v3130_v57 = vpop.f32.mrb[56].mxu0  ;;  %v1527_v49 = vpack.c.bf16 %v4082_v48, %v4080_v17 }
 0x16b   : > { %v3131_v61 = vpop.f32.mrb[57].mxu0 }
 0x16c   : > { %v3132_v62 = vadd.f32 %v3131_v61, %v3130_v57  ;;  %v3133_v56 = vpop.f32.mrb[58].mxu0 }
 0x16d   : > { %v3134_v0 = vpop.f32.mrb[59].mxu0 }
 0x16e   : > { %v4086_v1 = vadd.f32 %v3244_v5, %v3132_v62  ;;  %v3135_v37 = vadd.f32 %v3134_v0, %v3133_v56 }
 0x170   : > { %v1404_v4 = vadd.f32 %v3247_v14, %v3135_v37 }
 0x172   : > { %v3136_v6 = vpop.f32.mrb[60].mxu0  ;;  %v1528_v10 = vpack.c.bf16 %v1404_v4, %v4086_v1 }
 0x173   : > { %v3137_v20 = vpop.f32.mrb[61].mxu0 }
 0x174   : > { %v3138_v18 = vadd.f32 %v3137_v20, %v3136_v6  ;;  %v3139_v45 = vpop.f32.mrb[62].mxu0 }
 0x175   : > { %v3140_v23 = vpop.f32.mrb[63].mxu0 }
 0x176   : > { %v1409_v11 = vadd.f32 %v3250_v36, %v3138_v18  ;;  %v3141_v26 = vadd.f32 %v3140_v23, %v3139_v45 }
 0x178   : > { %v1412_v28 = vadd.f32 %v3253_v51, %v3141_v26 }
 0x17a   : > { %v3158_v29 = vpop.f32.mrb[64].mxu0  ;;  %v1529_v30 = vpack.c.bf16 %v1412_v28, %v1409_v11 }
 0x17b   : > { %v3159_v32 = vpop.f32.mrb[65].mxu0 }
 0x17c   : > { %v3160_v38 = vadd.f32 %v3159_v32, %v3158_v29  ;;  %v3161_v41 = vpop.f32.mrb[66].mxu0 }
 0x17d   : > { %v3162_v57 = vpop.f32.mrb[67].mxu0 }
 0x17e   : > { %v1289_v5 = vadd.f32 %v3160_v38, %v3980_v39  ;;  %v3163_v61 = vadd.f32 %v3162_v57, %v3161_v41 }
 0x180   : > { %v1292_v14 = vadd.f32 %v3163_v61, %v3982_v42 }
 0x182   : > { %v3164_v62 = vpop.f32.mrb[68].mxu0  ;;  %v1514_v56 = vpack.c.bf16 %v1292_v14, %v1289_v5 }
 0x183   : > { %v3165_v0 = vpop.f32.mrb[69].mxu0 }
 0x184   : > { %v3166_v1 = vadd.f32 %v3165_v0, %v3164_v62  ;;  %v3167_v37 = vpop.f32.mrb[70].mxu0  ;;  %3342 = vmatprep.mubr.bf16.mxu0 %v1514_v56  ;;  %v3691_v0 = vld [vmem:[%s4289_s5 + $0x28] sm:$0xff]  }
 0x185   : > { %v3168_v36 = vpop.f32.mrb[71].mxu0 }
 0x186   : > { %v1297_v51 = vadd.f32 %v3166_v1, %v3990_v47  ;;  %v3169_v4 = vadd.f32 %v3168_v36, %v3167_v37 }
 0x188   : > { %v1300_v6 = vadd.f32 %v3169_v4, %v3992_v50 }
 0x18a   : > { %v1515_v20 = vpack.c.bf16 %v1300_v6, %v1297_v51  ;;  %v3170_v18 = vpop.f32.mrb[72].mxu0 }
 0x18b   : > { %v3171_v45 = vpop.f32.mrb[73].mxu0 }
 0x18c   : > { %v3172_v23 = vadd.f32 %v3171_v45, %v3170_v18  ;;  %v3173_v39 = vpop.f32.mrb[74].mxu0  ;;  %3343 = vmatmul.mubr.bf16.vlgmr.msra.gmra.mrb[80].mxu0 %v1515_v20  ;;  %v3692_v18 = vld [vmem:[%s4289_s5 + $0x30] sm:$0xff]  }
 0x18d   : > { %v3174_v11 = vpop.f32.mrb[75].mxu0 }
 0x18e   : > { %v1305_v42 = vadd.f32 %v3172_v23, %v3997_v54  ;;  %v3175_v26 = vadd.f32 %v3174_v11, %v3173_v39  ;;  %v3685_v54 = vld [vmem:[%s4290_s6 + $0x38] sm:$0xff]  }
 0x18f   : > { %3388 = vmatprep.subr.bf16.mxu1 %v3685_v54 }
 0x190   : > { %v1308_v28 = vadd.f32 %v3175_v26, %v3999_v59  ;;  %3389 = vmatpush3.bf16.msra.mxu1 %v3685_v54  ;;  %v3686_v59 = vld [vmem:[%s4289_s5] sm:$0xff]  }
 0x191   : > { %3422 = vmatprep.subr.bf16.mxu1 %v3686_v59 }
 0x192   : > { %v3176_v29 = vpop.f32.mrb[76].mxu0  ;;  %v1516_v32 = vpack.c.bf16 %v1308_v28, %v1305_v42 }
 0x193   : > { %v3177_v38 = vpop.f32.mrb[77].mxu0 }
 0x194   : > { %v3178_v41 = vadd.f32 %v3177_v38, %v3176_v29  ;;  %v3179_v47 = vpop.f32.mrb[78].mxu0  ;;  %3346 = vmatprep.mubr.bf16.mxu0 %v1516_v32  ;;  %v3693_v29 = vld [vmem:[%s4289_s5 + $0x38] sm:$0xff]  }
 0x195   : > { %v3180_v57 = vpop.f32.mrb[79].mxu0 }
 0x196   : > { %v1313_v50 = vadd.f32 %v3178_v41, %v4001_v2  ;;  %v3181_v5 = vadd.f32 %v3180_v57, %v3179_v47  ;;  %v4144_v2 = vld [vmem:[%s4288_s4] ss:$0 sm:$0xff] }
 0x198   : > { %v1316_v61 = vadd.f32 %v3181_v5, %v4003_v7 }
 0x19a   : > { %v1517_v14 = vpack.c.bf16 %v1316_v61, %v1313_v50 }
 0x19c   : > { %3347 = vmatmul.mubr.bf16.gmra.mrb[84].mxu0 %v1517_v14 }
 0x19d   : > { %3350 = vmatprep.mubr.bf16.mxu0 %v1518_v27 }
 0x1a4   : > { %3351 = vmatmul.mubr.bf16.gmra.mrb[88].mxu0 %v1519_v44 }
 0x1a5   : > { %3354 = vmatprep.mubr.bf16.mxu0 %v1520_v63 }
 0x1ac   : > { %3355 = vmatmul.mubr.bf16.gmra.mrb[92].mxu0 %v1521_v16 }
 0x1ad   : > { %3358 = vmatprep.mubr.bf16.mxu0 %v1522_v35  ;;  %v3688_v35 = vld [vmem:[%s4289_s5 + $0x10] sm:$0xff]  }
 0x1b4   : > { %3359 = vmatmul.mubr.bf16.gmra.mrb[96].mxu0 %v1523_v58 }
 0x1b5   : > { %3362 = vmatprep.mubr.bf16.mxu0 %v1524_v21 }
 0x1bc   : > { %3363 = vmatmul.mubr.bf16.gmra.mrb[100].mxu0 %v1525_v52 }
 0x1bd   : > { %3366 = vmatprep.mubr.bf16.mxu0 %v1526_v22  ;;  %v3690_v22 = vld [vmem:[%s4289_s5 + $0x20] sm:$0xff]  }
 0x1c4   : > { %3367 = vmatmul.mubr.bf16.gmra.mrb[104].mxu0 %v1527_v49 }
 0x1c5   : > { %3370 = vmatprep.mubr.bf16.mxu0 %v1528_v10 }
 0x1cc   : > { %3371 = vmatmul.mubr.bf16.gmra.mrb[108].mxu0 %v1529_v30 }
 0x25f   : > { %v3344_v7 = vpop.f32.mrb[80].mxu0 }
 0x260   : > { %v1644_v19 = vadd.f32 %v3344_v7, %v4144_v2  ;;  %v1635_v24 = vpop.f32.mrb[81].mxu0 }
 0x261   : > { %v1636_v27 = vadd.f32 %v4144_v2, %v1635_v24  ;;  %v3345_v34 = vpop.f32.mrb[82].mxu0 }
 0x262   : > { %v1647_v40 = vadd.f32 %v3345_v34, %v4144_v2  ;;  %v1638_v44 = vpop.f32.mrb[83].mxu0  ;;  %v1764_v60 = vmax.f32 %v1644_v19, 0.0 }
 0x263   : > { %v1639_v53 = vadd.f32 %v4144_v2, %v1638_v44  ;;  %v1762_v8 = vmax.f32 %v1636_v27, 0.0 }
 0x264   : > { %v1765_v63 = vmax.f32 %v1647_v40, 0.0 }
 0x265   : > { %v1763_v13 = vmax.f32 %v1639_v53, 0.0 }
 0x266   : > { %v1843_v16 = vpack.c.bf16 %v1765_v63, %v1764_v60 }
 0x267   : > { %v1842_v25 = vpack.c.bf16 %v1763_v13, %v1762_v8 }
 0x269   : > { %3390 = vmatprep.mubr.bf16.mxu1 %v1842_v25 }
 0x26a   : > { %3391 = vmatmul.mubr.bf16.vlgmr.msra.gmra.mrb[48].mxu1 %v1843_v16 }
 0x26b   : > { %3423 = vmatpush3.bf16.msra.mxu1 %v3686_v59 }
 0x26c   : > { %3424 = vmatprep.subr.bf16.mxu1 %v3687_v31 }
 0x26f   : > { %v3348_v46 = vpop.f32.mrb[84].mxu0  ;;  %3425 = vmatpush3.bf16.msra.mxu1 %v3687_v31 }
 0x270   : > { %v1660_v55 = vadd.f32 %v3348_v46, %v4144_v2  ;;  %v1651_v58 = vpop.f32.mrb[85].mxu0  ;;  %3426 = vmatprep.subr.bf16.mxu1 %v3688_v35 }
 0x271   : > { %v1652_v15 = vadd.f32 %v4144_v2, %v1651_v58  ;;  %v3349_v21 = vpop.f32.mrb[86].mxu0 }
 0x272   : > { %v1663_v33 = vadd.f32 %v3349_v21, %v4144_v2  ;;  %v1654_v43 = vpop.f32.mrb[87].mxu0  ;;  %v1768_v3 = vmax.f32 %v1660_v55, 0.0 }
 0x273   : > { %v1655_v52 = vadd.f32 %v4144_v2, %v1654_v43  ;;  %3427 = vmatpush3.bf16.msra.mxu1 %v3688_v35  ;;  %v1766_v17 = vmax.f32 %v1652_v15, 0.0 }
 0x274   : > { %v1769_v12 = vmax.f32 %v1663_v33, 0.0  ;;  %3428 = vmatprep.subr.bf16.mxu1 %v3689_v9 }
 0x275   : > { %v1767_v48 = vmax.f32 %v1655_v52, 0.0 }
 0x276   : > { %v1845_v49 = vpack.c.bf16 %v1769_v12, %v1768_v3 }
 0x277   : > { %v1844_v10 = vpack.c.bf16 %v1767_v48, %v1766_v17  ;;  %v3352_v30 = vpop.f32.mrb[88].mxu0  ;;  %3429 = vmatpush3.bf16.msra.mxu1 %v3689_v9 }
 0x278   : > { %v1676_v62 = vadd.f32 %v3352_v30, %v4144_v2  ;;  %v1667_v56 = vpop.f32.mrb[89].mxu0  ;;  %3430 = vmatprep.subr.bf16.mxu1 %v3690_v22 }
 0x279   : > { %v1668_v1 = vadd.f32 %v4144_v2, %v1667_v56  ;;  %v3353_v37 = vpop.f32.mrb[90].mxu0  ;;  %3394 = vmatprep.mubr.bf16.mxu1 %v1844_v10 }
 0x27a   : > { %v1679_v36 = vadd.f32 %v3353_v37, %v4144_v2  ;;  %v1670_v51 = vpop.f32.mrb[91].mxu0  ;;  %3395 = vmatmul.mubr.bf16.gmra.mrb[52].mxu1 %v1845_v49  ;;  %v1772_v6 = vmax.f32 %v1676_v62, 0.0 }
 0x27b   : > { %v1671_v4 = vadd.f32 %v4144_v2, %v1670_v51  ;;  %3431 = vmatpush3.bf16.msra.mxu1 %v3690_v22  ;;  %v1770_v45 = vmax.f32 %v1668_v1, 0.0 }
 0x27c   : > { %v1773_v20 = vmax.f32 %v1679_v36, 0.0  ;;  %3432 = vmatprep.subr.bf16.mxu1 %v3691_v0 }
 0x27d   : > { %v1771_v23 = vmax.f32 %v1671_v4, 0.0 }
 0x27e   : > { %v1847_v39 = vpack.c.bf16 %v1773_v20, %v1772_v6 }
 0x27f   : > { %v1846_v11 = vpack.c.bf16 %v1771_v23, %v1770_v45  ;;  %v3356_v42 = vpop.f32.mrb[92].mxu0  ;;  %3433 = vmatpush3.bf16.msra.mxu1 %v3691_v0 }
 0x280   : > { %v1692_v26 = vadd.f32 %v3356_v42, %v4144_v2  ;;  %v1683_v28 = vpop.f32.mrb[93].mxu0  ;;  %3434 = vmatprep.subr.bf16.mxu1 %v3692_v18 }
 0x281   : > { %v1684_v32 = vadd.f32 %v4144_v2, %v1683_v28  ;;  %v3357_v38 = vpop.f32.mrb[94].mxu0  ;;  %3398 = vmatprep.mubr.bf16.mxu1 %v1846_v11 }
 0x282   : > { %v1695_v41 = vadd.f32 %v3357_v38, %v4144_v2  ;;  %v1686_v47 = vpop.f32.mrb[95].mxu0  ;;  %3399 = vmatmul.mubr.bf16.gmra.mrb[56].mxu1 %v1847_v39  ;;  %v1776_v50 = vmax.f32 %v1692_v26, 0.0 }
 0x283   : > { %v1687_v57 = vadd.f32 %v4144_v2, %v1686_v47  ;;  %3435 = vmatpush3.bf16.msra.mxu1 %v3692_v18  ;;  %v1774_v61 = vmax.f32 %v1684_v32, 0.0 }
 0x284   : > { %v1777_v5 = vmax.f32 %v1695_v41, 0.0  ;;  %3436 = vmatprep.subr.bf16.mxu1 %v3693_v29 }
 0x285   : > { %v1775_v14 = vmax.f32 %v1687_v57, 0.0  ;;  %v3694_v57 = vld [vmem:[%s4139_s27] sm:$0xff]  }
 0x286   : > { %v1849_v54 = vpack.c.bf16 %v1777_v5, %v1776_v50  ;;  %v3695_v50 = vld [vmem:[%s4139_s27 + $0x8] sm:$0xff]   ;;  %v3696_v5 = vld [vmem:[%s4139_s27 + $0x10] sm:$0xff]  }
 0x287   : > { %v1848_v59 = vpack.c.bf16 %v1775_v14, %v1774_v61  ;;  %v3360_v7 = vpop.f32.mrb[96].mxu0  ;;  %3437 = vmatpush3.bf16.msra.mxu1 %v3693_v29  ;;  %v3698_v61 = vld [vmem:[%s4139_s27 + $0x20] sm:$0xff]   ;;  %v3699_v14 = vld [vmem:[%s4139_s27 + $0x28] sm:$0xff]  }
 0x288   : > { %v1708_v19 = vadd.f32 %v3360_v7, %v4144_v2  ;;  %v1699_v24 = vpop.f32.mrb[97].mxu0  ;;  %v3702_v7 = vld [vmem:[%s4139_s27 + $0x40] sm:$0xff]  }
 0x289   : > { %v1700_v27 = vadd.f32 %v4144_v2, %v1699_v24  ;;  %v3361_v34 = vpop.f32.mrb[98].mxu0  ;;  %3402 = vmatprep.mubr.bf16.mxu1 %v1848_v59  ;;  %v3701_v59 = vld [vmem:[%s4139_s27 + $0x38] sm:$0xff]   ;;  %v3704_v24 = vld [vmem:[%s4139_s27 + $0x50] sm:$0xff]  }
 0x28a   : > { %v1711_v40 = vadd.f32 %v3361_v34, %v4144_v2  ;;  %v1702_v44 = vpop.f32.mrb[99].mxu0  ;;  %3403 = vmatmul.mubr.bf16.gmra.mrb[60].mxu1 %v1849_v54  ;;  %v1780_v60 = vmax.f32 %v1708_v19, 0.0  ;;  %v3700_v54 = vld [vmem:[%s4139_s27 + $0x30] sm:$0xff]   ;;  %v3703_v19 = vld [vmem:[%s4139_s27 + $0x48] sm:$0xff]   ;;  %v3706_v34 = vld [vmem:[%s4139_s27 + $0x60] sm:$0xff]  }
 0x28b   : > { %v1703_v53 = vadd.f32 %v4144_v2, %v1702_v44  ;;  %v1778_v8 = vmax.f32 %v1700_v27, 0.0  ;;  %v3705_v27 = vld [vmem:[%s4139_s27 + $0x58] sm:$0xff]   ;;  %v3708_v44 = vld [vmem:[%s4139_s27 + $0x70] sm:$0xff]  }
 0x28c   : > { %v1781_v63 = vmax.f32 %v1711_v40, 0.0  ;;  %v3707_v40 = vld [vmem:[%s4139_s27 + $0x68] sm:$0xff]  }
 0x28d   : > { %v1779_v13 = vmax.f32 %v1703_v53, 0.0  ;;  %v3709_v53 = vld [vmem:[%s4139_s27 + $0x78] sm:$0xff]  }
 0x28e   : > { %v1851_v16 = vpack.c.bf16 %v1781_v63, %v1780_v60  ;;  %v4218_v60 = vld [vmem:[%s4291_s7] ss:$0 sm:$0xff] }
 0x28f   : > { %v1850_v25 = vpack.c.bf16 %v1779_v13, %v1778_v8  ;;  %v3364_v31 = vpop.f32.mrb[100].mxu0 }
 0x290   : > { %v1724_v35 = vadd.f32 %v3364_v31, %v4144_v2  ;;  %v1715_v46 = vpop.f32.mrb[101].mxu0 }
 0x291   : > { %v1716_v55 = vadd.f32 %v4144_v2, %v1715_v46  ;;  %v3365_v58 = vpop.f32.mrb[102].mxu0  ;;  %3406 = vmatprep.mubr.bf16.mxu1 %v1850_v25 }
 0x292   : > { %v1727_v9 = vadd.f32 %v3365_v58, %v4144_v2  ;;  %v1718_v15 = vpop.f32.mrb[103].mxu0  ;;  %3407 = vmatmul.mubr.bf16.gmra.mrb[64].mxu1 %v1851_v16  ;;  %v1784_v33 = vmax.f32 %v1724_v35, 0.0 }
 0x293   : > { %v1719_v21 = vadd.f32 %v4144_v2, %v1718_v15  ;;  %v1782_v52 = vmax.f32 %v1716_v55, 0.0 }
 0x294   : > { %v1785_v43 = vmax.f32 %v1727_v9, 0.0 }
 0x295   : > { %v1783_v3 = vmax.f32 %v1719_v21, 0.0 }
 0x296   : > { %v1853_v12 = vpack.c.bf16 %v1785_v43, %v1784_v33 }
 0x297   : > { %v1852_v22 = vpack.c.bf16 %v1783_v3, %v1782_v52  ;;  %v3368_v17 = vpop.f32.mrb[104].mxu0 }
 0x298   : > { %v1740_v48 = vadd.f32 %v3368_v17, %v4144_v2  ;;  %v1731_v49 = vpop.f32.mrb[105].mxu0 }
 0x299   : > { %v1732_v10 = vadd.f32 %v4144_v2, %v1731_v49  ;;  %v3369_v30 = vpop.f32.mrb[106].mxu0  ;;  %3410 = vmatprep.mubr.bf16.mxu1 %v1852_v22 }
 0x29a   : > { %v1743_v62 = vadd.f32 %v3369_v30, %v4144_v2  ;;  %v1734_v56 = vpop.f32.mrb[107].mxu0  ;;  %3411 = vmatmul.mubr.bf16.gmra.mrb[68].mxu1 %v1853_v12  ;;  %v1788_v1 = vmax.f32 %v1740_v48, 0.0 }
 0x29b   : > { %v1735_v0 = vadd.f32 %v4144_v2, %v1734_v56  ;;  %v1786_v36 = vmax.f32 %v1732_v10, 0.0 }
 0x29c   : > { %v1789_v37 = vmax.f32 %v1743_v62, 0.0 }
 0x29d   : > { %v1787_v51 = vmax.f32 %v1735_v0, 0.0 }
 0x29e   : > { %v1855_v4 = vpack.c.bf16 %v1789_v37, %v1788_v1 }
 0x29f   : > { %v1854_v6 = vpack.c.bf16 %v1787_v51, %v1786_v36  ;;  %v3372_v20 = vpop.f32.mrb[108].mxu0 }
 0x2a0   : > { %v1756_v18 = vadd.f32 %v3372_v20, %v4144_v2  ;;  %v1747_v45 = vpop.f32.mrb[109].mxu0 }
 0x2a1   : > { %v1748_v23 = vadd.f32 %v4144_v2, %v1747_v45  ;;  %v3373_v39 = vpop.f32.mrb[110].mxu0  ;;  %3414 = vmatprep.mubr.bf16.mxu1 %v1854_v6 }
 0x2a2   : > { %v1759_v11 = vadd.f32 %v3373_v39, %v4144_v2  ;;  %v1750_v42 = vpop.f32.mrb[111].mxu0  ;;  %3415 = vmatmul.mubr.bf16.gmra.mrb[72].mxu1 %v1855_v4  ;;  %v1792_v28 = vmax.f32 %v1756_v18, 0.0 }
 0x2a3   : > { %v1751_v26 = vadd.f32 %v4144_v2, %v1750_v42  ;;  %v1790_v32 = vmax.f32 %v1748_v23, 0.0  ;;  %v3697_v2 = vld [vmem:[%s4139_s27 + $0x18] sm:$0xff]  }
 0x2a4   : > { %v1793_v29 = vmax.f32 %v1759_v11, 0.0 }
 0x2a5   : > { %v1791_v38 = vmax.f32 %v1751_v26, 0.0 }
 0x2a6   : > { %v1857_v41 = vpack.c.bf16 %v1793_v29, %v1792_v28 }
 0x2a7   : > { %v1856_v47 = vpack.c.bf16 %v1791_v38, %v1790_v32 }
 0x2a9   : > { %3418 = vmatprep.mubr.bf16.mxu1 %v1856_v47 }
 0x2aa   : > { %3419 = vmatmul.mubr.bf16.gmra.mrb[76].mxu1 %v1857_v41 }
 0x2ab   : > { %3438 = vmatprep.mubr.bf16.mxu1 %v3694_v57 }
 0x2b2   : > { %3439 = vmatmul.mubr.bf16.vlgmr.msra.gmra.mrb[48].mxu1 %v3695_v50 }
 0x2b3   : > { %3442 = vmatprep.mubr.bf16.mxu1 %v3696_v5 }
 0x2ba   : > { %3443 = vmatmul.mubr.bf16.gmra.mrb[52].mxu1 %v3697_v2 }
 0x2bb   : > { %3446 = vmatprep.mubr.bf16.mxu1 %v3698_v61 }
 0x2c2   : > { %3447 = vmatmul.mubr.bf16.gmra.mrb[56].mxu1 %v3699_v14 }
 0x2c3   : > { %3450 = vmatprep.mubr.bf16.mxu1 %v3700_v54 }
 0x2ca   : > { %3451 = vmatmul.mubr.bf16.gmra.mrb[60].mxu1 %v3701_v59 }
 0x2cb   : > { %3454 = vmatprep.mubr.bf16.mxu1 %v3702_v7 }
 0x2d2   : > { %3455 = vmatmul.mubr.bf16.gmra.mrb[64].mxu1 %v3703_v19 }
 0x2d3   : > { %3458 = vmatprep.mubr.bf16.mxu1 %v3704_v24 }
 0x2da   : > { %3459 = vmatmul.mubr.bf16.gmra.mrb[68].mxu1 %v3705_v27 }
 0x2db   : > { %3462 = vmatprep.mubr.bf16.mxu1 %v3706_v34 }
 0x2e2   : > { %3463 = vmatmul.mubr.bf16.gmra.mrb[72].mxu1 %v3707_v40 }
 0x2e3   : > { %3466 = vmatprep.mubr.bf16.mxu1 %v3708_v44 }
 0x2ea   : > { %3467 = vmatmul.mubr.bf16.gmra.mrb[76].mxu1 %v3709_v53 }
 0x385   : > { %v3440_v63 = vpop.f32.mrb[48].mxu1 }
 0x386   : > { %v2397_v8 = vadd.f32 %v3440_v63, %v4218_v60  ;;  %v2261_v13 = vpop.f32.mrb[49].mxu1 }
 0x387   : > { %v2395_v16 = vadd.f32 %v4218_v60, %v2261_v13  ;;  %v3441_v25 = vpop.f32.mrb[50].mxu1 }
 0x388   : > { %v2398_v31 = vadd.f32 %v3441_v25, %v4218_v60  ;;  %v2264_v35 = vpop.f32.mrb[51].mxu1  ;;  %v2429_v55 = vmax.f32 %v2397_v8, 0.0 }
 0x389   : > { %v2396_v46 = vadd.f32 %v4218_v60, %v2264_v35  ;;  %v2427_v9 = vmax.f32 %v2395_v16, 0.0 }
 0x38a   : > { %v2430_v58 = vmax.f32 %v2398_v31, 0.0 }
 0x38b   : > { %v2428_v15 = vmax.f32 %v2396_v46, 0.0 }
 0x38c   : > { %v2943_v21 = vpack.c.bf16 %v2430_v58, %v2429_v55 }
 0x38d   : > { %v2938_v33 = vpack.c.bf16 %v2428_v15, %v2427_v9  ;;  %v3444_v43 = vpop.f32.mrb[52].mxu1 }
 0x38e   : > { %3015 = vst [vmem:[%s4229_s14 + $0x8] sm:$0xff] %v2943_v21   ;;  %v2401_v52 = vadd.f32 %v3444_v43, %v4218_v60  ;;  %v2277_v3 = vpop.f32.mrb[53].mxu1 }
 0x38f   : > { %2939 = vst [vmem:[%s4229_s14] sm:$0xff] %v2938_v33   ;;  %v2399_v12 = vadd.f32 %v4218_v60, %v2277_v3  ;;  %v3445_v22 = vpop.f32.mrb[54].mxu1 }
 0x390   : > { %v2402_v17 = vadd.f32 %v3445_v22, %v4218_v60  ;;  %v2280_v48 = vpop.f32.mrb[55].mxu1  ;;  %v2433_v10 = vmax.f32 %v2401_v52, 0.0 }
 0x391   : > { %v2400_v49 = vadd.f32 %v4218_v60, %v2280_v48  ;;  %v2431_v62 = vmax.f32 %v2399_v12, 0.0 }
 0x392   : > { %v2434_v30 = vmax.f32 %v2402_v17, 0.0 }
 0x393   : > { %v2432_v56 = vmax.f32 %v2400_v49, 0.0 }
 0x394   : > { %v2953_v0 = vpack.c.bf16 %v2434_v30, %v2433_v10 }
 0x395   : > { %v2948_v1 = vpack.c.bf16 %v2432_v56, %v2431_v62  ;;  %v3448_v37 = vpop.f32.mrb[56].mxu1 }
 0x396   : > { %3017 = vst [vmem:[%s4229_s14 + $0x18] sm:$0xff] %v2953_v0   ;;  %v2405_v36 = vadd.f32 %v3448_v37, %v4218_v60  ;;  %v2293_v51 = vpop.f32.mrb[57].mxu1 }
 0x397   : > { %3016 = vst [vmem:[%s4229_s14 + $0x10] sm:$0xff] %v2948_v1   ;;  %v2403_v4 = vadd.f32 %v4218_v60, %v2293_v51  ;;  %v3449_v6 = vpop.f32.mrb[58].mxu1 }
 0x398   : > { %v2406_v20 = vadd.f32 %v3449_v6, %v4218_v60  ;;  %v2296_v18 = vpop.f32.mrb[59].mxu1  ;;  %v2437_v23 = vmax.f32 %v2405_v36, 0.0 }
 0x399   : > { %v2404_v45 = vadd.f32 %v4218_v60, %v2296_v18  ;;  %v2435_v11 = vmax.f32 %v2403_v4, 0.0 }
 0x39a   : > { %v2438_v39 = vmax.f32 %v2406_v20, 0.0 }
 0x39b   : > { %v2436_v42 = vmax.f32 %v2404_v45, 0.0 }
 0x39c   : > { %v2963_v26 = vpack.c.bf16 %v2438_v39, %v2437_v23 }
 0x39d   : > { %v2958_v28 = vpack.c.bf16 %v2436_v42, %v2435_v11  ;;  %v3452_v29 = vpop.f32.mrb[60].mxu1 }
 0x39e   : > { %3019 = vst [vmem:[%s4229_s14 + $0x28] sm:$0xff] %v2963_v26   ;;  %v2409_v32 = vadd.f32 %v3452_v29, %v4218_v60  ;;  %v2309_v38 = vpop.f32.mrb[61].mxu1 }
 0x39f   : > { %3018 = vst [vmem:[%s4229_s14 + $0x20] sm:$0xff] %v2958_v28   ;;  %v2407_v41 = vadd.f32 %v4218_v60, %v2309_v38  ;;  %v3453_v47 = vpop.f32.mrb[62].mxu1 }
 0x3a0   : > { %v2410_v57 = vadd.f32 %v3453_v47, %v4218_v60  ;;  %v2312_v50 = vpop.f32.mrb[63].mxu1  ;;  %v2441_v2 = vmax.f32 %v2409_v32, 0.0 }
 0x3a1   : > { %v2408_v5 = vadd.f32 %v4218_v60, %v2312_v50  ;;  %v2439_v14 = vmax.f32 %v2407_v41, 0.0 }
 0x3a2   : > { %v2442_v61 = vmax.f32 %v2410_v57, 0.0 }
 0x3a3   : > { %v2440_v54 = vmax.f32 %v2408_v5, 0.0 }
 0x3a4   : > { %v2973_v59 = vpack.c.bf16 %v2442_v61, %v2441_v2 }
 0x3a5   : > { %v2968_v7 = vpack.c.bf16 %v2440_v54, %v2439_v14  ;;  %v3456_v19 = vpop.f32.mrb[64].mxu1 }
 0x3a6   : > { %3021 = vst [vmem:[%s4229_s14 + $0x38] sm:$0xff] %v2973_v59   ;;  %v2413_v24 = vadd.f32 %v3456_v19, %v4218_v60  ;;  %v2325_v27 = vpop.f32.mrb[65].mxu1 }
 0x3a7   : > { %3020 = vst [vmem:[%s4229_s14 + $0x30] sm:$0xff] %v2968_v7   ;;  %v2411_v34 = vadd.f32 %v4218_v60, %v2325_v27  ;;  %v3457_v40 = vpop.f32.mrb[66].mxu1 }
 0x3a8   : > { %v2414_v44 = vadd.f32 %v3457_v40, %v4218_v60  ;;  %v2328_v53 = vpop.f32.mrb[67].mxu1  ;;  %v2445_v8 = vmax.f32 %v2413_v24, 0.0 }
 0x3a9   : > { %v2412_v63 = vadd.f32 %v4218_v60, %v2328_v53  ;;  %v2443_v16 = vmax.f32 %v2411_v34, 0.0 }
 0x3aa   : > { %v2446_v13 = vmax.f32 %v2414_v44, 0.0 }
 0x3ab   : > { %v2444_v25 = vmax.f32 %v2412_v63, 0.0 }
 0x3ac   : > { %v2983_v31 = vpack.c.bf16 %v2446_v13, %v2445_v8 }
 0x3ad   : > { %v2978_v35 = vpack.c.bf16 %v2444_v25, %v2443_v16  ;;  %v3460_v46 = vpop.f32.mrb[68].mxu1 }
 0x3ae   : > { %3023 = vst [vmem:[%s4229_s14 + $0x48] sm:$0xff] %v2983_v31   ;;  %v2417_v55 = vadd.f32 %v3460_v46, %v4218_v60  ;;  %v2341_v58 = vpop.f32.mrb[69].mxu1 }
 0x3af   : > { %3022 = vst [vmem:[%s4229_s14 + $0x40] sm:$0xff] %v2978_v35   ;;  %v2415_v9 = vadd.f32 %v4218_v60, %v2341_v58  ;;  %v3461_v15 = vpop.f32.mrb[70].mxu1 }
 0x3b0   : > { %v2418_v21 = vadd.f32 %v3461_v15, %v4218_v60  ;;  %v2344_v33 = vpop.f32.mrb[71].mxu1  ;;  %v2449_v52 = vmax.f32 %v2417_v55, 0.0 }
 0x3b1   : > { %v2416_v43 = vadd.f32 %v4218_v60, %v2344_v33  ;;  %v2447_v12 = vmax.f32 %v2415_v9, 0.0 }
 0x3b2   : > { %v2450_v3 = vmax.f32 %v2418_v21, 0.0 }
 0x3b3   : > { %v2448_v22 = vmax.f32 %v2416_v43, 0.0 }
 0x3b4   : > { %v2993_v17 = vpack.c.bf16 %v2450_v3, %v2449_v52 }
 0x3b5   : > { %v2988_v48 = vpack.c.bf16 %v2448_v22, %v2447_v12  ;;  %v3464_v49 = vpop.f32.mrb[72].mxu1 }
 0x3b6   : > { %3025 = vst [vmem:[%s4229_s14 + $0x58] sm:$0xff] %v2993_v17   ;;  %v2421_v10 = vadd.f32 %v3464_v49, %v4218_v60  ;;  %v2357_v30 = vpop.f32.mrb[73].mxu1 }
 0x3b7   : > { %3024 = vst [vmem:[%s4229_s14 + $0x50] sm:$0xff] %v2988_v48   ;;  %v2419_v62 = vadd.f32 %v4218_v60, %v2357_v30  ;;  %v3465_v56 = vpop.f32.mrb[74].mxu1 }
 0x3b8   : > { %v2422_v0 = vadd.f32 %v3465_v56, %v4218_v60  ;;  %v2360_v1 = vpop.f32.mrb[75].mxu1  ;;  %v2453_v36 = vmax.f32 %v2421_v10, 0.0 }
 0x3b9   : > { %v2420_v37 = vadd.f32 %v4218_v60, %v2360_v1  ;;  %v2451_v4 = vmax.f32 %v2419_v62, 0.0 }
 0x3ba   : > { %v2454_v51 = vmax.f32 %v2422_v0, 0.0 }
 0x3bb   : > { %v2452_v6 = vmax.f32 %v2420_v37, 0.0 }
 0x3bc   : > { %v3003_v20 = vpack.c.bf16 %v2454_v51, %v2453_v36 }
 0x3bd   : > { %v2998_v18 = vpack.c.bf16 %v2452_v6, %v2451_v4  ;;  %v3468_v45 = vpop.f32.mrb[76].mxu1 }
 0x3be   : > { %3027 = vst [vmem:[%s4229_s14 + $0x68] sm:$0xff] %v3003_v20   ;;  %v2425_v23 = vadd.f32 %v3468_v45, %v4218_v60  ;;  %v2373_v39 = vpop.f32.mrb[77].mxu1 }
 0x3bf   : > { %3026 = vst [vmem:[%s4229_s14 + $0x60] sm:$0xff] %v2998_v18   ;;  %v2423_v11 = vadd.f32 %v4218_v60, %v2373_v39  ;;  %v3469_v42 = vpop.f32.mrb[78].mxu1 }
 0x3c0   : > { %v2426_v26 = vadd.f32 %v3469_v42, %v4218_v60  ;;  %v2376_v28 = vpop.f32.mrb[79].mxu1  ;;  %v2457_v32 = vmax.f32 %v2425_v23, 0.0 }
 0x3c1   : > { %v2424_v29 = vadd.f32 %v4218_v60, %v2376_v28  ;;  %v2455_v41 = vmax.f32 %v2423_v11, 0.0 }
 0x3c2   : > { %v2458_v38 = vmax.f32 %v2426_v26, 0.0 }
 0x3c3   : > { %v2456_v47 = vmax.f32 %v2424_v29, 0.0 }
 0x3c4   : > { %v3013_v57 = vpack.c.bf16 %v2458_v38, %v2457_v32 }
 0x3c5   : > { %v3008_v50 = vpack.c.bf16 %v2456_v47, %v2455_v41 }
 0x3c6   : > { %3029 = vst [vmem:[%s4229_s14 + $0x78] sm:$0xff] %v3013_v57  }
 0x3c7   : > { %3028 = vst [vmem:[%s4229_s14 + $0x70] sm:$0xff] %v3008_v50  }
 0x3c8 PF: > { %s18_s29 = sadd.s32 1, %s3732_s29   ;;  %s4293_s27 = smov %s3728_s28 }
 0x3c9   : > { %p15_p5 = scmp.ge.s32.totalorder %s18_s29, 4   ;;  %s4294_s28 = smov %s4296_s30 }
 0x3cb   :  { %17 = sbr.rel (!%p15_p5) target bundleno = 2 (0x2), region = 96 }

// kernel: gcn_model_forward.5
= control target key start
LH: loop header
LB: loop body
LE: loop exit
PB: predicated region body
PF: predicated region fallthrough
CT: control target
= control target key end

     0   :  { %s4719_s25 = smov 0   ;;  %s4721_s26 = smov 0   ;;  %s5333_s0 = inlined_call_operand.vmem [shape: bf16[512,512], index: 0, kind: input, shape index: {}]   ;;  %s5334_s1 = inlined_call_operand.vmem [shape: bf16[512,128], index: 1, kind: input, shape index: {}]   ;;  %s5335_s2 = inlined_call_operand.vmem [shape: bf16[512,128], index: 2, kind: input, shape index: {}]   ;;  %s5336_s3 = inlined_call_operand.vmem [shape: bf16[128,128], index: 3, kind: input, shape index: {}]   ;;  %s5337_s4 = inlined_call_operand.vmem [shape: f32[1,128], index: 4, kind: input, shape index: {}]   ;;  %s5338_s5 = inlined_call_operand.vmem [shape: bf16[128,128], index: 5, kind: input, shape index: {}]   ;;  %s5339_s6 = inlined_call_operand.vmem [shape: bf16[128,128], index: 6, kind: input, shape index: {}]   ;;  %s5340_s7 = inlined_call_operand.vmem [shape: f32[1,128], index: 7, kind: input, shape index: {}]   ;;  %s5341_s8 = inlined_call_operand.vmem [shape: bf16[128,128], index: 8, kind: input, shape index: {}]   ;;  %s5342_s9 = inlined_call_operand.vmem [shape: bf16[128,128], index: 9, kind: input, shape index: {}]   ;;  %s5343_s10 = inlined_call_operand.vmem [shape: f32[1,128], index: 10, kind: input, shape index: {}]   ;;  %s5344_s11 = inlined_call_operand.vmem [shape: bf16[128,128], index: 11, kind: input, shape index: {}]   ;;  %s5345_s12 = inlined_call_operand.vmem [shape: f32[1,128], index: 12, kind: input, shape index: {}]   ;;  %s5346_s13 = inlined_call_operand.vmem [shape: f32[512,128], index: 13, kind: output, shape index: {}]  }
   0x1   :  { %s4723_s27 = smov 0  }
   0x2 LB: > { %s35_s28 = sadd.s32 1, %s4643_s26  ;;  %p3514_p0 = scmp.ge.s32.totalorder %s4647_s27, 1  ;;  %s4647_s27 = sphi %s4723_s27, %s23_s27   ;;  %s4643_s26 = sphi %s4721_s26, %s5348_s26   ;;  %s4639_s25 = sphi %s4719_s25, %s5347_s25  }
   0x3   : > { %p37_p1 = scmp.ge.s32.totalorder %s35_s28, 2  ;;  %p430_p2 = scmp.lt.s32.totalorder %s4647_s27, 3 }
   0x5   : > { %s5350_s28 = smov (%p37_p1, %s35_s28), 0  ;;  %p431_p3 = pnand %p3514_p0, %p430_p2 }
   0x6   : > { %v4433_v0 = vld [vmem:[%s5334_s1 + $0x40] sm:$0xff] (!%p431_p3)   ;;  %v4437_v4 = vld [vmem:[%s5334_s1 + $0x48] sm:$0xff] (!%p431_p3)   ;;  %v4441_v8 = vld [vmem:[%s5334_s1 + $0x50] sm:$0xff] (!%p431_p3)   ;;  %s3515_s18 = sshll.u32 (!%p431_p3), %s4639_s25, 5 }
   0x7   : > { %434 = sbr.rel (%p431_p3) target bundleno = 1394 (0x572), region = 72  ;;  %v4434_v1 = vld [vmem:[%s5334_s1 + $0xc0] sm:$0xff] (!%p431_p3)   ;;  %3689 = vmatprep.subr.bf16.mxu0 (!%p431_p3), %v4433_v0  ;;  %v4438_v5 = vld [vmem:[%s5334_s1 + $0xc8] sm:$0xff] (!%p431_p3)   ;;  %v4442_v9 = vld [vmem:[%s5334_s1 + $0xd0] sm:$0xff] (!%p431_p3)   ;;  %p491_p4 = scmp.lt.s32.totalorder (!%p431_p3), %s3515_s18, 63 }
   0x8   : > { %v4435_v2 = vld [vmem:[%s5334_s1] sm:$0xff] (!%p431_p3)   ;;  %3801 = vmatprep.subr.bf16.mxu1 (!%p431_p3), %v4434_v1  ;;  %v4439_v6 = vld [vmem:[%s5334_s1 + $0x8] sm:$0xff] (!%p431_p3)   ;;  %v4443_v10 = vld [vmem:[%s5334_s1 + $0x10] sm:$0xff] (!%p431_p3)  }
   0x9   : > { %v4436_v3 = vld [vmem:[%s5334_s1 + $0x80] sm:$0xff] (!%p431_p3)   ;;  %3690 = vmatpush3.bf16.msra.mxu0 (!%p431_p3), %v4435_v2  ;;  %v4440_v7 = vld [vmem:[%s5334_s1 + $0x88] sm:$0xff] (!%p431_p3)   ;;  %v4444_v11 = vld [vmem:[%s5334_s1 + $0x90] sm:$0xff] (!%p431_p3)  }
   0xa   : > { %3802 = vmatpush3.bf16.msra.mxu1 (!%p431_p3), %v4436_v3  ;;  %3691 = vmatprep.subr.bf16.mxu0 (!%p431_p3), %v4437_v4  ;;  %v4445_v12 = vld [vmem:[%s5334_s1 + $0x58] sm:$0xff] (!%p431_p3)   ;;  %v4449_v16 = vld [vmem:[%s5334_s1 + $0x60] sm:$0xff] (!%p431_p3)   ;;  %v4453_v20 = vld [vmem:[%s5334_s1 + $0x68] sm:$0xff] (!%p431_p3)  }
   0xb   : > { %3803 = vmatprep.subr.bf16.mxu1 (!%p431_p3), %v4438_v5  ;;  %v4446_v13 = vld [vmem:[%s5334_s1 + $0xd8] sm:$0xff] (!%p431_p3)   ;;  %v4450_v17 = vld [vmem:[%s5334_s1 + $0xe0] sm:$0xff] (!%p431_p3)   ;;  %v4454_v21 = vld [vmem:[%s5334_s1 + $0xe8] sm:$0xff] (!%p431_p3)  }
   0xc   : > { %v4447_v14 = vld [vmem:[%s5334_s1 + $0x18] sm:$0xff] (!%p431_p3)   ;;  %v4451_v18 = vld [vmem:[%s5334_s1 + $0x20] sm:$0xff] (!%p431_p3)   ;;  %v4455_v22 = vld [vmem:[%s5334_s1 + $0x28] sm:$0xff] (!%p431_p3)  }
   0xd   : > { %3692 = vmatpush3.bf16.msra.mxu0 (!%p431_p3), %v4439_v6  ;;  %v4448_v15 = vld [vmem:[%s5334_s1 + $0x98] sm:$0xff] (!%p431_p3)   ;;  %v4452_v19 = vld [vmem:[%s5334_s1 + $0xa0] sm:$0xff] (!%p431_p3)   ;;  %v4456_v23 = vld [vmem:[%s5334_s1 + $0xa8] sm:$0xff] (!%p431_p3)  }
   0xe   : > { %3804 = vmatpush3.bf16.msra.mxu1 %v4440_v7  ;;  %3693 = vmatprep.subr.bf16.mxu0 %v4441_v8  ;;  %s5352_s18 = smov (!%p491_p4, %s3515_s18), 63  ;;  %v4457_v24 = vld [vmem:[%s5334_s1 + $0x70] sm:$0xff]   ;;  %v4461_v28 = vld [vmem:[%s5334_s1 + $0x78] sm:$0xff]   ;;  %v4561_v58 = vld [vmem:[%s5336_s3] sm:$0xff]  }
   0xf   : > { %3805 = vmatprep.subr.bf16.mxu1 %v4442_v9  ;;  %v4458_v25 = vld [vmem:[%s5334_s1 + $0xf0] sm:$0xff]   ;;  %s3688_s14 = sshll.u32 %s5352_s18, 4  ;;  %v4462_v29 = vld [vmem:[%s5334_s1 + $0xf8] sm:$0xff]   ;;  %v4562_v59 = vld [vmem:[%s5336_s3 + $0x8] sm:$0xff]   ;;  %s3519_s29 = sshll.u32 %s5352_s18, 2 }
  0x10   : > { %v4459_v26 = vld [vmem:[%s5334_s1 + $0x30] sm:$0xff]   ;;  %s4836_s24 = scalar_lea.vmem %s5333_s0, %s3688_s14  ;;  %v4463_v30 = vld [vmem:[%s5334_s1 + $0x38] sm:$0xff]   ;;  %s4963_s15 = scalar_lea.vmem %s5335_s2, %s3519_s29 }
  0x11   : > { %3694 = vmatpush3.bf16.msra.mxu0 %v4443_v10  ;;  %v4460_v27 = vld [vmem:[%s5334_s1 + $0xb0] sm:$0xff]   ;;  %v4464_v31 = vld [vmem:[%s5334_s1 + $0xb8] sm:$0xff]   ;;  %s3521_s21 = sshll.u32 %s5352_s18, 3 }
  0x12   : > { %3806 = vmatpush3.bf16.msra.mxu1 %v4444_v11  ;;  %3695 = vmatprep.subr.bf16.mxu0 %v4445_v12  ;;  %v4465_v32 = vld [vmem:[%s4836_s24] ss:$16 sps:$4 sm:$0xff]   ;;  %v4467_v33 = vld [vmem:[%s4836_s24 + $0x4] ss:$16 sps:$4 sm:$0xff]   ;;  %v4468_v34 = vld [vmem:[%s4836_s24 + $0x8] ss:$16 sps:$4 sm:$0xff]   ;;  %s5258_s30 = scalar_lea.vmem %s5346_s13, %s3521_s21 }
  0x13   : > { %3807 = vmatprep.subr.bf16.mxu1 %v4446_v13  ;;  %v4470_v35 = vld [vmem:[%s4836_s24 + $0xc] ss:$16 sps:$4 sm:$0xff]   ;;  %1260 = vmatprep.mubr.bf16.mxu0 %v4467_v33  ;;  %v4471_v36 = vld [vmem:[%s4836_s24 + $0x24] ss:$16 sps:$4 sm:$0xff]   ;;  %v4475_v38 = vld [vmem:[%s4836_s24 + $0x20] ss:$16 sps:$4 sm:$0xff]  }
  0x14   : > { %1421 = vmatprep.mubr.bf16.mxu1 %v4470_v35  ;;  %v4473_v37 = vld [vmem:[%s4836_s24 + $0x2c] ss:$16 sps:$4 sm:$0xff]   ;;  %v4476_v39 = vld [vmem:[%s4836_s24 + $0x28] ss:$16 sps:$4 sm:$0xff]   ;;  %v4477_v40 = vld [vmem:[%s4836_s24 + $0x44] ss:$16 sps:$4 sm:$0xff]  }
  0x15   : > { %3696 = vmatpush3.bf16.msra.mxu0 %v4447_v14  ;;  %v4479_v41 = vld [vmem:[%s4836_s24 + $0x4c] ss:$16 sps:$4 sm:$0xff]   ;;  %v4481_v42 = vld [vmem:[%s4836_s24 + $0x40] ss:$16 sps:$4 sm:$0xff]   ;;  %v4482_v43 = vld [vmem:[%s4836_s24 + $0x48] ss:$16 sps:$4 sm:$0xff]  }
  0x16   : > { %3808 = vmatpush3.bf16.msra.mxu1 %v4448_v15  ;;  %3697 = vmatprep.subr.bf16.mxu0 %v4449_v16  ;;  %v4483_v44 = vld [vmem:[%s4836_s24 + $0x64] ss:$16 sps:$4 sm:$0xff]   ;;  %v4485_v45 = vld [vmem:[%s4836_s24 + $0x6c] ss:$16 sps:$4 sm:$0xff]   ;;  %v4487_v46 = vld [vmem:[%s4836_s24 + $0x60] ss:$16 sps:$4 sm:$0xff]  }
  0x17   : > { %3809 = vmatprep.subr.bf16.mxu1 %v4450_v17  ;;  %v4488_v47 = vld [vmem:[%s4836_s24 + $0x68] ss:$16 sps:$4 sm:$0xff]   ;;  %v4489_v48 = vld [vmem:[%s4836_s24 + $0x84] ss:$16 sps:$4 sm:$0xff]   ;;  %v4491_v49 = vld [vmem:[%s4836_s24 + $0x8c] ss:$16 sps:$4 sm:$0xff]  }
  0x18   : > { %v4493_v50 = vld [vmem:[%s4836_s24 + $0x80] ss:$16 sps:$4 sm:$0xff]   ;;  %v4494_v51 = vld [vmem:[%s4836_s24 + $0x88] ss:$16 sps:$4 sm:$0xff]   ;;  %v4495_v52 = vld [vmem:[%s4836_s24 + $0xa4] ss:$16 sps:$4 sm:$0xff]  }
  0x19   : > { %3698 = vmatpush3.bf16.msra.mxu0 %v4451_v18  ;;  %v4497_v53 = vld [vmem:[%s4836_s24 + $0xac] ss:$16 sps:$4 sm:$0xff]   ;;  %v4499_v54 = vld [vmem:[%s4836_s24 + $0xa0] ss:$16 sps:$4 sm:$0xff]   ;;  %v4500_v55 = vld [vmem:[%s4836_s24 + $0xa8] ss:$16 sps:$4 sm:$0xff]  }
  0x1a   : > { %3810 = vmatpush3.bf16.msra.mxu1 %v4452_v19  ;;  %3699 = vmatprep.subr.bf16.mxu0 %v4453_v20  ;;  %v4501_v56 = vld [vmem:[%s4836_s24 + $0xc4] ss:$16 sps:$4 sm:$0xff]   ;;  %v4503_v57 = vld [vmem:[%s4836_s24 + $0xcc] ss:$16 sps:$4 sm:$0xff]   ;;  %v4505_v60 = vld [vmem:[%s4836_s24 + $0xc0] ss:$16 sps:$4 sm:$0xff]  }
  0x1b   : > { %3811 = vmatprep.subr.bf16.mxu1 %v4454_v21  ;;  %v4563_v61 = vld [vmem:[%s5336_s3 + $0x10] sm:$0xff]   ;;  %v4506_v62 = vld [vmem:[%s4836_s24 + $0xc8] ss:$16 sps:$4 sm:$0xff]   ;;  %v4509_v0 = vld [vmem:[%s4836_s24 + $0xec] ss:$16 sps:$4 sm:$0xff]  }
  0x1c   : > { %v4507_v63 = vld [vmem:[%s4836_s24 + $0xe4] ss:$16 sps:$4 sm:$0xff]   ;;  %v4564_v1 = vld [vmem:[%s5336_s3 + $0x18] sm:$0xff]   ;;  %v4511_v2 = vld [vmem:[%s4836_s24 + $0xe0] ss:$16 sps:$4 sm:$0xff]  }
  0x1d   : > { %3700 = vmatpush3.bf16.msra.mxu0 %v4455_v22  ;;  %v4512_v3 = vld [vmem:[%s4836_s24 + $0xe8] ss:$16 sps:$4 sm:$0xff]   ;;  %v4513_v4 = vld [vmem:[%s4836_s24 + $0x104] ss:$16 sps:$4 sm:$0xff]   ;;  %v4515_v5 = vld [vmem:[%s4836_s24 + $0x10c] ss:$16 sps:$4 sm:$0xff]  }
  0x1e   : > { %3812 = vmatpush3.bf16.msra.mxu1 %v4456_v23  ;;  %3701 = vmatprep.subr.bf16.mxu0 %v4457_v24  ;;  %v4517_v6 = vld [vmem:[%s4836_s24 + $0x100] ss:$16 sps:$4 sm:$0xff]   ;;  %v4518_v7 = vld [vmem:[%s4836_s24 + $0x108] ss:$16 sps:$4 sm:$0xff]   ;;  %v4519_v8 = vld [vmem:[%s4836_s24 + $0x124] ss:$16 sps:$4 sm:$0xff]  }
  0x1f   : > { %3813 = vmatprep.subr.bf16.mxu1 %v4458_v25  ;;  %v4521_v9 = vld [vmem:[%s4836_s24 + $0x12c] ss:$16 sps:$4 sm:$0xff]   ;;  %v4523_v10 = vld [vmem:[%s4836_s24 + $0x120] ss:$16 sps:$4 sm:$0xff]   ;;  %v4524_v11 = vld [vmem:[%s4836_s24 + $0x128] ss:$16 sps:$4 sm:$0xff]  }
  0x20   : > { %v4525_v12 = vld [vmem:[%s4836_s24 + $0x144] ss:$16 sps:$4 sm:$0xff]   ;;  %v4527_v13 = vld [vmem:[%s4836_s24 + $0x14c] ss:$16 sps:$4 sm:$0xff]   ;;  %v4529_v14 = vld [vmem:[%s4836_s24 + $0x140] ss:$16 sps:$4 sm:$0xff]  }
  0x21   : > { %3702 = vmatpush3.bf16.msra.mxu0 %v4459_v26  ;;  %v4530_v15 = vld [vmem:[%s4836_s24 + $0x148] ss:$16 sps:$4 sm:$0xff]   ;;  %v4531_v16 = vld [vmem:[%s4836_s24 + $0x164] ss:$16 sps:$4 sm:$0xff]   ;;  %v4533_v17 = vld [vmem:[%s4836_s24 + $0x16c] ss:$16 sps:$4 sm:$0xff]  }
  0x22   : > { %3814 = vmatpush3.bf16.msra.mxu1 %v4460_v27  ;;  %3703 = vmatprep.subr.bf16.mxu0 %v4461_v28  ;;  %v4535_v18 = vld [vmem:[%s4836_s24 + $0x160] ss:$16 sps:$4 sm:$0xff]   ;;  %v4536_v20 = vld [vmem:[%s4836_s24 + $0x168] ss:$16 sps:$4 sm:$0xff]   ;;  %v4537_v21 = vld [vmem:[%s4836_s24 + $0x184] ss:$16 sps:$4 sm:$0xff]  }
  0x23   : > { %3815 = vmatprep.subr.bf16.mxu1 %v4462_v29  ;;  %v4565_v19 = vld [vmem:[%s5336_s3 + $0x20] sm:$0xff]   ;;  %v4539_v22 = vld [vmem:[%s4836_s24 + $0x18c] ss:$16 sps:$4 sm:$0xff]   ;;  %v4567_v25 = vld [vmem:[%s5336_s3 + $0x30] sm:$0xff]  }
  0x24   : > { %v4566_v23 = vld [vmem:[%s5336_s3 + $0x28] sm:$0xff]   ;;  %v4541_v24 = vld [vmem:[%s4836_s24 + $0x180] ss:$16 sps:$4 sm:$0xff]   ;;  %v4543_v27 = vld [vmem:[%s4836_s24 + $0x1a4] ss:$16 sps:$4 sm:$0xff]  }
  0x25   : > { %3704 = vmatpush3.bf16.msra.mxu0 %v4463_v30  ;;  %v4542_v26 = vld [vmem:[%s4836_s24 + $0x188] ss:$16 sps:$4 sm:$0xff]   ;;  %v4545_v28 = vld [vmem:[%s4836_s24 + $0x1ac] ss:$16 sps:$4 sm:$0xff]   ;;  %v4547_v30 = vld [vmem:[%s4836_s24 + $0x1a0] ss:$16 sps:$4 sm:$0xff]  }
  0x26   : > { %3816 = vmatpush3.bf16.msra.mxu1 %v4464_v31  ;;  %4057 = vmatprep.subr.bf16.mxu0 %v4561_v58  ;;  %v4568_v29 = vld [vmem:[%s5336_s3 + $0x38] sm:$0xff]  }
  0x27   : > { %v4548_v31 = vld [vmem:[%s4836_s24 + $0x1a8] ss:$16 sps:$4 sm:$0xff]   ;;  %v4551_v33 = vld [vmem:[%s4836_s24 + $0x1cc] ss:$16 sps:$4 sm:$0xff]  }
  0x28   : > { %1261 = vmatmul.mubr.bf16.vlgmr.msra.gmra.mrb[0].mxu0 %v4465_v32  ;;  %v4549_v32 = vld [vmem:[%s4836_s24 + $0x1c4] ss:$16 sps:$4 sm:$0xff]   ;;  %v4554_v35 = vld [vmem:[%s4836_s24 + $0x1c8] ss:$16 sps:$4 sm:$0xff]  }
  0x29   : > { %1422 = vmatmul.mubr.bf16.vlgmr.msra.gmra.mrb[0].mxu1 %v4468_v34  ;;  %1268 = vmatprep.mubr.bf16.mxu0 %v4471_v36  ;;  %v4553_v34 = vld [vmem:[%s4836_s24 + $0x1c0] ss:$16 sps:$4 sm:$0xff]   ;;  %v4555_v36 = vld [vmem:[%s4836_s24 + $0x1e4] ss:$16 sps:$4 sm:$0xff]  }
  0x2a   : > { %1429 = vmatprep.mubr.bf16.mxu1 %v4473_v37  ;;  %4058 = vmatpush3.bf16.msra.mxu0 %v4561_v58  ;;  %v4557_v37 = vld [vmem:[%s4836_s24 + $0x1ec] ss:$16 sps:$4 sm:$0xff]  }
  0x2b   : > { %4059 = vmatprep.subr.bf16.mxu0 %v4562_v59 }
  0x2e   : > { %4060 = vmatpush3.bf16.msra.mxu0 %v4562_v59 }
  0x2f   : > { %4061 = vmatprep.subr.bf16.mxu0 %v4563_v61 }
  0x30   : > { %1269 = vmatmul.mubr.bf16.gmra.mrb[4].mxu0 %v4475_v38  ;;  %v4559_v38 = vld [vmem:[%s4836_s24 + $0x1e0] ss:$16 sps:$4 sm:$0xff]  }
  0x31   : > { %1430 = vmatmul.mubr.bf16.gmra.mrb[4].mxu1 %v4476_v39  ;;  %1276 = vmatprep.mubr.bf16.mxu0 %v4477_v40  ;;  %v4560_v39 = vld [vmem:[%s4836_s24 + $0x1e8] ss:$16 sps:$4 sm:$0xff]  }
  0x32   : > { %1437 = vmatprep.mubr.bf16.mxu1 %v4479_v41  ;;  %4062 = vmatpush3.bf16.msra.mxu0 %v4563_v61 }
  0x33   : > { %4063 = vmatprep.subr.bf16.mxu0 %v4564_v1 }
  0x36   : > { %4064 = vmatpush3.bf16.msra.mxu0 %v4564_v1 }
  0x37   : > { %4065 = vmatprep.subr.bf16.mxu0 %v4565_v19 }
  0x38   : > { %1277 = vmatmul.mubr.bf16.gmra.mrb[8].mxu0 %v4481_v42 }
  0x39   : > { %1438 = vmatmul.mubr.bf16.gmra.mrb[8].mxu1 %v4482_v43  ;;  %1284 = vmatprep.mubr.bf16.mxu0 %v4483_v44 }
  0x3a   : > { %1445 = vmatprep.mubr.bf16.mxu1 %v4485_v45  ;;  %4066 = vmatpush3.bf16.msra.mxu0 %v4565_v19 }
  0x3b   : > { %4067 = vmatprep.subr.bf16.mxu0 %v4566_v23 }
  0x3e   : > { %4068 = vmatpush3.bf16.msra.mxu0 %v4566_v23 }
  0x3f   : > { %4069 = vmatprep.subr.bf16.mxu0 %v4567_v25 }
  0x40   : > { %1285 = vmatmul.mubr.bf16.gmra.mrb[12].mxu0 %v4487_v46 }
  0x41   : > { %1446 = vmatmul.mubr.bf16.gmra.mrb[12].mxu1 %v4488_v47  ;;  %1292 = vmatprep.mubr.bf16.mxu0 %v4489_v48 }
  0x42   : > { %1453 = vmatprep.mubr.bf16.mxu1 %v4491_v49  ;;  %4070 = vmatpush3.bf16.msra.mxu0 %v4567_v25  ;;  %v4569_v49 = vld [vmem:[%s5339_s6] sm:$0xff]  }
  0x43   : > { %4071 = vmatprep.subr.bf16.mxu0 %v4568_v29  ;;  %4105 = vmatprep.subr.bf16.mxu1 %v4569_v49 }
  0x44   : > { %4106 = vmatpush3.bf16.msra.mxu1 %v4569_v49 }
  0x46   : > { %4072 = vmatpush3.bf16.msra.mxu0 %v4568_v29 }
  0x48   : > { %1293 = vmatmul.mubr.bf16.gmra.mrb[16].mxu0 %v4493_v50  ;;  %v4570_v50 = vld [vmem:[%s5339_s6 + $0x8] sm:$0xff]  }
  0x49   : > { %1454 = vmatmul.mubr.bf16.gmra.mrb[16].mxu1 %v4494_v51  ;;  %1300 = vmatprep.mubr.bf16.mxu0 %v4495_v52 }
  0x4a   : > { %1461 = vmatprep.mubr.bf16.mxu1 %v4497_v53  ;;  %4107 = vmatprep.subr.bf16.mxu1 %v4570_v50 }
  0x4b   : > { %4108 = vmatpush3.bf16.msra.mxu1 %v4570_v50 }
  0x50   : > { %1301 = vmatmul.mubr.bf16.gmra.mrb[20].mxu0 %v4499_v54 }
  0x51   : > { %1462 = vmatmul.mubr.bf16.gmra.mrb[20].mxu1 %v4500_v55  ;;  %1308 = vmatprep.mubr.bf16.mxu0 %v4501_v56  ;;  %v4571_v56 = vld [vmem:[%s5339_s6 + $0x10] sm:$0xff]  }
  0x52   : > { %1469 = vmatprep.mubr.bf16.mxu1 %v4503_v57  ;;  %4109 = vmatprep.subr.bf16.mxu1 %v4571_v56 }
  0x53   : > { %4110 = vmatpush3.bf16.msra.mxu1 %v4571_v56 }
  0x58   : > { %1309 = vmatmul.mubr.bf16.gmra.mrb[24].mxu0 %v4505_v60 }
  0x59   : > { %1470 = vmatmul.mubr.bf16.gmra.mrb[24].mxu1 %v4506_v62  ;;  %1316 = vmatprep.mubr.bf16.mxu0 %v4507_v63 }
  0x5a   : > { %1477 = vmatprep.mubr.bf16.mxu1 %v4509_v0 }
  0x60   : > { %1317 = vmatmul.mubr.bf16.gmra.mrb[28].mxu0 %v4511_v2 }
  0x61   : > { %1478 = vmatmul.mubr.bf16.gmra.mrb[28].mxu1 %v4512_v3  ;;  %1324 = vmatprep.mubr.bf16.mxu0 %v4513_v4  ;;  %v4572_v3 = vld [vmem:[%s5339_s6 + $0x18] sm:$0xff]  }
  0x62   : > { %1485 = vmatprep.mubr.bf16.mxu1 %v4515_v5  ;;  %4111 = vmatprep.subr.bf16.mxu1 %v4572_v3 }
  0x63   : > { %4112 = vmatpush3.bf16.msra.mxu1 %v4572_v3 }
  0x68   : > { %1325 = vmatmul.mubr.bf16.gmra.mrb[32].mxu0 %v4517_v6 }
  0x69   : > { %1486 = vmatmul.mubr.bf16.gmra.mrb[32].mxu1 %v4518_v7  ;;  %1332 = vmatprep.mubr.bf16.mxu0 %v4519_v8 }
  0x6a   : > { %1493 = vmatprep.mubr.bf16.mxu1 %v4521_v9  ;;  %v4573_v9 = vld [vmem:[%s5339_s6 + $0x20] sm:$0xff]  }
  0x6b   : > { %4113 = vmatprep.subr.bf16.mxu1 %v4573_v9 }
  0x6c   : > { %4114 = vmatpush3.bf16.msra.mxu1 %v4573_v9 }
  0x70   : > { %1333 = vmatmul.mubr.bf16.gmra.mrb[36].mxu0 %v4523_v10 }
  0x71   : > { %1494 = vmatmul.mubr.bf16.gmra.mrb[36].mxu1 %v4524_v11  ;;  %1340 = vmatprep.mubr.bf16.mxu0 %v4525_v12 }
  0x72   : > { %1501 = vmatprep.mubr.bf16.mxu1 %v4527_v13 }
  0x78   : > { %1341 = vmatmul.mubr.bf16.gmra.mrb[40].mxu0 %v4529_v14 }
  0x79   : > { %1502 = vmatmul.mubr.bf16.gmra.mrb[40].mxu1 %v4530_v15  ;;  %1348 = vmatprep.mubr.bf16.mxu0 %v4531_v16 }
  0x7a   : > { %1509 = vmatprep.mubr.bf16.mxu1 %v4533_v17 }
  0x80   : > { %1349 = vmatmul.mubr.bf16.gmra.mrb[44].mxu0 %v4535_v18 }
  0x81   : > { %1510 = vmatmul.mubr.bf16.gmra.mrb[44].mxu1 %v4536_v20  ;;  %1356 = vmatprep.mubr.bf16.mxu0 %v4537_v21  ;;  %v4574_v20 = vld [vmem:[%s5339_s6 + $0x28] sm:$0xff]  }
  0x82   : > { %1517 = vmatprep.mubr.bf16.mxu1 %v4539_v22  ;;  %4115 = vmatprep.subr.bf16.mxu1 %v4574_v20 }
  0x83   : > { %4116 = vmatpush3.bf16.msra.mxu1 %v4574_v20 }
  0x88   : > { %1357 = vmatmul.mubr.bf16.gmra.mrb[48].mxu0 %v4541_v24 }
  0x89   : > { %1518 = vmatmul.mubr.bf16.gmra.mrb[48].mxu1 %v4542_v26  ;;  %1364 = vmatprep.mubr.bf16.mxu0 %v4543_v27 }
  0x8a   : > { %1525 = vmatprep.mubr.bf16.mxu1 %v4545_v28 }
  0x90   : > { %1365 = vmatmul.mubr.bf16.gmra.mrb[52].mxu0 %v4547_v30 }
  0x91   : > { %1526 = vmatmul.mubr.bf16.gmra.mrb[52].mxu1 %v4548_v31  ;;  %1372 = vmatprep.mubr.bf16.mxu0 %v4549_v32 }
  0x92   : > { %1533 = vmatprep.mubr.bf16.mxu1 %v4551_v33 }
  0x98   : > { %1373 = vmatmul.mubr.bf16.gmra.mrb[56].mxu0 %v4553_v34 }
  0x99   : > { %1534 = vmatmul.mubr.bf16.gmra.mrb[56].mxu1 %v4554_v35  ;;  %1380 = vmatprep.mubr.bf16.mxu0 %v4555_v36 }
  0x9a   : > { %1541 = vmatprep.mubr.bf16.mxu1 %v4557_v37 }
  0xa0   : > { %1381 = vmatmul.mubr.bf16.gmra.mrb[60].mxu0 %v4559_v38 }
  0xa1   : > { %1542 = vmatmul.mubr.bf16.gmra.mrb[60].mxu1 %v4560_v39 }
  0xfb   : > { %v3705_v40 = vpop.f32.mrb[0].mxu0 }
  0xfc   : > { %v3817_v41 = vpop.f32.mrb[0].mxu1  ;;  %v3706_v42 = vpop.f32.mrb[1].mxu0 }
  0xfd   : > { %v3707_v43 = vadd.f32 %v3706_v42, %v3705_v40  ;;  %v3818_v44 = vpop.f32.mrb[1].mxu1  ;;  %v3708_v45 = vpop.f32.mrb[2].mxu0 }
  0xfe   : > { %v3819_v46 = vadd.f32 %v3818_v44, %v3817_v41  ;;  %v3820_v47 = vpop.f32.mrb[2].mxu1  ;;  %v3709_v48 = vpop.f32.mrb[3].mxu0 }
  0xff   : > { %v3710_v51 = vadd.f32 %v3709_v48, %v3708_v45  ;;  %v3821_v52 = vpop.f32.mrb[3].mxu1 }
 0x100   : > { %v1424_v53 = vadd.f32 %v3819_v46, %v3707_v43  ;;  %v3822_v54 = vadd.f32 %v3821_v52, %v3820_v47 }
 0x102   : > { %v1427_v55 = vadd.f32 %v3822_v54, %v3710_v51 }
 0x103   : > { %v3711_v57 = vpop.f32.mrb[4].mxu0 }
 0x104   : > { %v3823_v58 = vpop.f32.mrb[4].mxu1  ;;  %v3712_v59 = vpop.f32.mrb[5].mxu0  ;;  %v1649_v60 = vpack.c.bf16 %v1427_v55, %v1424_v53 }
 0x105   : > { %v3713_v61 = vadd.f32 %v3712_v59, %v3711_v57  ;;  %v3824_v62 = vpop.f32.mrb[5].mxu1  ;;  %v3714_v63 = vpop.f32.mrb[6].mxu0 }
 0x106   : > { %v3825_v0 = vadd.f32 %v3824_v62, %v3823_v58  ;;  %v3826_v1 = vpop.f32.mrb[6].mxu1  ;;  %4073 = vmatprep.mubr.bf16.mxu0 %v1649_v60  ;;  %v3715_v2 = vpop.f32.mrb[7].mxu0 }
 0x107   : > { %v3716_v4 = vadd.f32 %v3715_v2, %v3714_v63  ;;  %v3827_v5 = vpop.f32.mrb[7].mxu1 }
 0x108   : > { %v1432_v6 = vadd.f32 %v3825_v0, %v3713_v61  ;;  %v3828_v7 = vadd.f32 %v3827_v5, %v3826_v1 }
 0x10a   : > { %v1435_v8 = vadd.f32 %v3828_v7, %v3716_v4 }
 0x10b   : > { %v3717_v10 = vpop.f32.mrb[8].mxu0 }
 0x10c   : > { %v1650_v11 = vpack.c.bf16 %v1435_v8, %v1432_v6  ;;  %v3829_v12 = vpop.f32.mrb[8].mxu1  ;;  %v3718_v13 = vpop.f32.mrb[9].mxu0 }
 0x10d   : > { %v3719_v14 = vadd.f32 %v3718_v13, %v3717_v10  ;;  %v3830_v15 = vpop.f32.mrb[9].mxu1  ;;  %v3720_v16 = vpop.f32.mrb[10].mxu0 }
 0x10e   : > { %v3831_v17 = vadd.f32 %v3830_v15, %v3829_v12  ;;  %v3832_v18 = vpop.f32.mrb[10].mxu1  ;;  %4074 = vmatmul.mubr.bf16.vlgmr.msra.gmra.mrb[64].mxu0 %v1650_v11  ;;  %v3721_v19 = vpop.f32.mrb[11].mxu0 }
 0x10f   : > { %v3722_v21 = vadd.f32 %v3721_v19, %v3720_v16  ;;  %v3833_v22 = vpop.f32.mrb[11].mxu1 }
 0x110   : > { %v1440_v23 = vadd.f32 %v3831_v17, %v3719_v14  ;;  %v3834_v24 = vadd.f32 %v3833_v22, %v3832_v18 }
 0x112   : > { %v1443_v25 = vadd.f32 %v3834_v24, %v3722_v21 }
 0x113   : > { %v3723_v26 = vpop.f32.mrb[12].mxu0 }
 0x114   : > { %v3835_v27 = vpop.f32.mrb[12].mxu1  ;;  %v3724_v28 = vpop.f32.mrb[13].mxu0  ;;  %v1651_v29 = vpack.c.bf16 %v1443_v25, %v1440_v23 }
 0x115   : > { %v3725_v30 = vadd.f32 %v3724_v28, %v3723_v26  ;;  %v3836_v31 = vpop.f32.mrb[13].mxu1  ;;  %v3726_v32 = vpop.f32.mrb[14].mxu0 }
 0x116   : > { %v3837_v33 = vadd.f32 %v3836_v31, %v3835_v27  ;;  %v3838_v34 = vpop.f32.mrb[14].mxu1  ;;  %4077 = vmatprep.mubr.bf16.mxu0 %v1651_v29  ;;  %v3727_v35 = vpop.f32.mrb[15].mxu0 }
 0x117   : > { %v3728_v36 = vadd.f32 %v3727_v35, %v3726_v32  ;;  %v3839_v37 = vpop.f32.mrb[15].mxu1 }
 0x118   : > { %v1448_v38 = vadd.f32 %v3837_v33, %v3725_v30  ;;  %v3840_v39 = vadd.f32 %v3839_v37, %v3838_v34 }
 0x11a   : > { %v1451_v40 = vadd.f32 %v3840_v39, %v3728_v36 }
 0x11b   : > { %v3729_v41 = vpop.f32.mrb[16].mxu0 }
 0x11c   : > { %v3841_v42 = vpop.f32.mrb[16].mxu1  ;;  %v3730_v43 = vpop.f32.mrb[17].mxu0  ;;  %v1652_v44 = vpack.c.bf16 %v1451_v40, %v1448_v38 }
 0x11d   : > { %v3731_v45 = vadd.f32 %v3730_v43, %v3729_v41  ;;  %v3842_v46 = vpop.f32.mrb[17].mxu1  ;;  %v3732_v47 = vpop.f32.mrb[18].mxu0 }
 0x11e   : > { %v3843_v48 = vadd.f32 %v3842_v46, %v3841_v42  ;;  %v3844_v49 = vpop.f32.mrb[18].mxu1  ;;  %4078 = vmatmul.mubr.bf16.gmra.mrb[68].mxu0 %v1652_v44  ;;  %v3733_v50 = vpop.f32.mrb[19].mxu0 }
 0x11f   : > { %v3734_v51 = vadd.f32 %v3733_v50, %v3732_v47  ;;  %v3845_v52 = vpop.f32.mrb[19].mxu1 }
 0x120   : > { %v1456_v53 = vadd.f32 %v3843_v48, %v3731_v45  ;;  %v3846_v54 = vadd.f32 %v3845_v52, %v3844_v49 }
 0x122   : > { %v1459_v55 = vadd.f32 %v3846_v54, %v3734_v51 }
 0x123   : > { %v3735_v56 = vpop.f32.mrb[20].mxu0 }
 0x124   : > { %v3847_v57 = vpop.f32.mrb[20].mxu1  ;;  %v3736_v58 = vpop.f32.mrb[21].mxu0  ;;  %v1653_v59 = vpack.c.bf16 %v1459_v55, %v1456_v53 }
 0x125   : > { %v3737_v60 = vadd.f32 %v3736_v58, %v3735_v56  ;;  %v3848_v61 = vpop.f32.mrb[21].mxu1  ;;  %v3738_v62 = vpop.f32.mrb[22].mxu0 }
 0x126   : > { %v3849_v63 = vadd.f32 %v3848_v61, %v3847_v57  ;;  %v3850_v0 = vpop.f32.mrb[22].mxu1  ;;  %4081 = vmatprep.mubr.bf16.mxu0 %v1653_v59  ;;  %v3739_v1 = vpop.f32.mrb[23].mxu0 }
 0x127   : > { %v3740_v2 = vadd.f32 %v3739_v1, %v3738_v62  ;;  %v3851_v3 = vpop.f32.mrb[23].mxu1 }
 0x128   : > { %v1464_v4 = vadd.f32 %v3849_v63, %v3737_v60  ;;  %v3852_v5 = vadd.f32 %v3851_v3, %v3850_v0 }
 0x12a   : > { %v1467_v6 = vadd.f32 %v3852_v5, %v3740_v2 }
 0x12b   : > { %v3741_v7 = vpop.f32.mrb[24].mxu0 }
 0x12c   : > { %v3853_v8 = vpop.f32.mrb[24].mxu1  ;;  %v3742_v9 = vpop.f32.mrb[25].mxu0  ;;  %v1654_v10 = vpack.c.bf16 %v1467_v6, %v1464_v4 }
 0x12d   : > { %v3743_v11 = vadd.f32 %v3742_v9, %v3741_v7  ;;  %v3854_v12 = vpop.f32.mrb[25].mxu1  ;;  %v3744_v13 = vpop.f32.mrb[26].mxu0 }
 0x12e   : > { %v3855_v14 = vadd.f32 %v3854_v12, %v3853_v8  ;;  %v3856_v15 = vpop.f32.mrb[26].mxu1  ;;  %4082 = vmatmul.mubr.bf16.gmra.mrb[72].mxu0 %v1654_v10  ;;  %v3745_v16 = vpop.f32.mrb[27].mxu0 }
 0x12f   : > { %v3746_v17 = vadd.f32 %v3745_v16, %v3744_v13  ;;  %v3857_v18 = vpop.f32.mrb[27].mxu1 }
 0x130   : > { %v1472_v19 = vadd.f32 %v3855_v14, %v3743_v11  ;;  %v3858_v20 = vadd.f32 %v3857_v18, %v3856_v15 }
 0x132   : > { %v1475_v21 = vadd.f32 %v3858_v20, %v3746_v17 }
 0x133   : > { %v3747_v22 = vpop.f32.mrb[28].mxu0 }
 0x134   : > { %v3859_v23 = vpop.f32.mrb[28].mxu1  ;;  %v3748_v24 = vpop.f32.mrb[29].mxu0  ;;  %v1655_v25 = vpack.c.bf16 %v1475_v21, %v1472_v19 }
 0x135   : > { %v3749_v26 = vadd.f32 %v3748_v24, %v3747_v22  ;;  %v3860_v27 = vpop.f32.mrb[29].mxu1  ;;  %v3750_v28 = vpop.f32.mrb[30].mxu0 }
 0x136   : > { %v3861_v29 = vadd.f32 %v3860_v27, %v3859_v23  ;;  %v3862_v30 = vpop.f32.mrb[30].mxu1  ;;  %4085 = vmatprep.mubr.bf16.mxu0 %v1655_v25  ;;  %v3751_v31 = vpop.f32.mrb[31].mxu0 }
 0x137   : > { %v3752_v32 = vadd.f32 %v3751_v31, %v3750_v28  ;;  %v3863_v33 = vpop.f32.mrb[31].mxu1 }
 0x138   : > { %v1480_v34 = vadd.f32 %v3861_v29, %v3749_v26  ;;  %v3864_v35 = vadd.f32 %v3863_v33, %v3862_v30 }
 0x13a   : > { %v1483_v36 = vadd.f32 %v3864_v35, %v3752_v32 }
 0x13b   : > { %v3753_v37 = vpop.f32.mrb[32].mxu0 }
 0x13c   : > { %v3865_v38 = vpop.f32.mrb[32].mxu1  ;;  %v3754_v39 = vpop.f32.mrb[33].mxu0  ;;  %v1656_v40 = vpack.c.bf16 %v1483_v36, %v1480_v34 }
 0x13d   : > { %v3755_v41 = vadd.f32 %v3754_v39, %v3753_v37  ;;  %v3866_v42 = vpop.f32.mrb[33].mxu1  ;;  %v3756_v43 = vpop.f32.mrb[34].mxu0 }
 0x13e   : > { %v3867_v44 = vadd.f32 %v3866_v42, %v3865_v38  ;;  %v3868_v45 = vpop.f32.mrb[34].mxu1  ;;  %4086 = vmatmul.mubr.bf16.gmra.mrb[76].mxu0 %v1656_v40  ;;  %v3757_v46 = vpop.f32.mrb[35].mxu0 }
 0x13f   : > { %v3758_v47 = vadd.f32 %v3757_v46, %v3756_v43  ;;  %v3869_v48 = vpop.f32.mrb[35].mxu1 }
 0x140   : > { %v1488_v49 = vadd.f32 %v3867_v44, %v3755_v41  ;;  %v3870_v50 = vadd.f32 %v3869_v48, %v3868_v45  ;;  %v4575_v48 = vld [vmem:[%s5339_s6 + $0x30] sm:$0xff]  }
 0x141   : > { %4117 = vmatprep.subr.bf16.mxu1 %v4575_v48 }
 0x142   : > { %v1491_v51 = vadd.f32 %v3870_v50, %v3758_v47  ;;  %4118 = vmatpush3.bf16.msra.mxu1 %v4575_v48 }
 0x143   : > { %v3759_v52 = vpop.f32.mrb[36].mxu0 }
 0x144   : > { %v3871_v53 = vpop.f32.mrb[36].mxu1  ;;  %v3760_v54 = vpop.f32.mrb[37].mxu0  ;;  %v1657_v55 = vpack.c.bf16 %v1491_v51, %v1488_v49 }
 0x145   : > { %v3761_v56 = vadd.f32 %v3760_v54, %v3759_v52  ;;  %v3872_v57 = vpop.f32.mrb[37].mxu1  ;;  %v3762_v58 = vpop.f32.mrb[38].mxu0 }
 0x146   : > { %v3873_v59 = vadd.f32 %v3872_v57, %v3871_v53  ;;  %v3874_v60 = vpop.f32.mrb[38].mxu1  ;;  %4089 = vmatprep.mubr.bf16.mxu0 %v1657_v55  ;;  %v3763_v61 = vpop.f32.mrb[39].mxu0 }
 0x147   : > { %v3764_v62 = vadd.f32 %v3763_v61, %v3762_v58  ;;  %v3875_v63 = vpop.f32.mrb[39].mxu1 }
 0x148   : > { %v1496_v0 = vadd.f32 %v3873_v59, %v3761_v56  ;;  %v3876_v1 = vadd.f32 %v3875_v63, %v3874_v60  ;;  %v4576_v59 = vld [vmem:[%s5339_s6 + $0x38] sm:$0xff]  }
 0x149   : > { %4119 = vmatprep.subr.bf16.mxu1 %v4576_v59 }
 0x14a   : > { %v1499_v2 = vadd.f32 %v3876_v1, %v3764_v62  ;;  %4120 = vmatpush3.bf16.msra.mxu1 %v4576_v59 }
 0x14b   : > { %v3765_v3 = vpop.f32.mrb[40].mxu0 }
 0x14c   : > { %v3877_v4 = vpop.f32.mrb[40].mxu1  ;;  %v3766_v5 = vpop.f32.mrb[41].mxu0  ;;  %v1658_v6 = vpack.c.bf16 %v1499_v2, %v1496_v0 }
 0x14d   : > { %v3767_v7 = vadd.f32 %v3766_v5, %v3765_v3  ;;  %v3878_v8 = vpop.f32.mrb[41].mxu1  ;;  %v3768_v9 = vpop.f32.mrb[42].mxu0 }
 0x14e   : > { %v3879_v10 = vadd.f32 %v3878_v8, %v3877_v4  ;;  %v3880_v11 = vpop.f32.mrb[42].mxu1  ;;  %4090 = vmatmul.mubr.bf16.gmra.mrb[80].mxu0 %v1658_v6  ;;  %v3769_v12 = vpop.f32.mrb[43].mxu0 }
 0x14f   : > { %v3770_v13 = vadd.f32 %v3769_v12, %v3768_v9  ;;  %v3881_v14 = vpop.f32.mrb[43].mxu1 }
 0x150   : > { %v1504_v15 = vadd.f32 %v3879_v10, %v3767_v7  ;;  %v3882_v16 = vadd.f32 %v3881_v14, %v3880_v11 }
 0x152   : > { %v1507_v17 = vadd.f32 %v3882_v16, %v3770_v13 }
 0x153   : > { %v3771_v18 = vpop.f32.mrb[44].mxu0 }
 0x154   : > { %v3883_v19 = vpop.f32.mrb[44].mxu1  ;;  %v3772_v20 = vpop.f32.mrb[45].mxu0  ;;  %v1659_v21 = vpack.c.bf16 %v1507_v17, %v1504_v15 }
 0x155   : > { %v3773_v22 = vadd.f32 %v3772_v20, %v3771_v18  ;;  %v3884_v23 = vpop.f32.mrb[45].mxu1  ;;  %v3774_v24 = vpop.f32.mrb[46].mxu0 }
 0x156   : > { %v3885_v25 = vadd.f32 %v3884_v23, %v3883_v19  ;;  %v3886_v26 = vpop.f32.mrb[46].mxu1  ;;  %4093 = vmatprep.mubr.bf16.mxu0 %v1659_v21  ;;  %v3775_v27 = vpop.f32.mrb[47].mxu0 }
 0x157   : > { %v3776_v28 = vadd.f32 %v3775_v27, %v3774_v24  ;;  %v3887_v29 = vpop.f32.mrb[47].mxu1 }
 0x158   : > { %v1512_v30 = vadd.f32 %v3885_v25, %v3773_v22  ;;  %v3888_v31 = vadd.f32 %v3887_v29, %v3886_v26 }
 0x15a   : > { %v1515_v32 = vadd.f32 %v3888_v31, %v3776_v28 }
 0x15b   : > { %v3777_v33 = vpop.f32.mrb[48].mxu0 }
 0x15c   : > { %v3889_v34 = vpop.f32.mrb[48].mxu1  ;;  %v3778_v35 = vpop.f32.mrb[49].mxu0  ;;  %v1660_v36 = vpack.c.bf16 %v1515_v32, %v1512_v30  ;;  %v4577_v32 = vld [vmem:[%s5338_s5] sm:$0xff]  }
 0x15d   : > { %v3779_v37 = vadd.f32 %v3778_v35, %v3777_v33  ;;  %v3890_v38 = vpop.f32.mrb[49].mxu1  ;;  %v3780_v39 = vpop.f32.mrb[50].mxu0  ;;  %4153 = vmatprep.subr.bf16.mxu1 %v4577_v32  ;;  %v4968_v33 = vld [vmem:[%s5337_s4] ss:$0 sm:$0xff] }
 0x15e   : > { %v3891_v40 = vadd.f32 %v3890_v38, %v3889_v34  ;;  %v3892_v41 = vpop.f32.mrb[50].mxu1  ;;  %4094 = vmatmul.mubr.bf16.gmra.mrb[84].mxu0 %v1660_v36  ;;  %v3781_v42 = vpop.f32.mrb[51].mxu0 }
 0x15f   : > { %v3782_v43 = vadd.f32 %v3781_v42, %v3780_v39  ;;  %v3893_v44 = vpop.f32.mrb[51].mxu1 }
 0x160   : > { %v1520_v45 = vadd.f32 %v3891_v40, %v3779_v37  ;;  %v3894_v46 = vadd.f32 %v3893_v44, %v3892_v41 }
 0x162   : > { %v1523_v47 = vadd.f32 %v3894_v46, %v3782_v43 }
 0x163   : > { %v3783_v49 = vpop.f32.mrb[52].mxu0 }
 0x164   : > { %v3895_v50 = vpop.f32.mrb[52].mxu1  ;;  %v3784_v51 = vpop.f32.mrb[53].mxu0  ;;  %v1661_v52 = vpack.c.bf16 %v1523_v47, %v1520_v45  ;;  %v4578_v47 = vld [vmem:[%s5338_s5 + $0x8] sm:$0xff]  }
 0x165   : > { %v3785_v53 = vadd.f32 %v3784_v51, %v3783_v49  ;;  %v3896_v54 = vpop.f32.mrb[53].mxu1  ;;  %v3786_v55 = vpop.f32.mrb[54].mxu0  ;;  %v4579_v49 = vld [vmem:[%s5338_s5 + $0x10] sm:$0xff]  }
 0x166   : > { %v3897_v56 = vadd.f32 %v3896_v54, %v3895_v50  ;;  %v3898_v57 = vpop.f32.mrb[54].mxu1  ;;  %4097 = vmatprep.mubr.bf16.mxu0 %v1661_v52  ;;  %v3787_v58 = vpop.f32.mrb[55].mxu0 }
 0x167   : > { %v3788_v60 = vadd.f32 %v3787_v58, %v3786_v55  ;;  %v3899_v61 = vpop.f32.mrb[55].mxu1 }
 0x168   : > { %v1528_v62 = vadd.f32 %v3897_v56, %v3785_v53  ;;  %v3900_v63 = vadd.f32 %v3899_v61, %v3898_v57  ;;  %v4580_v53 = vld [vmem:[%s5338_s5 + $0x18] sm:$0xff]   ;;  %v4581_v61 = vld [vmem:[%s5338_s5 + $0x20] sm:$0xff]  }
 0x16a   : > { %v1531_v0 = vadd.f32 %v3900_v63, %v3788_v60 }
 0x16b   : > { %v3789_v1 = vpop.f32.mrb[56].mxu0 }
 0x16c   : > { %v3901_v2 = vpop.f32.mrb[56].mxu1  ;;  %v3790_v3 = vpop.f32.mrb[57].mxu0  ;;  %v1662_v4 = vpack.c.bf16 %v1531_v0, %v1528_v62 }
 0x16d   : > { %v3791_v5 = vadd.f32 %v3790_v3, %v3789_v1  ;;  %v3902_v6 = vpop.f32.mrb[57].mxu1  ;;  %v3792_v7 = vpop.f32.mrb[58].mxu0  ;;  %v4583_v3 = vld [vmem:[%s5338_s5 + $0x30] sm:$0xff]  }
 0x16e   : > { %v3903_v8 = vadd.f32 %v3902_v6, %v3901_v2  ;;  %v3904_v9 = vpop.f32.mrb[58].mxu1  ;;  %4098 = vmatmul.mubr.bf16.gmra.mrb[88].mxu0 %v1662_v4  ;;  %v3793_v10 = vpop.f32.mrb[59].mxu0  ;;  %v4582_v2 = vld [vmem:[%s5338_s5 + $0x28] sm:$0xff]  }
 0x16f   : > { %v3794_v11 = vadd.f32 %v3793_v10, %v3792_v7  ;;  %v3905_v12 = vpop.f32.mrb[59].mxu1  ;;  %v4584_v7 = vld [vmem:[%s5338_s5 + $0x38] sm:$0xff]  }
 0x170   : > { %v1536_v13 = vadd.f32 %v3903_v8, %v3791_v5  ;;  %v3906_v14 = vadd.f32 %v3905_v12, %v3904_v9 }
 0x172   : > { %v1539_v15 = vadd.f32 %v3906_v14, %v3794_v11 }
 0x173   : > { %v3795_v16 = vpop.f32.mrb[60].mxu0 }
 0x174   : > { %v3907_v17 = vpop.f32.mrb[60].mxu1  ;;  %v3796_v18 = vpop.f32.mrb[61].mxu0  ;;  %v1663_v19 = vpack.c.bf16 %v1539_v15, %v1536_v13 }
 0x175   : > { %v3797_v20 = vadd.f32 %v3796_v18, %v3795_v16  ;;  %v3908_v21 = vpop.f32.mrb[61].mxu1  ;;  %v3798_v22 = vpop.f32.mrb[62].mxu0 }
 0x176   : > { %v3909_v23 = vadd.f32 %v3908_v21, %v3907_v17  ;;  %v3910_v24 = vpop.f32.mrb[62].mxu1  ;;  %4101 = vmatprep.mubr.bf16.mxu0 %v1663_v19  ;;  %v3799_v25 = vpop.f32.mrb[63].mxu0 }
 0x177   : > { %v3800_v26 = vadd.f32 %v3799_v25, %v3798_v22  ;;  %v3911_v27 = vpop.f32.mrb[63].mxu1 }
 0x178   : > { %v1544_v28 = vadd.f32 %v3909_v23, %v3797_v20  ;;  %v3912_v29 = vadd.f32 %v3911_v27, %v3910_v24 }
 0x17a   : > { %v1547_v30 = vadd.f32 %v3912_v29, %v3800_v26 }
 0x17c   : > { %v1664_v31 = vpack.c.bf16 %v1547_v30, %v1544_v28 }
 0x17e   : > { %4102 = vmatmul.mubr.bf16.gmra.mrb[92].mxu0 %v1664_v31 }
 0x1e1   : > { %v4075_v34 = vpop.f32.mrb[64].mxu0 }
 0x1e2   : > { %v1779_v35 = vadd.f32 %v4075_v34, %v4968_v33  ;;  %v1770_v36 = vpop.f32.mrb[65].mxu0  ;;  %v4601_v34 = vld [vmem:[%s5342_s9] sm:$0xff]  }
 0x1e3   : > { %v1771_v37 = vadd.f32 %v4968_v33, %v1770_v36  ;;  %v4076_v38 = vpop.f32.mrb[66].mxu0  ;;  %4201 = vmatprep.subr.bf16.mxu0 %v4601_v34  ;;  %v4603_v36 = vld [vmem:[%s5342_s9 + $0x10] sm:$0xff]  }
 0x1e4   : > { %v1782_v39 = vadd.f32 %v4076_v38, %v4968_v33  ;;  %v1773_v40 = vpop.f32.mrb[67].mxu0  ;;  %v1899_v42 = vmax.f32 %v1779_v35, 0.0  ;;  %v4602_v35 = vld [vmem:[%s5342_s9 + $0x8] sm:$0xff]   ;;  %4202 = vmatpush3.bf16.msra.mxu0 %v4601_v34  ;;  %v5045_v34 = vld [vmem:[%s4963_s15] sm:$0xff]  }
 0x1e5   : > { %v1774_v41 = vadd.f32 %v4968_v33, %v1773_v40  ;;  %v1897_v44 = vmax.f32 %v1771_v37, 0.0  ;;  %4203 = vmatprep.subr.bf16.mxu0 %v4602_v35 }
 0x1e6   : > { %v1900_v43 = vmax.f32 %v1782_v39, 0.0 }
 0x1e7   : > { %v1898_v45 = vmax.f32 %v1774_v41, 0.0 }
 0x1e8   : > { %v1978_v46 = vpack.c.bf16 %v1900_v43, %v1899_v42  ;;  %4204 = vmatpush3.bf16.msra.mxu0 %v4602_v35  ;;  %v5049_v35 = vld [vmem:[%s4963_s15 + $0x8] sm:$0xff]  }
 0x1e9   : > { %v1977_v48 = vpack.c.bf16 %v1898_v45, %v1897_v44  ;;  %4205 = vmatprep.subr.bf16.mxu0 %v4603_v36  ;;  %v4604_v44 = vld [vmem:[%s5342_s9 + $0x18] sm:$0xff]  }
 0x1eb   : > { %4121 = vmatprep.mubr.bf16.mxu1 %v1977_v48 }
 0x1ec   : > { %4122 = vmatmul.mubr.bf16.vlgmr.msra.gmra.mrb[64].mxu1 %v1978_v46  ;;  %4206 = vmatpush3.bf16.msra.mxu0 %v4603_v36  ;;  %v5057_v36 = vld [vmem:[%s4963_s15 + $0x18] sm:$0xff]  }
 0x1ed   : > { %4154 = vmatpush3.bf16.msra.mxu1 %v4577_v32  ;;  %4207 = vmatprep.subr.bf16.mxu0 %v4604_v44 }
 0x1ee   : > { %4155 = vmatprep.subr.bf16.mxu1 %v4578_v47 }
 0x1f0   : > { %4208 = vmatpush3.bf16.msra.mxu0 %v4604_v44  ;;  %v5089_v44 = vld [vmem:[%s4963_s15 + $0x58] sm:$0xff]  }
 0x1f1   : > { %v4079_v50 = vpop.f32.mrb[68].mxu0  ;;  %4156 = vmatpush3.bf16.msra.mxu1 %v4578_v47 }
 0x1f2   : > { %v1795_v51 = vadd.f32 %v4079_v50, %v4968_v33  ;;  %v1786_v52 = vpop.f32.mrb[69].mxu0  ;;  %4157 = vmatprep.subr.bf16.mxu1 %v4579_v49 }
 0x1f3   : > { %v1787_v54 = vadd.f32 %v4968_v33, %v1786_v52  ;;  %v4080_v55 = vpop.f32.mrb[70].mxu0 }
 0x1f4   : > { %v1798_v56 = vadd.f32 %v4080_v55, %v4968_v33  ;;  %v1789_v57 = vpop.f32.mrb[71].mxu0  ;;  %v1903_v59 = vmax.f32 %v1795_v51, 0.0  ;;  %v4605_v51 = vld [vmem:[%s5342_s9 + $0x20] sm:$0xff]  }
 0x1f5   : > { %v1790_v58 = vadd.f32 %v4968_v33, %v1789_v57  ;;  %4158 = vmatpush3.bf16.msra.mxu1 %v4579_v49  ;;  %v1901_v62 = vmax.f32 %v1787_v54, 0.0  ;;  %4209 = vmatprep.subr.bf16.mxu0 %v4605_v51  ;;  %v4607_v54 = vld [vmem:[%s5342_s9 + $0x30] sm:$0xff]  }
 0x1f6   : > { %v1904_v60 = vmax.f32 %v1798_v56, 0.0  ;;  %4159 = vmatprep.subr.bf16.mxu1 %v4580_v53  ;;  %4210 = vmatpush3.bf16.msra.mxu0 %v4605_v51  ;;  %v5117_v51 = vld [vmem:[%s5340_s7] ss:$0 sm:$0xff] }
 0x1f7   : > { %v1902_v63 = vmax.f32 %v1790_v58, 0.0 }
 0x1f8   : > { %v1980_v0 = vpack.c.bf16 %v1904_v60, %v1903_v59 }
 0x1f9   : > { %v1979_v1 = vpack.c.bf16 %v1902_v63, %v1901_v62  ;;  %4160 = vmatpush3.bf16.msra.mxu1 %v4580_v53  ;;  %v4606_v53 = vld [vmem:[%s5342_s9 + $0x28] sm:$0xff]  }
 0x1fa   : > { %4161 = vmatprep.subr.bf16.mxu1 %v4581_v61  ;;  %4211 = vmatprep.subr.bf16.mxu0 %v4606_v53 }
 0x1fb   : > { %4125 = vmatprep.mubr.bf16.mxu1 %v1979_v1  ;;  %4212 = vmatpush3.bf16.msra.mxu0 %v4606_v53 }
 0x1fc   : > { %4126 = vmatmul.mubr.bf16.gmra.mrb[68].mxu1 %v1980_v0  ;;  %4213 = vmatprep.subr.bf16.mxu0 %v4607_v54 }
 0x1fd   : > { %4162 = vmatpush3.bf16.msra.mxu1 %v4581_v61 }
 0x1fe   : > { %4163 = vmatprep.subr.bf16.mxu1 %v4582_v2 }
 0x1ff   : > { %4214 = vmatpush3.bf16.msra.mxu0 %v4607_v54 }
 0x201   : > { %v4083_v4 = vpop.f32.mrb[72].mxu0  ;;  %4164 = vmatpush3.bf16.msra.mxu1 %v4582_v2 }
 0x202   : > { %v1811_v5 = vadd.f32 %v4083_v4, %v4968_v33  ;;  %v1802_v6 = vpop.f32.mrb[73].mxu0  ;;  %4165 = vmatprep.subr.bf16.mxu1 %v4583_v3 }
 0x203   : > { %v1803_v8 = vadd.f32 %v4968_v33, %v1802_v6  ;;  %v4084_v9 = vpop.f32.mrb[74].mxu0 }
 0x204   : > { %v1814_v10 = vadd.f32 %v4084_v9, %v4968_v33  ;;  %v1805_v11 = vpop.f32.mrb[75].mxu0  ;;  %v1907_v13 = vmax.f32 %v1811_v5, 0.0 }
 0x205   : > { %v1806_v12 = vadd.f32 %v4968_v33, %v1805_v11  ;;  %4166 = vmatpush3.bf16.msra.mxu1 %v4583_v3  ;;  %v1905_v15 = vmax.f32 %v1803_v8, 0.0 }
 0x206   : > { %v1908_v14 = vmax.f32 %v1814_v10, 0.0  ;;  %4167 = vmatprep.subr.bf16.mxu1 %v4584_v7 }
 0x207   : > { %v1906_v16 = vmax.f32 %v1806_v12, 0.0 }
 0x208   : > { %v1982_v17 = vpack.c.bf16 %v1908_v14, %v1907_v13 }
 0x209   : > { %v1981_v18 = vpack.c.bf16 %v1906_v16, %v1905_v15  ;;  %4168 = vmatpush3.bf16.msra.mxu1 %v4584_v7 }
 0x20b   : > { %4129 = vmatprep.mubr.bf16.mxu1 %v1981_v18 }
 0x20c   : > { %4130 = vmatmul.mubr.bf16.gmra.mrb[72].mxu1 %v1982_v17 }
 0x211   : > { %v4087_v19 = vpop.f32.mrb[76].mxu0 }
 0x212   : > { %v1827_v20 = vadd.f32 %v4087_v19, %v4968_v33  ;;  %v1818_v21 = vpop.f32.mrb[77].mxu0 }
 0x213   : > { %v1819_v22 = vadd.f32 %v4968_v33, %v1818_v21  ;;  %v4088_v23 = vpop.f32.mrb[78].mxu0 }
 0x214   : > { %v1830_v24 = vadd.f32 %v4088_v23, %v4968_v33  ;;  %v1821_v25 = vpop.f32.mrb[79].mxu0  ;;  %v1911_v27 = vmax.f32 %v1827_v20, 0.0 }
 0x215   : > { %v1822_v26 = vadd.f32 %v4968_v33, %v1821_v25  ;;  %v1909_v29 = vmax.f32 %v1819_v22, 0.0 }
 0x216   : > { %v1912_v28 = vmax.f32 %v1830_v24, 0.0 }
 0x217   : > { %v1910_v30 = vmax.f32 %v1822_v26, 0.0 }
 0x218   : > { %v1984_v31 = vpack.c.bf16 %v1912_v28, %v1911_v27 }
 0x219   : > { %v1983_v32 = vpack.c.bf16 %v1910_v30, %v1909_v29 }
 0x21b   : > { %4133 = vmatprep.mubr.bf16.mxu1 %v1983_v32 }
 0x21c   : > { %4134 = vmatmul.mubr.bf16.gmra.mrb[76].mxu1 %v1984_v31 }
 0x221   : > { %v4091_v37 = vpop.f32.mrb[80].mxu0 }
 0x222   : > { %v1843_v38 = vadd.f32 %v4091_v37, %v4968_v33  ;;  %v1834_v39 = vpop.f32.mrb[81].mxu0  ;;  %v5060_v37 = vld [vmem:[%s4963_s15 + $0x20] sm:$0xff]  }
 0x223   : > { %v1835_v40 = vadd.f32 %v4968_v33, %v1834_v39  ;;  %v4092_v41 = vpop.f32.mrb[82].mxu0  ;;  %v5068_v39 = vld [vmem:[%s4963_s15 + $0x30] sm:$0xff]  }
 0x224   : > { %v1846_v42 = vadd.f32 %v4092_v41, %v4968_v33  ;;  %v1837_v43 = vpop.f32.mrb[83].mxu0  ;;  %v1915_v46 = vmax.f32 %v1843_v38, 0.0  ;;  %v5065_v38 = vld [vmem:[%s4963_s15 + $0x28] sm:$0xff]   ;;  %v5076_v41 = vld [vmem:[%s4963_s15 + $0x40] sm:$0xff]  }
 0x225   : > { %v1838_v45 = vadd.f32 %v4968_v33, %v1837_v43  ;;  %v1913_v48 = vmax.f32 %v1835_v40, 0.0  ;;  %v5073_v40 = vld [vmem:[%s4963_s15 + $0x38] sm:$0xff]   ;;  %v5084_v43 = vld [vmem:[%s4963_s15 + $0x50] sm:$0xff]  }
 0x226   : > { %v1916_v47 = vmax.f32 %v1846_v42, 0.0  ;;  %v5081_v42 = vld [vmem:[%s4963_s15 + $0x48] sm:$0xff]  }
 0x227   : > { %v1914_v49 = vmax.f32 %v1838_v45, 0.0  ;;  %v5092_v45 = vld [vmem:[%s4963_s15 + $0x60] sm:$0xff]  }
 0x228   : > { %v1986_v50 = vpack.c.bf16 %v1916_v47, %v1915_v46  ;;  %v5097_v46 = vld [vmem:[%s4963_s15 + $0x68] sm:$0xff]   ;;  %v5100_v47 = vld [vmem:[%s4963_s15 + $0x70] sm:$0xff]  }
 0x229   : > { %v1985_v52 = vpack.c.bf16 %v1914_v49, %v1913_v48  ;;  %v5105_v48 = vld [vmem:[%s4963_s15 + $0x78] sm:$0xff]  }
 0x22a   : > { %v4608_v49 = vld [vmem:[%s5342_s9 + $0x38] sm:$0xff]  }
 0x22b   : > { %4137 = vmatprep.mubr.bf16.mxu1 %v1985_v52  ;;  %4215 = vmatprep.subr.bf16.mxu0 %v4608_v49 }
 0x22c   : > { %4138 = vmatmul.mubr.bf16.gmra.mrb[80].mxu1 %v1986_v50  ;;  %4216 = vmatpush3.bf16.msra.mxu0 %v4608_v49  ;;  %v4609_v50 = vld [vmem:[%s5341_s8] sm:$0xff]  }
 0x22d   : > { %4249 = vmatprep.subr.bf16.mxu0 %v4609_v50 }
 0x231   : > { %v4095_v55 = vpop.f32.mrb[84].mxu0 }
 0x232   : > { %v1859_v56 = vadd.f32 %v4095_v55, %v4968_v33  ;;  %v1850_v57 = vpop.f32.mrb[85].mxu0 }
 0x233   : > { %v1851_v58 = vadd.f32 %v4968_v33, %v1850_v57  ;;  %v4096_v59 = vpop.f32.mrb[86].mxu0 }
 0x234   : > { %v1862_v60 = vadd.f32 %v4096_v59, %v4968_v33  ;;  %v1853_v61 = vpop.f32.mrb[87].mxu0  ;;  %v1919_v63 = vmax.f32 %v1859_v56, 0.0  ;;  %v4617_v59 = vld [vmem:[%s5344_s11] sm:$0xff]  }
 0x235   : > { %v1854_v62 = vadd.f32 %v4968_v33, %v1853_v61  ;;  %v1917_v1 = vmax.f32 %v1851_v58, 0.0  ;;  %4297 = vmatprep.subr.bf16.mxu1 %v4617_v59 }
 0x236   : > { %v1920_v0 = vmax.f32 %v1862_v60, 0.0  ;;  %v4618_v60 = vld [vmem:[%s5344_s11 + $0x8] sm:$0xff]  }
 0x237   : > { %v1918_v2 = vmax.f32 %v1854_v62, 0.0 }
 0x238   : > { %v1988_v3 = vpack.c.bf16 %v1920_v0, %v1919_v63 }
 0x239   : > { %v1987_v4 = vpack.c.bf16 %v1918_v2, %v1917_v1 }
 0x23b   : > { %4141 = vmatprep.mubr.bf16.mxu1 %v1987_v4 }
 0x23c   : > { %4142 = vmatmul.mubr.bf16.gmra.mrb[84].mxu1 %v1988_v3  ;;  %v4619_v3 = vld [vmem:[%s5344_s11 + $0x10] sm:$0xff]  }
 0x241   : > { %v4099_v5 = vpop.f32.mrb[88].mxu0 }
 0x242   : > { %v1875_v6 = vadd.f32 %v4099_v5, %v4968_v33  ;;  %v1866_v7 = vpop.f32.mrb[89].mxu0 }
 0x243   : > { %v1867_v8 = vadd.f32 %v4968_v33, %v1866_v7  ;;  %v4100_v9 = vpop.f32.mrb[90].mxu0 }
 0x244   : > { %v1878_v10 = vadd.f32 %v4100_v9, %v4968_v33  ;;  %v1869_v11 = vpop.f32.mrb[91].mxu0  ;;  %v1923_v13 = vmax.f32 %v1875_v6, 0.0 }
 0x245   : > { %v1870_v12 = vadd.f32 %v4968_v33, %v1869_v11  ;;  %v1921_v15 = vmax.f32 %v1867_v8, 0.0  ;;  %v4610_v8 = vld [vmem:[%s5341_s8 + $0x8] sm:$0xff]  }
 0x246   : > { %v1924_v14 = vmax.f32 %v1878_v10, 0.0 }
 0x247   : > { %v1922_v16 = vmax.f32 %v1870_v12, 0.0 }
 0x248   : > { %v1990_v17 = vpack.c.bf16 %v1924_v14, %v1923_v13  ;;  %v4620_v13 = vld [vmem:[%s5344_s11 + $0x18] sm:$0xff]  }
 0x249   : > { %v1989_v18 = vpack.c.bf16 %v1922_v16, %v1921_v15 }
 0x24b   : > { %4145 = vmatprep.mubr.bf16.mxu1 %v1989_v18 }
 0x24c   : > { %4146 = vmatmul.mubr.bf16.gmra.mrb[88].mxu1 %v1990_v17  ;;  %v4611_v17 = vld [vmem:[%s5341_s8 + $0x10] sm:$0xff]  }
 0x251   : > { %v4103_v19 = vpop.f32.mrb[92].mxu0 }
 0x252   : > { %v1891_v20 = vadd.f32 %v4103_v19, %v4968_v33  ;;  %v1882_v21 = vpop.f32.mrb[93].mxu0 }
 0x253   : > { %v1883_v22 = vadd.f32 %v4968_v33, %v1882_v21  ;;  %v4104_v23 = vpop.f32.mrb[94].mxu0  ;;  %v4621_v21 = vld [vmem:[%s5344_s11 + $0x20] sm:$0xff]  }
 0x254   : > { %v1894_v24 = vadd.f32 %v4104_v23, %v4968_v33  ;;  %v1885_v25 = vpop.f32.mrb[95].mxu0  ;;  %v1927_v27 = vmax.f32 %v1891_v20, 0.0 }
 0x255   : > { %v1886_v26 = vadd.f32 %v4968_v33, %v1885_v25  ;;  %v1925_v29 = vmax.f32 %v1883_v22, 0.0  ;;  %v5052_v33 = vld [vmem:[%s4963_s15 + $0x10] sm:$0xff]  }
 0x256   : > { %v1928_v28 = vmax.f32 %v1894_v24, 0.0 }
 0x257   : > { %v1926_v30 = vmax.f32 %v1886_v26, 0.0  ;;  %v4612_v26 = vld [vmem:[%s5341_s8 + $0x18] sm:$0xff]  }
 0x258   : > { %v1992_v31 = vpack.c.bf16 %v1928_v28, %v1927_v27 }
 0x259   : > { %v1991_v32 = vpack.c.bf16 %v1926_v30, %v1925_v29 }
 0x25b   : > { %4149 = vmatprep.mubr.bf16.mxu1 %v1991_v32 }
 0x25c   : > { %4150 = vmatmul.mubr.bf16.gmra.mrb[92].mxu1 %v1992_v31  ;;  %v4622_v31 = vld [vmem:[%s5344_s11 + $0x28] sm:$0xff]  }
 0x25d   : > { %4169 = vmatprep.mubr.bf16.mxu1 %v5045_v34 }
 0x264   : > { %4170 = vmatmul.mubr.bf16.vlgmr.msra.gmra.mrb[64].mxu1 %v5049_v35 }
 0x265   : > { %4173 = vmatprep.mubr.bf16.mxu1 %v5052_v33  ;;  %4298 = vmatpush3.bf16.msra.mxu1 %v4617_v59 }
 0x266   : > { %4299 = vmatprep.subr.bf16.mxu1 %v4618_v60 }
 0x269   : > { %4300 = vmatpush3.bf16.msra.mxu1 %v4618_v60 }
 0x26a   : > { %4301 = vmatprep.subr.bf16.mxu1 %v4619_v3 }
 0x26c   : > { %4174 = vmatmul.mubr.bf16.gmra.mrb[68].mxu1 %v5057_v36 }
 0x26d   : > { %4177 = vmatprep.mubr.bf16.mxu1 %v5060_v37  ;;  %4302 = vmatpush3.bf16.msra.mxu1 %v4619_v3 }
 0x26e   : > { %4303 = vmatprep.subr.bf16.mxu1 %v4620_v13 }
 0x271   : > { %4304 = vmatpush3.bf16.msra.mxu1 %v4620_v13  ;;  %v4616_v13 = vld [vmem:[%s5341_s8 + $0x38] sm:$0xff]  }
 0x272   : > { %4305 = vmatprep.subr.bf16.mxu1 %v4621_v21 }
 0x274   : > { %4178 = vmatmul.mubr.bf16.gmra.mrb[72].mxu1 %v5065_v38 }
 0x275   : > { %4181 = vmatprep.mubr.bf16.mxu1 %v5068_v39  ;;  %4306 = vmatpush3.bf16.msra.mxu1 %v4621_v21 }
 0x276   : > { %4307 = vmatprep.subr.bf16.mxu1 %v4622_v31 }
 0x279   : > { %4308 = vmatpush3.bf16.msra.mxu1 %v4622_v31 }
 0x27c   : > { %4182 = vmatmul.mubr.bf16.gmra.mrb[76].mxu1 %v5073_v40 }
 0x27d   : > { %4185 = vmatprep.mubr.bf16.mxu1 %v5076_v41 }
 0x284   : > { %4186 = vmatmul.mubr.bf16.gmra.mrb[80].mxu1 %v5081_v42 }
 0x285   : > { %4189 = vmatprep.mubr.bf16.mxu1 %v5084_v43 }
 0x28c   : > { %4190 = vmatmul.mubr.bf16.gmra.mrb[84].mxu1 %v5089_v44 }
 0x28d   : > { %4193 = vmatprep.mubr.bf16.mxu1 %v5092_v45 }
 0x294   : > { %4194 = vmatmul.mubr.bf16.gmra.mrb[88].mxu1 %v5097_v46 }
 0x295   : > { %4197 = vmatprep.mubr.bf16.mxu1 %v5100_v47 }
 0x29c   : > { %4198 = vmatmul.mubr.bf16.gmra.mrb[92].mxu1 %v5105_v48 }
 0x337   : > { %v4171_v52 = vpop.f32.mrb[64].mxu1 }
 0x338   : > { %v2532_v53 = vadd.f32 %v4171_v52, %v5117_v51  ;;  %v2396_v54 = vpop.f32.mrb[65].mxu1  ;;  %v4613_v52 = vld [vmem:[%s5341_s8 + $0x20] sm:$0xff]  }
 0x339   : > { %v2530_v55 = vadd.f32 %v5117_v51, %v2396_v54  ;;  %v4172_v56 = vpop.f32.mrb[66].mxu1 }
 0x33a   : > { %v2533_v57 = vadd.f32 %v4172_v56, %v5117_v51  ;;  %v2399_v58 = vpop.f32.mrb[67].mxu1  ;;  %v2564_v62 = vmax.f32 %v2532_v53, 0.0  ;;  %v4623_v56 = vld [vmem:[%s5344_s11 + $0x30] sm:$0xff]  }
 0x33b   : > { %v2531_v61 = vadd.f32 %v5117_v51, %v2399_v58  ;;  %v2562_v0 = vmax.f32 %v2530_v55, 0.0  ;;  %4309 = vmatprep.subr.bf16.mxu1 %v4623_v56 }
 0x33c   : > { %v2565_v63 = vmax.f32 %v2533_v57, 0.0  ;;  %4310 = vmatpush3.bf16.msra.mxu1 %v4623_v56 }
 0x33d   : > { %v2563_v1 = vmax.f32 %v2531_v61, 0.0  ;;  %v4614_v61 = vld [vmem:[%s5341_s8 + $0x28] sm:$0xff]  }
 0x33e   : > { %v2611_v2 = vpack.c.bf16 %v2565_v63, %v2564_v62 }
 0x33f   : > { %v2610_v4 = vpack.c.bf16 %v2563_v1, %v2562_v0  ;;  %v4175_v5 = vpop.f32.mrb[68].mxu1 }
 0x340   : > { %v2536_v6 = vadd.f32 %v4175_v5, %v5117_v51  ;;  %v2412_v7 = vpop.f32.mrb[69].mxu1  ;;  %v4615_v5 = vld [vmem:[%s5341_s8 + $0x30] sm:$0xff]  }
 0x341   : > { %v2534_v9 = vadd.f32 %v5117_v51, %v2412_v7  ;;  %v4176_v10 = vpop.f32.mrb[70].mxu1  ;;  %4217 = vmatprep.mubr.bf16.mxu0 %v2610_v4 }
 0x342   : > { %v2537_v11 = vadd.f32 %v4176_v10, %v5117_v51  ;;  %v2415_v12 = vpop.f32.mrb[71].mxu1  ;;  %4218 = vmatmul.mubr.bf16.vlgmr.msra.gmra.mrb[96].mxu0 %v2611_v2  ;;  %v2568_v15 = vmax.f32 %v2536_v6, 0.0 }
 0x343   : > { %v2535_v14 = vadd.f32 %v5117_v51, %v2415_v12  ;;  %4250 = vmatpush3.bf16.msra.mxu0 %v4609_v50  ;;  %v2566_v18 = vmax.f32 %v2534_v9, 0.0 }
 0x344   : > { %v2569_v16 = vmax.f32 %v2537_v11, 0.0  ;;  %4251 = vmatprep.subr.bf16.mxu0 %v4610_v8 }
 0x345   : > { %v2567_v19 = vmax.f32 %v2535_v14, 0.0 }
 0x346   : > { %v2613_v20 = vpack.c.bf16 %v2569_v16, %v2568_v15 }
 0x347   : > { %v2612_v22 = vpack.c.bf16 %v2567_v19, %v2566_v18  ;;  %v4179_v23 = vpop.f32.mrb[72].mxu1  ;;  %4252 = vmatpush3.bf16.msra.mxu0 %v4610_v8 }
 0x348   : > { %v2540_v24 = vadd.f32 %v4179_v23, %v5117_v51  ;;  %v2428_v25 = vpop.f32.mrb[73].mxu1  ;;  %4253 = vmatprep.subr.bf16.mxu0 %v4611_v17 }
 0x349   : > { %v2538_v27 = vadd.f32 %v5117_v51, %v2428_v25  ;;  %v4180_v28 = vpop.f32.mrb[74].mxu1  ;;  %4221 = vmatprep.mubr.bf16.mxu0 %v2612_v22 }
 0x34a   : > { %v2541_v29 = vadd.f32 %v4180_v28, %v5117_v51  ;;  %v2431_v30 = vpop.f32.mrb[75].mxu1  ;;  %4222 = vmatmul.mubr.bf16.gmra.mrb[100].mxu0 %v2613_v20  ;;  %v2572_v49 = vmax.f32 %v2540_v24, 0.0 }
 0x34b   : > { %v2539_v32 = vadd.f32 %v5117_v51, %v2431_v30  ;;  %4254 = vmatpush3.bf16.msra.mxu0 %v4611_v17  ;;  %v2570_v53 = vmax.f32 %v2538_v27, 0.0 }
 0x34c   : > { %v2573_v50 = vmax.f32 %v2541_v29, 0.0  ;;  %4255 = vmatprep.subr.bf16.mxu0 %v4612_v26 }
 0x34d   : > { %v2571_v54 = vmax.f32 %v2539_v32, 0.0 }
 0x34e   : > { %v2615_v55 = vpack.c.bf16 %v2573_v50, %v2572_v49 }
 0x34f   : > { %v2614_v57 = vpack.c.bf16 %v2571_v54, %v2570_v53  ;;  %v4183_v58 = vpop.f32.mrb[76].mxu1  ;;  %4256 = vmatpush3.bf16.msra.mxu0 %v4612_v26 }
 0x350   : > { %v2544_v59 = vadd.f32 %v4183_v58, %v5117_v51  ;;  %v2444_v60 = vpop.f32.mrb[77].mxu1  ;;  %4257 = vmatprep.subr.bf16.mxu0 %v4613_v52 }
 0x351   : > { %v2542_v62 = vadd.f32 %v5117_v51, %v2444_v60  ;;  %v4184_v63 = vpop.f32.mrb[78].mxu1  ;;  %4225 = vmatprep.mubr.bf16.mxu0 %v2614_v57 }
 0x352   : > { %v2545_v0 = vadd.f32 %v4184_v63, %v5117_v51  ;;  %v2447_v1 = vpop.f32.mrb[79].mxu1  ;;  %4226 = vmatmul.mubr.bf16.gmra.mrb[104].mxu0 %v2615_v55  ;;  %v2576_v3 = vmax.f32 %v2544_v59, 0.0 }
 0x353   : > { %v2543_v2 = vadd.f32 %v5117_v51, %v2447_v1  ;;  %4258 = vmatpush3.bf16.msra.mxu0 %v4613_v52  ;;  %v2574_v6 = vmax.f32 %v2542_v62, 0.0 }
 0x354   : > { %v2577_v4 = vmax.f32 %v2545_v0, 0.0  ;;  %4259 = vmatprep.subr.bf16.mxu0 %v4614_v61 }
 0x355   : > { %v2575_v7 = vmax.f32 %v2543_v2, 0.0 }
 0x356   : > { %v2617_v8 = vpack.c.bf16 %v2577_v4, %v2576_v3 }
 0x357   : > { %v2616_v9 = vpack.c.bf16 %v2575_v7, %v2574_v6  ;;  %v4187_v10 = vpop.f32.mrb[80].mxu1  ;;  %4260 = vmatpush3.bf16.msra.mxu0 %v4614_v61 }
 0x358   : > { %v2548_v11 = vadd.f32 %v4187_v10, %v5117_v51  ;;  %v2460_v12 = vpop.f32.mrb[81].mxu1  ;;  %4261 = vmatprep.subr.bf16.mxu0 %v4615_v5 }
 0x359   : > { %v2546_v14 = vadd.f32 %v5117_v51, %v2460_v12  ;;  %v4188_v15 = vpop.f32.mrb[82].mxu1  ;;  %4229 = vmatprep.mubr.bf16.mxu0 %v2616_v9 }
 0x35a   : > { %v2549_v16 = vadd.f32 %v4188_v15, %v5117_v51  ;;  %v2463_v17 = vpop.f32.mrb[83].mxu1  ;;  %4230 = vmatmul.mubr.bf16.gmra.mrb[108].mxu0 %v2617_v8  ;;  %v2580_v19 = vmax.f32 %v2548_v11, 0.0 }
 0x35b   : > { %v2547_v18 = vadd.f32 %v5117_v51, %v2463_v17  ;;  %4262 = vmatpush3.bf16.msra.mxu0 %v4615_v5  ;;  %v2578_v21 = vmax.f32 %v2546_v14, 0.0 }
 0x35c   : > { %v2581_v20 = vmax.f32 %v2549_v16, 0.0  ;;  %4263 = vmatprep.subr.bf16.mxu0 %v4616_v13 }
 0x35d   : > { %v2579_v22 = vmax.f32 %v2547_v18, 0.0 }
 0x35e   : > { %v2619_v23 = vpack.c.bf16 %v2581_v20, %v2580_v19 }
 0x35f   : > { %v2618_v24 = vpack.c.bf16 %v2579_v22, %v2578_v21  ;;  %v4191_v25 = vpop.f32.mrb[84].mxu1  ;;  %4264 = vmatpush3.bf16.msra.mxu0 %v4616_v13 }
 0x360   : > { %v2552_v26 = vadd.f32 %v4191_v25, %v5117_v51  ;;  %v2476_v27 = vpop.f32.mrb[85].mxu1 }
 0x361   : > { %v2550_v28 = vadd.f32 %v5117_v51, %v2476_v27  ;;  %v4192_v29 = vpop.f32.mrb[86].mxu1  ;;  %4233 = vmatprep.mubr.bf16.mxu0 %v2618_v24 }
 0x362   : > { %v2553_v30 = vadd.f32 %v4192_v29, %v5117_v51  ;;  %v2479_v31 = vpop.f32.mrb[87].mxu1  ;;  %4234 = vmatmul.mubr.bf16.gmra.mrb[112].mxu0 %v2619_v23  ;;  %v2584_v49 = vmax.f32 %v2552_v26, 0.0 }
 0x363   : > { %v2551_v32 = vadd.f32 %v5117_v51, %v2479_v31  ;;  %v2582_v52 = vmax.f32 %v2550_v28, 0.0 }
 0x364   : > { %v2585_v50 = vmax.f32 %v2553_v30, 0.0 }
 0x365   : > { %v2583_v53 = vmax.f32 %v2551_v32, 0.0 }
 0x366   : > { %v2621_v54 = vpack.c.bf16 %v2585_v50, %v2584_v49 }
 0x367   : > { %v2620_v55 = vpack.c.bf16 %v2583_v53, %v2582_v52  ;;  %v4195_v56 = vpop.f32.mrb[88].mxu1 }
 0x368   : > { %v2556_v57 = vadd.f32 %v4195_v56, %v5117_v51  ;;  %v2492_v58 = vpop.f32.mrb[89].mxu1 }
 0x369   : > { %v2554_v59 = vadd.f32 %v5117_v51, %v2492_v58  ;;  %v4196_v60 = vpop.f32.mrb[90].mxu1  ;;  %4237 = vmatprep.mubr.bf16.mxu0 %v2620_v55 }
 0x36a   : > { %v2557_v61 = vadd.f32 %v4196_v60, %v5117_v51  ;;  %v2495_v62 = vpop.f32.mrb[91].mxu1  ;;  %4238 = vmatmul.mubr.bf16.gmra.mrb[116].mxu0 %v2621_v54  ;;  %v2588_v0 = vmax.f32 %v2556_v57, 0.0 }
 0x36b   : > { %v2555_v63 = vadd.f32 %v5117_v51, %v2495_v62  ;;  %v2586_v2 = vmax.f32 %v2554_v59, 0.0 }
 0x36c   : > { %v2589_v1 = vmax.f32 %v2557_v61, 0.0 }
 0x36d   : > { %v2587_v3 = vmax.f32 %v2555_v63, 0.0 }
 0x36e   : > { %v2623_v4 = vpack.c.bf16 %v2589_v1, %v2588_v0 }
 0x36f   : > { %v2622_v5 = vpack.c.bf16 %v2587_v3, %v2586_v2  ;;  %v4199_v6 = vpop.f32.mrb[92].mxu1 }
 0x370   : > { %v2560_v7 = vadd.f32 %v4199_v6, %v5117_v51  ;;  %v2508_v8 = vpop.f32.mrb[93].mxu1 }
 0x371   : > { %v2558_v9 = vadd.f32 %v5117_v51, %v2508_v8  ;;  %v4200_v10 = vpop.f32.mrb[94].mxu1  ;;  %4241 = vmatprep.mubr.bf16.mxu0 %v2622_v5 }
 0x372   : > { %v2561_v11 = vadd.f32 %v4200_v10, %v5117_v51  ;;  %v2511_v12 = vpop.f32.mrb[95].mxu1  ;;  %4242 = vmatmul.mubr.bf16.gmra.mrb[120].mxu0 %v2623_v4  ;;  %v2592_v14 = vmax.f32 %v2560_v7, 0.0 }
 0x373   : > { %v2559_v13 = vadd.f32 %v5117_v51, %v2511_v12  ;;  %v2590_v16 = vmax.f32 %v2558_v9, 0.0 }
 0x374   : > { %v2593_v15 = vmax.f32 %v2561_v11, 0.0 }
 0x375   : > { %v2591_v17 = vmax.f32 %v2559_v13, 0.0 }
 0x376   : > { %v2625_v18 = vpack.c.bf16 %v2593_v15, %v2592_v14 }
 0x377   : > { %v2624_v19 = vpack.c.bf16 %v2591_v17, %v2590_v16 }
 0x379   : > { %4245 = vmatprep.mubr.bf16.mxu0 %v2624_v19 }
 0x37a   : > { %4246 = vmatmul.mubr.bf16.gmra.mrb[124].mxu0 %v2625_v18 }
 0x37b   : > { %4265 = vmatprep.mubr.bf16.mxu0 %v5045_v34  ;;  %v4624_v34 = vld [vmem:[%s5344_s11 + $0x38] sm:$0xff]  }
 0x37c   : > { %4311 = vmatprep.subr.bf16.mxu1 %v4624_v34 }
 0x37d   : > { %4312 = vmatpush3.bf16.msra.mxu1 %v4624_v34 }
 0x382   : > { %4266 = vmatmul.mubr.bf16.vlgmr.msra.gmra.mrb[96].mxu0 %v5049_v35  ;;  %v5215_v35 = vld [vmem:[%s5343_s10] ss:$0 sm:$0xff] }
 0x383   : > { %4269 = vmatprep.mubr.bf16.mxu0 %v5052_v33 }
 0x38a   : > { %4270 = vmatmul.mubr.bf16.gmra.mrb[100].mxu0 %v5057_v36 }
 0x38b   : > { %4273 = vmatprep.mubr.bf16.mxu0 %v5060_v37 }
 0x392   : > { %4274 = vmatmul.mubr.bf16.gmra.mrb[104].mxu0 %v5065_v38 }
 0x393   : > { %4277 = vmatprep.mubr.bf16.mxu0 %v5068_v39 }
 0x39a   : > { %4278 = vmatmul.mubr.bf16.gmra.mrb[108].mxu0 %v5073_v40 }
 0x39b   : > { %4281 = vmatprep.mubr.bf16.mxu0 %v5076_v41 }
 0x3a2   : > { %4282 = vmatmul.mubr.bf16.gmra.mrb[112].mxu0 %v5081_v42 }
 0x3a3   : > { %4285 = vmatprep.mubr.bf16.mxu0 %v5084_v43 }
 0x3aa   : > { %4286 = vmatmul.mubr.bf16.gmra.mrb[116].mxu0 %v5089_v44 }
 0x3ab   : > { %4289 = vmatprep.mubr.bf16.mxu0 %v5092_v45 }
 0x3b2   : > { %4290 = vmatmul.mubr.bf16.gmra.mrb[120].mxu0 %v5097_v46 }
 0x3b3   : > { %4293 = vmatprep.mubr.bf16.mxu0 %v5100_v47 }
 0x3ba   : > { %4294 = vmatmul.mubr.bf16.gmra.mrb[124].mxu0 %v5105_v48 }
 0x455   : > { %v4267_v33 = vpop.f32.mrb[96].mxu0 }
 0x456   : > { %v3069_v36 = vadd.f32 %v4267_v33, %v5215_v35  ;;  %v2933_v37 = vpop.f32.mrb[97].mxu0 }
 0x457   : > { %v3067_v38 = vadd.f32 %v5215_v35, %v2933_v37  ;;  %v4268_v39 = vpop.f32.mrb[98].mxu0 }
 0x458   : > { %v3070_v40 = vadd.f32 %v4268_v39, %v5215_v35  ;;  %v2936_v41 = vpop.f32.mrb[99].mxu0  ;;  %v3101_v43 = vmax.f32 %v3069_v36, 0.0 }
 0x459   : > { %v3068_v42 = vadd.f32 %v5215_v35, %v2936_v41  ;;  %v3099_v45 = vmax.f32 %v3067_v38, 0.0 }
 0x45a   : > { %v3102_v44 = vmax.f32 %v3070_v40, 0.0 }
 0x45b   : > { %v3100_v46 = vmax.f32 %v3068_v42, 0.0 }
 0x45c   : > { %v3132_v47 = vpack.c.bf16 %v3102_v44, %v3101_v43 }
 0x45d   : > { %v3131_v48 = vpack.c.bf16 %v3100_v46, %v3099_v45  ;;  %v4271_v51 = vpop.f32.mrb[100].mxu0 }
 0x45e   : > { %v3073_v20 = vadd.f32 %v4271_v51, %v5215_v35  ;;  %v2949_v21 = vpop.f32.mrb[101].mxu0 }
 0x45f   : > { %v3071_v22 = vadd.f32 %v5215_v35, %v2949_v21  ;;  %v4272_v23 = vpop.f32.mrb[102].mxu0  ;;  %4313 = vmatprep.mubr.bf16.mxu1 %v3131_v48 }
 0x460   : > { %v3074_v24 = vadd.f32 %v4272_v23, %v5215_v35  ;;  %v2952_v25 = vpop.f32.mrb[103].mxu0  ;;  %4314 = vmatmul.mubr.bf16.vlgmr.msra.gmra.mrb[96].mxu1 %v3132_v47  ;;  %v3105_v27 = vmax.f32 %v3073_v20, 0.0 }
 0x461   : > { %v3072_v26 = vadd.f32 %v5215_v35, %v2952_v25  ;;  %v3103_v29 = vmax.f32 %v3071_v22, 0.0 }
 0x462   : > { %v3106_v28 = vmax.f32 %v3074_v24, 0.0 }
 0x463   : > { %v3104_v30 = vmax.f32 %v3072_v26, 0.0 }
 0x464   : > { %v3134_v31 = vpack.c.bf16 %v3106_v28, %v3105_v27 }
 0x465   : > { %v3133_v32 = vpack.c.bf16 %v3104_v30, %v3103_v29  ;;  %v4275_v49 = vpop.f32.mrb[104].mxu0 }
 0x466   : > { %v3077_v50 = vadd.f32 %v4275_v49, %v5215_v35  ;;  %v2965_v52 = vpop.f32.mrb[105].mxu0 }
 0x467   : > { %v3075_v53 = vadd.f32 %v5215_v35, %v2965_v52  ;;  %v4276_v54 = vpop.f32.mrb[106].mxu0  ;;  %4317 = vmatprep.mubr.bf16.mxu1 %v3133_v32 }
 0x468   : > { %v3078_v55 = vadd.f32 %v4276_v54, %v5215_v35  ;;  %v2968_v56 = vpop.f32.mrb[107].mxu0  ;;  %4318 = vmatmul.mubr.bf16.gmra.mrb[100].mxu1 %v3134_v31  ;;  %v3109_v58 = vmax.f32 %v3077_v50, 0.0 }
 0x469   : > { %v3076_v57 = vadd.f32 %v5215_v35, %v2968_v56  ;;  %v3107_v60 = vmax.f32 %v3075_v53, 0.0 }
 0x46a   : > { %v3110_v59 = vmax.f32 %v3078_v55, 0.0 }
 0x46b   : > { %v3108_v61 = vmax.f32 %v3076_v57, 0.0 }
 0x46c   : > { %v3136_v62 = vpack.c.bf16 %v3110_v59, %v3109_v58 }
 0x46d   : > { %v3135_v63 = vpack.c.bf16 %v3108_v61, %v3107_v60  ;;  %v4279_v0 = vpop.f32.mrb[108].mxu0 }
 0x46e   : > { %v3081_v1 = vadd.f32 %v4279_v0, %v5215_v35  ;;  %v2981_v2 = vpop.f32.mrb[109].mxu0 }
 0x46f   : > { %v3079_v3 = vadd.f32 %v5215_v35, %v2981_v2  ;;  %v4280_v4 = vpop.f32.mrb[110].mxu0  ;;  %4321 = vmatprep.mubr.bf16.mxu1 %v3135_v63 }
 0x470   : > { %v3082_v5 = vadd.f32 %v4280_v4, %v5215_v35  ;;  %v2984_v6 = vpop.f32.mrb[111].mxu0  ;;  %4322 = vmatmul.mubr.bf16.gmra.mrb[104].mxu1 %v3136_v62  ;;  %v3113_v8 = vmax.f32 %v3081_v1, 0.0 }
 0x471   : > { %v3080_v7 = vadd.f32 %v5215_v35, %v2984_v6  ;;  %v3111_v10 = vmax.f32 %v3079_v3, 0.0 }
 0x472   : > { %v3114_v9 = vmax.f32 %v3082_v5, 0.0 }
 0x473   : > { %v3112_v11 = vmax.f32 %v3080_v7, 0.0  ;;  %v5253_v7 = vld [vmem:[%s5345_s12] ss:$0 sm:$0xff] }
 0x474   : > { %v3138_v12 = vpack.c.bf16 %v3114_v9, %v3113_v8 }
 0x475   : > { %v3137_v13 = vpack.c.bf16 %v3112_v11, %v3111_v10  ;;  %v4283_v14 = vpop.f32.mrb[112].mxu0 }
 0x476   : > { %v3085_v15 = vadd.f32 %v4283_v14, %v5215_v35  ;;  %v2997_v16 = vpop.f32.mrb[113].mxu0 }
 0x477   : > { %v3083_v17 = vadd.f32 %v5215_v35, %v2997_v16  ;;  %v4284_v18 = vpop.f32.mrb[114].mxu0  ;;  %4325 = vmatprep.mubr.bf16.mxu1 %v3137_v13 }
 0x478   : > { %v3086_v19 = vadd.f32 %v4284_v18, %v5215_v35  ;;  %v3000_v34 = vpop.f32.mrb[115].mxu0  ;;  %4326 = vmatmul.mubr.bf16.gmra.mrb[108].mxu1 %v3138_v12  ;;  %v3117_v36 = vmax.f32 %v3085_v15, 0.0 }
 0x479   : > { %v3084_v33 = vadd.f32 %v5215_v35, %v3000_v34  ;;  %v3115_v38 = vmax.f32 %v3083_v17, 0.0 }
 0x47a   : > { %v3118_v37 = vmax.f32 %v3086_v19, 0.0 }
 0x47b   : > { %v3116_v39 = vmax.f32 %v3084_v33, 0.0 }
 0x47c   : > { %v3140_v40 = vpack.c.bf16 %v3118_v37, %v3117_v36 }
 0x47d   : > { %v3139_v41 = vpack.c.bf16 %v3116_v39, %v3115_v38  ;;  %v4287_v42 = vpop.f32.mrb[116].mxu0 }
 0x47e   : > { %v3089_v43 = vadd.f32 %v4287_v42, %v5215_v35  ;;  %v3013_v44 = vpop.f32.mrb[117].mxu0 }
 0x47f   : > { %v3087_v45 = vadd.f32 %v5215_v35, %v3013_v44  ;;  %v4288_v46 = vpop.f32.mrb[118].mxu0  ;;  %4329 = vmatprep.mubr.bf16.mxu1 %v3139_v41 }
 0x480   : > { %v3090_v47 = vadd.f32 %v4288_v46, %v5215_v35  ;;  %v3016_v48 = vpop.f32.mrb[119].mxu0  ;;  %4330 = vmatmul.mubr.bf16.gmra.mrb[112].mxu1 %v3140_v40  ;;  %v3121_v20 = vmax.f32 %v3089_v43, 0.0 }
 0x481   : > { %v3088_v51 = vadd.f32 %v5215_v35, %v3016_v48  ;;  %v3119_v22 = vmax.f32 %v3087_v45, 0.0 }
 0x482   : > { %v3122_v21 = vmax.f32 %v3090_v47, 0.0 }
 0x483   : > { %v3120_v23 = vmax.f32 %v3088_v51, 0.0 }
 0x484   : > { %v3142_v24 = vpack.c.bf16 %v3122_v21, %v3121_v20 }
 0x485   : > { %v3141_v25 = vpack.c.bf16 %v3120_v23, %v3119_v22  ;;  %v4291_v26 = vpop.f32.mrb[120].mxu0 }
 0x486   : > { %v3093_v27 = vadd.f32 %v4291_v26, %v5215_v35  ;;  %v3029_v28 = vpop.f32.mrb[121].mxu0 }
 0x487   : > { %v3091_v29 = vadd.f32 %v5215_v35, %v3029_v28  ;;  %v4292_v30 = vpop.f32.mrb[122].mxu0  ;;  %4333 = vmatprep.mubr.bf16.mxu1 %v3141_v25 }
 0x488   : > { %v3094_v31 = vadd.f32 %v4292_v30, %v5215_v35  ;;  %v3032_v32 = vpop.f32.mrb[123].mxu0  ;;  %4334 = vmatmul.mubr.bf16.gmra.mrb[116].mxu1 %v3142_v24  ;;  %v3125_v50 = vmax.f32 %v3093_v27, 0.0 }
 0x489   : > { %v3092_v49 = vadd.f32 %v5215_v35, %v3032_v32  ;;  %v3123_v53 = vmax.f32 %v3091_v29, 0.0 }
 0x48a   : > { %v3126_v52 = vmax.f32 %v3094_v31, 0.0 }
 0x48b   : > { %v3124_v54 = vmax.f32 %v3092_v49, 0.0 }
 0x48c   : > { %v3144_v55 = vpack.c.bf16 %v3126_v52, %v3125_v50 }
 0x48d   : > { %v3143_v56 = vpack.c.bf16 %v3124_v54, %v3123_v53  ;;  %v4295_v57 = vpop.f32.mrb[124].mxu0 }
 0x48e   : > { %v3097_v58 = vadd.f32 %v4295_v57, %v5215_v35  ;;  %v3045_v59 = vpop.f32.mrb[125].mxu0 }
 0x48f   : > { %v3095_v60 = vadd.f32 %v5215_v35, %v3045_v59  ;;  %v4296_v61 = vpop.f32.mrb[126].mxu0  ;;  %4337 = vmatprep.mubr.bf16.mxu1 %v3143_v56 }
 0x490   : > { %v3098_v62 = vadd.f32 %v4296_v61, %v5215_v35  ;;  %v3048_v63 = vpop.f32.mrb[127].mxu0  ;;  %4338 = vmatmul.mubr.bf16.gmra.mrb[120].mxu1 %v3144_v55  ;;  %v3129_v1 = vmax.f32 %v3097_v58, 0.0 }
 0x491   : > { %v3096_v0 = vadd.f32 %v5215_v35, %v3048_v63  ;;  %v3127_v3 = vmax.f32 %v3095_v60, 0.0 }
 0x492   : > { %v3130_v2 = vmax.f32 %v3098_v62, 0.0 }
 0x493   : > { %v3128_v4 = vmax.f32 %v3096_v0, 0.0 }
 0x494   : > { %v3146_v5 = vpack.c.bf16 %v3130_v2, %v3129_v1 }
 0x495   : > { %v3145_v6 = vpack.c.bf16 %v3128_v4, %v3127_v3 }
 0x497   : > { %4341 = vmatprep.mubr.bf16.mxu1 %v3145_v6 }
 0x498   : > { %4342 = vmatmul.mubr.bf16.gmra.mrb[124].mxu1 %v3146_v5 }
 0x533   : > { %v4315_v35 = vpop.f32.mrb[96].mxu1 }
 0x534   : > { %v3261_v8 = vadd.f32 %v4315_v35, %v5253_v7  ;;  %v3252_v9 = vpop.f32.mrb[97].mxu1 }
 0x535   : > { %v3253_v10 = vadd.f32 %v5253_v7, %v3252_v9  ;;  %v4316_v11 = vpop.f32.mrb[98].mxu1 }
 0x536   : > { %3381 = vst [vmem:[%s5258_s30 + $0x10] sm:$0xff] %v3261_v8  ;;  %v3264_v12 = vadd.f32 %v4316_v11, %v5253_v7  ;;  %v3255_v13 = vpop.f32.mrb[99].mxu1 }
 0x537   : > { %3379 = vst [vmem:[%s5258_s30] sm:$0xff] %v3253_v10  ;;  %v3256_v14 = vadd.f32 %v5253_v7, %v3255_v13 }
 0x538   : > { %3382 = vst [vmem:[%s5258_s30 + $0x18] sm:$0xff] %v3264_v12 }
 0x539   : > { %3380 = vst [vmem:[%s5258_s30 + $0x8] sm:$0xff] %v3256_v14 }
 0x53b   : > { %v4319_v15 = vpop.f32.mrb[100].mxu1 }
 0x53c   : > { %v3277_v16 = vadd.f32 %v4319_v15, %v5253_v7  ;;  %v3268_v17 = vpop.f32.mrb[101].mxu1 }
 0x53d   : > { %v3269_v18 = vadd.f32 %v5253_v7, %v3268_v17  ;;  %v4320_v19 = vpop.f32.mrb[102].mxu1 }
 0x53e   : > { %3385 = vst [vmem:[%s5258_s30 + $0x30] sm:$0xff] %v3277_v16  ;;  %v3280_v34 = vadd.f32 %v4320_v19, %v5253_v7  ;;  %v3271_v33 = vpop.f32.mrb[103].mxu1 }
 0x53f   : > { %3383 = vst [vmem:[%s5258_s30 + $0x20] sm:$0xff] %v3269_v18  ;;  %v3272_v36 = vadd.f32 %v5253_v7, %v3271_v33 }
 0x540   : > { %3386 = vst [vmem:[%s5258_s30 + $0x38] sm:$0xff] %v3280_v34 }
 0x541   : > { %3384 = vst [vmem:[%s5258_s30 + $0x28] sm:$0xff] %v3272_v36 }
 0x543   : > { %v4323_v37 = vpop.f32.mrb[104].mxu1 }
 0x544   : > { %v3293_v38 = vadd.f32 %v4323_v37, %v5253_v7  ;;  %v3284_v39 = vpop.f32.mrb[105].mxu1 }
 0x545   : > { %v3285_v40 = vadd.f32 %v5253_v7, %v3284_v39  ;;  %v4324_v41 = vpop.f32.mrb[106].mxu1 }
 0x546   : > { %3389 = vst [vmem:[%s5258_s30 + $0x50] sm:$0xff] %v3293_v38  ;;  %v3296_v42 = vadd.f32 %v4324_v41, %v5253_v7  ;;  %v3287_v43 = vpop.f32.mrb[107].mxu1 }
 0x547   : > { %3387 = vst [vmem:[%s5258_s30 + $0x40] sm:$0xff] %v3285_v40  ;;  %v3288_v44 = vadd.f32 %v5253_v7, %v3287_v43 }
 0x548   : > { %3390 = vst [vmem:[%s5258_s30 + $0x58] sm:$0xff] %v3296_v42 }
 0x549   : > { %3388 = vst [vmem:[%s5258_s30 + $0x48] sm:$0xff] %v3288_v44 }
 0x54b   : > { %v4327_v45 = vpop.f32.mrb[108].mxu1 }
 0x54c   : > { %v3309_v46 = vadd.f32 %v4327_v45, %v5253_v7  ;;  %v3300_v47 = vpop.f32.mrb[109].mxu1 }
 0x54d   : > { %v3301_v48 = vadd.f32 %v5253_v7, %v3300_v47  ;;  %v4328_v51 = vpop.f32.mrb[110].mxu1 }
 0x54e   : > { %3393 = vst [vmem:[%s5258_s30 + $0x70] sm:$0xff] %v3309_v46  ;;  %v3312_v20 = vadd.f32 %v4328_v51, %v5253_v7  ;;  %v3303_v21 = vpop.f32.mrb[111].mxu1 }
 0x54f   : > { %3391 = vst [vmem:[%s5258_s30 + $0x60] sm:$0xff] %v3301_v48  ;;  %v3304_v22 = vadd.f32 %v5253_v7, %v3303_v21 }
 0x550   : > { %3394 = vst [vmem:[%s5258_s30 + $0x78] sm:$0xff] %v3312_v20 }
 0x551   : > { %3392 = vst [vmem:[%s5258_s30 + $0x68] sm:$0xff] %v3304_v22 }
 0x553   : > { %v4331_v23 = vpop.f32.mrb[112].mxu1 }
 0x554   : > { %v3325_v24 = vadd.f32 %v4331_v23, %v5253_v7  ;;  %v3316_v25 = vpop.f32.mrb[113].mxu1 }
 0x555   : > { %v3317_v26 = vadd.f32 %v5253_v7, %v3316_v25  ;;  %v4332_v27 = vpop.f32.mrb[114].mxu1 }
 0x556   : > { %3397 = vst [vmem:[%s5258_s30 + $0x90] sm:$0xff] %v3325_v24  ;;  %v3328_v28 = vadd.f32 %v4332_v27, %v5253_v7  ;;  %v3319_v29 = vpop.f32.mrb[115].mxu1 }
 0x557   : > { %3395 = vst [vmem:[%s5258_s30 + $0x80] sm:$0xff] %v3317_v26  ;;  %v3320_v30 = vadd.f32 %v5253_v7, %v3319_v29 }
 0x558   : > { %3398 = vst [vmem:[%s5258_s30 + $0x98] sm:$0xff] %v3328_v28 }
 0x559   : > { %3396 = vst [vmem:[%s5258_s30 + $0x88] sm:$0xff] %v3320_v30 }
 0x55b   : > { %v4335_v31 = vpop.f32.mrb[116].mxu1 }
 0x55c   : > { %v3341_v32 = vadd.f32 %v4335_v31, %v5253_v7  ;;  %v3332_v49 = vpop.f32.mrb[117].mxu1 }
 0x55d   : > { %v3333_v50 = vadd.f32 %v5253_v7, %v3332_v49  ;;  %v4336_v52 = vpop.f32.mrb[118].mxu1 }
 0x55e   : > { %3401 = vst [vmem:[%s5258_s30 + $0xb0] sm:$0xff] %v3341_v32  ;;  %v3344_v53 = vadd.f32 %v4336_v52, %v5253_v7  ;;  %v3335_v54 = vpop.f32.mrb[119].mxu1 }
 0x55f   : > { %3399 = vst [vmem:[%s5258_s30 + $0xa0] sm:$0xff] %v3333_v50  ;;  %v3336_v55 = vadd.f32 %v5253_v7, %v3335_v54 }
 0x560   : > { %3402 = vst [vmem:[%s5258_s30 + $0xb8] sm:$0xff] %v3344_v53 }
 0x561   : > { %3400 = vst [vmem:[%s5258_s30 + $0xa8] sm:$0xff] %v3336_v55 }
 0x563   : > { %v4339_v56 = vpop.f32.mrb[120].mxu1 }
 0x564   : > { %v3357_v57 = vadd.f32 %v4339_v56, %v5253_v7  ;;  %v3348_v58 = vpop.f32.mrb[121].mxu1 }
 0x565   : > { %v3349_v59 = vadd.f32 %v5253_v7, %v3348_v58  ;;  %v4340_v60 = vpop.f32.mrb[122].mxu1 }
 0x566   : > { %3405 = vst [vmem:[%s5258_s30 + $0xd0] sm:$0xff] %v3357_v57  ;;  %v3360_v61 = vadd.f32 %v4340_v60, %v5253_v7  ;;  %v3351_v62 = vpop.f32.mrb[123].mxu1 }
 0x567   : > { %3403 = vst [vmem:[%s5258_s30 + $0xc0] sm:$0xff] %v3349_v59  ;;  %v3352_v63 = vadd.f32 %v5253_v7, %v3351_v62 }
 0x568   : > { %3406 = vst [vmem:[%s5258_s30 + $0xd8] sm:$0xff] %v3360_v61 }
 0x569   : > { %3404 = vst [vmem:[%s5258_s30 + $0xc8] sm:$0xff] %v3352_v63 }
 0x56b   : > { %v4343_v0 = vpop.f32.mrb[124].mxu1 }
 0x56c   : > { %v3373_v1 = vadd.f32 %v4343_v0, %v5253_v7  ;;  %v3364_v2 = vpop.f32.mrb[125].mxu1 }
 0x56d   : > { %v3365_v3 = vadd.f32 %v5253_v7, %v3364_v2  ;;  %v4344_v4 = vpop.f32.mrb[126].mxu1 }
 0x56e   : > { %3409 = vst [vmem:[%s5258_s30 + $0xf0] sm:$0xff] %v3373_v1  ;;  %v3376_v5 = vadd.f32 %v4344_v4, %v5253_v7  ;;  %v3367_v6 = vpop.f32.mrb[127].mxu1 }
 0x56f   : > { %3407 = vst [vmem:[%s5258_s30 + $0xe0] sm:$0xff] %v3365_v3  ;;  %v3368_v35 = vadd.f32 %v5253_v7, %v3367_v6 }
 0x570   : > { %3410 = vst [vmem:[%s5258_s30 + $0xf8] sm:$0xff] %v3376_v5 }
 0x571   : > { %3408 = vst [vmem:[%s5258_s30 + $0xe8] sm:$0xff] %v3368_v35 }
 0x572 PF: > { %s23_s27 = sadd.s32 1, %s4647_s27   ;;  %s5347_s25 = smov %s4643_s26 }
 0x573   : > { %p20_p5 = scmp.ge.s32.totalorder %s23_s27, 4   ;;  %s5348_s26 = smov %s5350_s28 }
 0x575   :  { %22 = sbr.rel (!%p20_p5) target bundleno = 2 (0x2), region = 116 }

</bundles_post_ra>
